<compile_context>
chip_gen: v7x
topology: tpu7x:2x2x1
jax: 0.10.0
libtpu: 0.0.40
codegen_flags: <defaults>
</compile_context>

<pallas_src>
import functools

import jax
import jax.numpy as jnp
from jax.experimental import pallas as pl
from jax.experimental.pallas import tpu as pltpu

C_PAD = 128  # padded channel width (one vreg lane row)


# ----------------------------------------------------------------------------
# Pallas kernels
# ----------------------------------------------------------------------------
def _gemm_kernel(x_ref, w_ref, b_ref, o_ref, *, relu):
    """(patches_bf16 @ W_bf16) -> f32 acc, + folded bias, optional ReLU."""
    acc = jnp.dot(x_ref[...], w_ref[...], preferred_element_type=jnp.float32)
    acc = acc + b_ref[...]                      # (TM, TN) + (1, TN), f32 epilogue
    if relu:
        acc = jnp.maximum(acc, 0.0)
    o_ref[...] = acc.astype(o_ref.dtype)


def _gemm_res_kernel(x_ref, w_ref, b_ref, r_ref, o_ref, *, relu):
    """Same as _gemm_kernel, plus a fused residual add after the ReLU."""
    acc = jnp.dot(x_ref[...], w_ref[...], preferred_element_type=jnp.float32)
    acc = acc + b_ref[...]
    if relu:
        acc = jnp.maximum(acc, 0.0)
    acc = acc + r_ref[...]                      # residual (downsample branch)
    o_ref[...] = acc.astype(o_ref.dtype)


def _mlp_kernel(x_ref, w1_ref, b1_ref, w2_ref, b2_ref, w3_ref, b3_ref, o_ref):
    """Fused classifier: (Linear+BN+ReLU) x2 + final Linear, all VMEM-resident."""
    h = jnp.dot(x_ref[...], w1_ref[...], preferred_element_type=jnp.float32)
    h = jnp.maximum(h + b1_ref[...], 0.0)
    h = jnp.dot(h.astype(jnp.bfloat16), w2_ref[...],
                preferred_element_type=jnp.float32)
    h = jnp.maximum(h + b2_ref[...], 0.0)
    o = jnp.dot(h.astype(jnp.bfloat16), w3_ref[...],
                preferred_element_type=jnp.float32)
    o_ref[...] = o + b3_ref[...]


# ----------------------------------------------------------------------------
# Pallas wrappers
# ----------------------------------------------------------------------------
def _pick_tm(m):
    """Largest tile that divides m AND gives >=2 grid steps (megacore)."""
    for t in (128, 64, 32, 16, 8):
        if m % t == 0 and m // t >= 2:
            return t
    return m  # full dimension (single block)


def _pick_tn(n):
    """Keep output blocks lane-dense: only split N in multiples of 128."""
    if n % 128 == 0 and n // 128 >= 2:
        return 128
    return n


def fused_gemm(x, w, b, *, relu=True, residual=None):
    """x:(M,K) bf16, w:(K,N) bf16, b:(1,N) f32, residual:(M,N) f32 -> (M,N) f32."""
    M, K = x.shape
    Kw, N = w.shape
    assert K == Kw and b.shape == (1, N)
    TM, TN = _pick_tm(M), _pick_tn(N)
    grid = (M // TM, N // TN)

    in_specs = [
        pl.BlockSpec((TM, K), lambda i, j: (i, 0)),
        pl.BlockSpec((K, TN), lambda i, j: (0, j)),
        pl.BlockSpec((1, TN), lambda i, j: (0, j)),
    ]
    args = [x.astype(jnp.bfloat16), w, b]
    if residual is not None:
        assert residual.shape == (M, N)
        in_specs.append(pl.BlockSpec((TM, TN), lambda i, j: (i, j)))
        args.append(residual.astype(jnp.float32))
        kernel = functools.partial(_gemm_res_kernel, relu=relu)
    else:
        kernel = functools.partial(_gemm_kernel, relu=relu)

    return pl.pallas_call(
        kernel,
        out_shape=jax.ShapeDtypeStruct((M, N), jnp.float32),
        grid=grid,
        in_specs=in_specs,
        out_specs=pl.BlockSpec((TM, TN), lambda i, j: (i, j)),
        compiler_params=pltpu.CompilerParams(
            dimension_semantics=("parallel", "parallel")),
    )(*args)


def fused_mlp(x, fc):
    """Classifier tail in a single Pallas kernel (weights trivially VMEM-resident)."""
    B, D = x.shape
    H1 = fc["w1"].shape[1]
    H2 = fc["w2"].shape[1]
    NO = fc["w3"].shape[1]
    return pl.pallas_call(
        _mlp_kernel,
        out_shape=jax.ShapeDtypeStruct((B, NO), jnp.float32),
        grid=(1,),
        in_specs=[
            pl.BlockSpec((B, D), lambda i: (0, 0)),
            pl.BlockSpec((D, H1), lambda i: (0, 0)),
            pl.BlockSpec((1, H1), lambda i: (0, 0)),
            pl.BlockSpec((H1, H2), lambda i: (0, 0)),
            pl.BlockSpec((1, H2), lambda i: (0, 0)),
            pl.BlockSpec((H2, NO), lambda i: (0, 0)),
            pl.BlockSpec((1, NO), lambda i: (0, 0)),
        ],
        out_specs=pl.BlockSpec((B, NO), lambda i: (0, 0)),
    )(x.astype(jnp.bfloat16), fc["w1"], fc["b1"], fc["w2"], fc["b2"],
      fc["w3"], fc["b3"])


# ----------------------------------------------------------------------------
# XLA-side glue: im2col, maxpool (fused by XLA under jit)
# ----------------------------------------------------------------------------
def _im2col(x, k, stride, pad):
    """NHWC x -> (N*Ho*Wo, k*k*C) bf16 patches, ordered (kh, kw, c)."""
    # TODO(synk): at realistic batch/resolution, build patches in-kernel from a
    # VMEM-resident activation block to avoid the k*k x HBM traffic.
    N, H, W, C = x.shape
    xp = jnp.pad(x, ((0, 0), (pad, pad), (pad, pad), (0, 0)))
    Ho = (H + 2 * pad - k) // stride + 1
    Wo = (W + 2 * pad - k) // stride + 1
    cols = []
    for dh in range(k):
        for dw in range(k):
            cols.append(
                xp[:, dh: dh + stride * (Ho - 1) + 1: stride,
                      dw: dw + stride * (Wo - 1) + 1: stride, :])
    patches = jnp.stack(cols, axis=-2)          # (N, Ho, Wo, k*k, C)
    return patches.reshape(N * Ho * Wo, k * k * C).astype(jnp.bfloat16), (N, Ho, Wo)


def maxpool_3x3_s2_p1(x):
    """NHWC max-pool k3 s2 p1 as a jnp.maximum tree (XLA fuses the 9 views)."""
    N, H, W, C = x.shape
    Ho = (H + 2 - 3) // 2 + 1
    Wo = (W + 2 - 3) // 2 + 1
    xp = jnp.pad(x, ((0, 0), (1, 1), (1, 1), (0, 0)), constant_values=-jnp.inf)
    out = None
    for dh in range(3):
        for dw in range(3):
            s = xp[:, dh: dh + 2 * Ho - 1: 2, dw: dw + 2 * Wo - 1: 2, :]
            out = s if out is None else jnp.maximum(out, s)
    return out


# ----------------------------------------------------------------------------
# Parameter preparation: BN folding, 1x1->3x3 embedding, channel padding, bf16
# ----------------------------------------------------------------------------
def _bn_fold(bn, eps=1e-5):
    scale = bn["gamma"] / jnp.sqrt(bn["var"] + eps)
    shift = bn["beta"] - bn["mean"] * scale
    return scale, shift


def _fold_conv(w, b, bn, cin_pad, cout_pad):
    """Fold BN into (k,k,cin,cout) weights, pad cin/cout with zeros."""
    if bn is not None:
        scale, shift = _bn_fold(bn)
        w = w * scale
        b = b * scale + shift
    cin, cout = w.shape[2], w.shape[3]
    w = jnp.pad(w, ((0, 0), (0, 0), (0, cin_pad - cin), (0, cout_pad - cout)))
    b = jnp.pad(b, ((0, cout_pad - cout),))
    return w, b


def _embed_1x1_as_3x3(w):
    """(1,1,cin,cout) -> (3,3,cin,cout) with the 1x1 kernel at the center."""
    return jnp.pad(w, ((1, 1), (1, 1), (0, 0), (0, 0)))


def prepare_params(p):
    """One-time host-side prep: fold, pad, pack, cast to bf16."""
    prep = {}

    # master: 7x7 conv, cin=1 (real), cout 16 -> padded 128, no BN.
    wm, bm = _fold_conv(p["master"]["w"], p["master"]["b"], None, 1, C_PAD)
    prep["master_w"] = wm.reshape(7 * 7 * 1, C_PAD).astype(jnp.bfloat16)
    prep["master_b"] = bm.reshape(1, C_PAD).astype(jnp.float32)

    def block(ca, bn_a, ds, bn_ds, cb, bn_b):
        # main-path first conv (3x3) folded + padded to (3,3,128,128)
        wa, ba = _fold_conv(p[ca]["w"], p[ca]["b"], p[bn_a], C_PAD, C_PAD)
        # downsample 1x1 embedded as 3x3 (identical result with pad=1), folded
        wd = _embed_1x1_as_3x3(p[ds]["w"])
        wd, bd = _fold_conv(wd, p[ds]["b"], p[bn_ds], C_PAD, C_PAD)
        # concatenate along N -> one 256-wide GEMM sharing the same patches
        w_cat = jnp.concatenate([wa, wd], axis=3)
        b_cat = jnp.concatenate([ba, bd])
        # second conv (3x3), folded + padded
        wb, bb = _fold_conv(p[cb]["w"], p[cb]["b"], p[bn_b], C_PAD, C_PAD)
        return {
            "wa_cat": w_cat.reshape(9 * C_PAD, 2 * C_PAD).astype(jnp.bfloat16),
            "ba_cat": b_cat.reshape(1, 2 * C_PAD).astype(jnp.float32),
            "wb": wb.reshape(9 * C_PAD, C_PAD).astype(jnp.bfloat16),
            "bb": bb.reshape(1, C_PAD).astype(jnp.float32),
        }

    prep["blk1"] = block("b1c1", "bn_b1c1", "ds1", "bn_ds1", "b1c2", "bn_b1c2")
    prep["blk2"] = block("b2c1", "bn_b2c1", "ds2", "bn_ds2", "b2c2", "bn_b2c2")
    prep["blk3"] = block("b3c1", "bn_b3c1", "ds3", "bn_ds3", "b3c2", "bn_b3c2")

    # classifier: fold BN1d into fc1/fc2, pad fc3 output 10 -> 128 (lane-dense).
    def fold_lin(lin, bn):
        w, b = lin["w"], lin["b"]
        if bn is not None:
            scale, shift = _bn_fold(bn)
            w = w * scale
            b = b * scale + shift
        return w, b

    w1, b1 = fold_lin(p["fc1"], p["bn_fc1"])
    w2, b2 = fold_lin(p["fc2"], p["bn_fc2"])
    w3, b3 = fold_lin(p["fc3"], None)
    w3 = jnp.pad(w3, ((0, 0), (0, C_PAD - 10)))
    b3 = jnp.pad(b3, ((0, C_PAD - 10),))
    prep["fc"] = {
        "w1": w1.astype(jnp.bfloat16), "b1": b1.reshape(1, -1).astype(jnp.float32),
        "w2": w2.astype(jnp.bfloat16), "b2": b2.reshape(1, -1).astype(jnp.float32),
        "w3": w3.astype(jnp.bfloat16), "b3": b3.reshape(1, -1).astype(jnp.float32),
    }
    return prep


# ----------------------------------------------------------------------------
# Raw parameters (deterministic synthetic init, matching module shapes)
# ----------------------------------------------------------------------------
def init_params(key):
    keys = iter(jax.random.split(key, 32))

    def conv_p(k, cin, cout, xavier=False):
        kw, kb = jax.random.split(next(keys))
        fan_in = k * k * cin
        fan_out = k * k * cout
        std = (2.0 / (fan_in + fan_out)) ** 0.5 if xavier else (1.0 / fan_in) ** 0.5
        w = std * jax.random.normal(kw, (k, k, cin, cout), jnp.float32)
        b = 0.01 * jax.random.normal(kb, (cout,), jnp.float32)
        return {"w": w, "b": b}

    def bn_p(c):
        return {
            "gamma": jnp.ones((c,), jnp.float32),
            "beta": jnp.zeros((c,), jnp.float32),
            "mean": jnp.zeros((c,), jnp.float32),
            "var": jnp.ones((c,), jnp.float32),
        }

    def lin_p(cin, cout):
        kw, kb = jax.random.split(next(keys))
        std = (1.0 / cin) ** 0.5
        w = std * jax.random.normal(kw, (cin, cout), jnp.float32)
        b = 0.01 * jax.random.normal(kb, (cout,), jnp.float32)
        return {"w": w, "b": b}

    return {
        "master": conv_p(7, 1, 16, xavier=True),
        "b1c1": conv_p(3, 16, 16), "bn_b1c1": bn_p(16),
        "b1c2": conv_p(3, 16, 32), "bn_b1c2": bn_p(32),
        "b2c1": conv_p(3, 32, 32), "bn_b2c1": bn_p(32),
        "b2c2": conv_p(3, 32, 64), "bn_b2c2": bn_p(64),
        "b3c1": conv_p(3, 64, 64), "bn_b3c1": bn_p(64),
        "b3c2": conv_p(3, 64, 128), "bn_b3c2": bn_p(128),
        "ds1": conv_p(1, 16, 32), "bn_ds1": bn_p(32),
        "ds2": conv_p(1, 32, 64), "bn_ds2": bn_p(64),
        "ds3": conv_p(1, 64, 128), "bn_ds3": bn_p(128),
        "fc1": lin_p(128, 256), "bn_fc1": bn_p(256),
        "fc2": lin_p(256, 256), "bn_fc2": bn_p(256),
        "fc3": lin_p(256, 10),
    }


# ----------------------------------------------------------------------------
# Forward pass (inference semantics: BN running stats, dropout = identity)
# ----------------------------------------------------------------------------
def forward(prep, x_nchw):
    x = jnp.transpose(x_nchw, (0, 2, 3, 1)).astype(jnp.float32)   # NHWC

    # Input standardization (matches PyTorch reference: per-(N,C) spatial mean,
    # single global RMS sigma over the whole batch).
    mu = jnp.mean(x, axis=(1, 2), keepdims=True)                  # (N,1,1,C)
    sigma = jnp.sqrt(jnp.mean((x - mu) ** 2)) + 1e-8               # scalar
    x = (x - mu) / (4.0 * sigma)

    # master: conv7x7 s2 p3 (+ReLU) -> maxpool3 s2 p1. Channels padded to 128.
    patches, (N, Ho, Wo) = _im2col(x, 7, 2, 3)
    res = fused_gemm(patches, prep["master_w"], prep["master_b"], relu=True)
    res = maxpool_3x3_s2_p1(res.reshape(N, Ho, Wo, C_PAD))

    # residual blocks: [conv3x3 || downsample1x1] fused GEMM -> conv3x3 GEMM
    # with fused residual add -> maxpool.
    for blk in ("blk1", "blk2", "blk3"):
        bp = prep[blk]
        patches, (N, Ho, Wo) = _im2col(res, 3, 1, 1)
        out_a = fused_gemm(patches, bp["wa_cat"], bp["ba_cat"], relu=True)  # (M,256)
        h = out_a[:, :C_PAD].reshape(N, Ho, Wo, C_PAD)      # main-path activation
        d = out_a[:, C_PAD:]                                 # downsample branch
        patches2, _ = _im2col(h, 3, 1, 1)
        s = fused_gemm(patches2, bp["wb"], bp["bb"], relu=True, residual=d)
        res = maxpool_3x3_s2_p1(s.reshape(N, Ho, Wo, C_PAD))

    # global average pool -> fused classifier.
    feat = jnp.mean(res, axis=(1, 2))                        # (B, 128), all real
    # TODO(synk): Dropout(p=0.5) and BatchNorm batch-statistics are training-mode
    # stochastic/stateful ops; implemented here with inference semantics.
    logits = fused_mlp(feat, prep["fc"])[:, :10]             # drop N-padding
    return logits


forward_jit = jax.jit(forward)


# ----------------------------------------------------------------------------
if __name__ == "__main__":
    key = jax.random.PRNGKey(0)
    pkey, xkey = jax.random.split(key)
    params = init_params(pkey)
    prep = prepare_params(params)
    # PyTorch input convention: NCHW, single channel.
    x = jax.random.normal(xkey, (2, 1, 32, 32), jnp.float32)

    logits = forward_jit(prep, x)
    jax.block_until_ready(logits)
    assert logits.shape == (2, 10), logits.shape
    assert bool(jnp.all(jnp.isfinite(logits)))
    print("KERNEL_OK")
</pallas_src>

<mosaic_0001>
module attributes {stable_mosaic.version = 11 : i64} {
  func.func @_gemm_kernel(%arg0: i32, %arg1: i32, %arg2: memref<128x49xbf16, #tpu.memory_space<vmem>>, %arg3: memref<49x128xbf16, #tpu.memory_space<vmem>>, %arg4: memref<1x128xf32, #tpu.memory_space<vmem>>, %arg5: memref<128x128xf32, #tpu.memory_space<vmem>>) attributes {dimension_semantics = [#tpu.dimension_semantics<parallel>, #tpu.dimension_semantics<parallel>], iteration_bounds = array<i64: 4, 1>, scalar_prefetch = 0 : i64, scratch_operands = 0 : i64, tpu.core_type = #tpu.core_type<tc>, window_params = [{transform_indices = @transform_0, window_bounds = array<i64: 128, 49>}, {transform_indices = @transform_1, window_bounds = array<i64: 49, 128>}, {transform_indices = @transform_2, window_bounds = array<i64: 1, 128>}, {transform_indices = @transform_3, window_bounds = array<i64: 128, 128>}]} {
    %c0 = arith.constant 0 : index
    %c0_0 = arith.constant 0 : index
    %0 = vector.load %arg2[%c0, %c0_0] : memref<128x49xbf16, #tpu.memory_space<vmem>>, vector<128x49xbf16>
    %c0_1 = arith.constant 0 : index
    %c0_2 = arith.constant 0 : index
    %1 = vector.load %arg3[%c0_1, %c0_2] : memref<49x128xbf16, #tpu.memory_space<vmem>>, vector<49x128xbf16>
    %cst = arith.constant dense<0.000000e+00> : vector<128x128xf32>
    %2 = tpu.matmul %0, %1, %cst {dimension_numbers = #tpu.dot_dimension_numbers<[1], [0], [0], [1], [0, 0, 1, 1], [], []>} : vector<128x49xbf16>, vector<49x128xbf16>, vector<128x128xf32> -> vector<128x128xf32>
    %c0_3 = arith.constant 0 : index
    %c0_4 = arith.constant 0 : index
    %3 = vector.load %arg4[%c0_3, %c0_4] : memref<1x128xf32, #tpu.memory_space<vmem>>, vector<1x128xf32>
    %4 = vector.broadcast %3 : vector<1x128xf32> to vector<128x128xf32>
    %5 = arith.addf %2, %4 : vector<128x128xf32>
    %cst_5 = arith.constant 0.000000e+00 : f32
    %6 = vector.broadcast %cst_5 : f32 to vector<128x128xf32>
    %7 = arith.maximumf %5, %6 : vector<128x128xf32>
    %c0_6 = arith.constant 0 : index
    %c0_7 = arith.constant 0 : index
    %8 = vector.load %arg5[%c0_6, %c0_7] : memref<128x128xf32, #tpu.memory_space<vmem>>, vector<128x128xf32>
    tpu.vector_store %arg5[%c0_6, %c0_7], %7 {strides = array<i32>} : memref<128x128xf32, #tpu.memory_space<vmem>>, vector<128x128xf32>,
    return
  }
  func.func @transform_0(%arg0: i32, %arg1: i32) -> (i32, i32) {
    %c0_i32 = arith.constant 0 : i32
    %c0_i32_0 = arith.constant 0 : i32
    return %arg0, %c0_i32 : i32, i32
  }
  func.func @transform_1(%arg0: i32, %arg1: i32) -> (i32, i32) {
    %c0_i32 = arith.constant 0 : i32
    %c0_i32_0 = arith.constant 0 : i32
    return %c0_i32, %arg1 : i32, i32
  }
  func.func @transform_2(%arg0: i32, %arg1: i32) -> (i32, i32) {
    %c0_i32 = arith.constant 0 : i32
    %c0_i32_0 = arith.constant 0 : i32
    return %c0_i32, %arg1 : i32, i32
  }
  func.func @transform_3(%arg0: i32, %arg1: i32) -> (i32, i32) {
    %c0_i32 = arith.constant 0 : i32
    return %arg0, %arg1 : i32, i32
  }
}

module attributes {stable_mosaic.version = 11 : i64} {
  func.func @_gemm_res_kernel(%arg0: i32, %arg1: i32, %arg2: memref<64x1152xbf16, #tpu.memory_space<vmem>>, %arg3: memref<1152x128xbf16, #tpu.memory_space<vmem>>, %arg4: memref<1x128xf32, #tpu.memory_space<vmem>>, %arg5: memref<64x128xf32, #tpu.memory_space<vmem>>, %arg6: memref<64x128xf32, #tpu.memory_space<vmem>>) attributes {dimension_semantics = [#tpu.dimension_semantics<parallel>, #tpu.dimension_semantics<parallel>], iteration_bounds = array<i64: 2, 1>, scalar_prefetch = 0 : i64, scratch_operands = 0 : i64, tpu.core_type = #tpu.core_type<tc>, window_params = [{transform_indices = @transform_0, window_bounds = array<i64: 64, 1152>}, {transform_indices = @transform_1, window_bounds = array<i64: 1152, 128>}, {transform_indices = @transform_2, window_bounds = array<i64: 1, 128>}, {transform_indices = @transform_3, window_bounds = array<i64: 64, 128>}, {transform_indices = @transform_4, window_bounds = array<i64: 64, 128>}]} {
    %c0 = arith.constant 0 : index
    %c0_0 = arith.constant 0 : index
    %0 = vector.load %arg2[%c0, %c0_0] : memref<64x1152xbf16, #tpu.memory_space<vmem>>, vector<64x1152xbf16>
    %c0_1 = arith.constant 0 : index
    %c0_2 = arith.constant 0 : index
    %1 = vector.load %arg3[%c0_1, %c0_2] : memref<1152x128xbf16, #tpu.memory_space<vmem>>, vector<1152x128xbf16>
    %cst = arith.constant dense<0.000000e+00> : vector<64x128xf32>
    %2 = tpu.matmul %0, %1, %cst {dimension_numbers = #tpu.dot_dimension_numbers<[1], [0], [0], [1], [0, 0, 1, 1], [], []>} : vector<64x1152xbf16>, vector<1152x128xbf16>, vector<64x128xf32> -> vector<64x128xf32>
    %c0_3 = arith.constant 0 : index
    %c0_4 = arith.constant 0 : index
    %3 = vector.load %arg4[%c0_3, %c0_4] : memref<1x128xf32, #tpu.memory_space<vmem>>, vector<1x128xf32>
    %4 = vector.broadcast %3 : vector<1x128xf32> to vector<64x128xf32>
    %5 = arith.addf %2, %4 : vector<64x128xf32>
    %cst_5 = arith.constant 0.000000e+00 : f32
    %6 = vector.broadcast %cst_5 : f32 to vector<64x128xf32>
    %7 = arith.maximumf %5, %6 : vector<64x128xf32>
    %c0_6 = arith.constant 0 : index
    %c0_7 = arith.constant 0 : index
    %8 = vector.load %arg5[%c0_6, %c0_7] : memref<64x128xf32, #tpu.memory_space<vmem>>, vector<64x128xf32>
    %9 = arith.addf %7, %8 : vector<64x128xf32>
    %c0_8 = arith.constant 0 : index
    %c0_9 = arith.constant 0 : index
    %10 = vector.load %arg6[%c0_8, %c0_9] : memref<64x128xf32, #tpu.memory_space<vmem>>, vector<64x128xf32>
    tpu.vector_store %arg6[%c0_8, %c0_9], %9 {strides = array<i32>} : memref<64x128xf32, #tpu.memory_space<vmem>>, vector<64x128xf32>,
    return
  }
  func.func @transform_0(%arg0: i32, %arg1: i32) -> (i32, i32) {
    %c0_i32 = arith.constant 0 : i32
    %c0_i32_0 = arith.constant 0 : i32
    return %arg0, %c0_i32 : i32, i32
  }
  func.func @transform_1(%arg0: i32, %arg1: i32) -> (i32, i32) {
    %c0_i32 = arith.constant 0 : i32
    %c0_i32_0 = arith.constant 0 : i32
    return %c0_i32, %arg1 : i32, i32
  }
  func.func @transform_2(%arg0: i32, %arg1: i32) -> (i32, i32) {
    %c0_i32 = arith.constant 0 : i32
    %c0_i32_0 = arith.constant 0 : i32
    return %c0_i32, %arg1 : i32, i32
  }
  func.func @transform_3(%arg0: i32, %arg1: i32) -> (i32, i32) {
    %c0_i32 = arith.constant 0 : i32
    return %arg0, %arg1 : i32, i32
  }
  func.func @transform_4(%arg0: i32, %arg1: i32) -> (i32, i32) {
    %c0_i32 = arith.constant 0 : i32
    return %arg0, %arg1 : i32, i32
  }
}

module attributes {stable_mosaic.version = 11 : i64} {
  func.func @_gemm_kernel(%arg0: i32, %arg1: i32, %arg2: memref<64x1152xbf16, #tpu.memory_space<vmem>>, %arg3: memref<1152x128xbf16, #tpu.memory_space<vmem>>, %arg4: memref<1x128xf32, #tpu.memory_space<vmem>>, %arg5: memref<64x128xf32, #tpu.memory_space<vmem>>) attributes {dimension_semantics = [#tpu.dimension_semantics<parallel>, #tpu.dimension_semantics<parallel>], iteration_bounds = array<i64: 2, 2>, scalar_prefetch = 0 : i64, scratch_operands = 0 : i64, tpu.core_type = #tpu.core_type<tc>, window_params = [{transform_indices = @transform_0, window_bounds = array<i64: 64, 1152>}, {transform_indices = @transform_1, window_bounds = array<i64: 1152, 128>}, {transform_indices = @transform_2, window_bounds = array<i64: 1, 128>}, {transform_indices = @transform_3, window_bounds = array<i64: 64, 128>}]} {
    %c0 = arith.constant 0 : index
    %c0_0 = arith.constant 0 : index
    %0 = vector.load %arg2[%c0, %c0_0] : memref<64x1152xbf16, #tpu.memory_space<vmem>>, vector<64x1152xbf16>
    %c0_1 = arith.constant 0 : index
    %c0_2 = arith.constant 0 : index
    %1 = vector.load %arg3[%c0_1, %c0_2] : memref<1152x128xbf16, #tpu.memory_space<vmem>>, vector<1152x128xbf16>
    %cst = arith.constant dense<0.000000e+00> : vector<64x128xf32>
    %2 = tpu.matmul %0, %1, %cst {dimension_numbers = #tpu.dot_dimension_numbers<[1], [0], [0], [1], [0, 0, 1, 1], [], []>} : vector<64x1152xbf16>, vector<1152x128xbf16>, vector<64x128xf32> -> vector<64x128xf32>
    %c0_3 = arith.constant 0 : index
    %c0_4 = arith.constant 0 : index
    %3 = vector.load %arg4[%c0_3, %c0_4] : memref<1x128xf32, #tpu.memory_space<vmem>>, vector<1x128xf32>
    %4 = vector.broadcast %3 : vector<1x128xf32> to vector<64x128xf32>
    %5 = arith.addf %2, %4 : vector<64x128xf32>
    %cst_5 = arith.constant 0.000000e+00 : f32
    %6 = vector.broadcast %cst_5 : f32 to vector<64x128xf32>
    %7 = arith.maximumf %5, %6 : vector<64x128xf32>
    %c0_6 = arith.constant 0 : index
    %c0_7 = arith.constant 0 : index
    %8 = vector.load %arg5[%c0_6, %c0_7] : memref<64x128xf32, #tpu.memory_space<vmem>>, vector<64x128xf32>
    tpu.vector_store %arg5[%c0_6, %c0_7], %7 {strides = array<i32>} : memref<64x128xf32, #tpu.memory_space<vmem>>, vector<64x128xf32>,
    return
  }
  func.func @transform_0(%arg0: i32, %arg1: i32) -> (i32, i32) {
    %c0_i32 = arith.constant 0 : i32
    %c0_i32_0 = arith.constant 0 : i32
    return %arg0, %c0_i32 : i32, i32
  }
  func.func @transform_1(%arg0: i32, %arg1: i32) -> (i32, i32) {
    %c0_i32 = arith.constant 0 : i32
    %c0_i32_0 = arith.constant 0 : i32
    return %c0_i32, %arg1 : i32, i32
  }
  func.func @transform_2(%arg0: i32, %arg1: i32) -> (i32, i32) {
    %c0_i32 = arith.constant 0 : i32
    %c0_i32_0 = arith.constant 0 : i32
    return %c0_i32, %arg1 : i32, i32
  }
  func.func @transform_3(%arg0: i32, %arg1: i32) -> (i32, i32) {
    %c0_i32 = arith.constant 0 : i32
    return %arg0, %arg1 : i32, i32
  }
}

module attributes {stable_mosaic.version = 11 : i64} {
  func.func @_gemm_kernel(%arg0: i32, %arg1: i32, %arg2: memref<16x1152xbf16, #tpu.memory_space<vmem>>, %arg3: memref<1152x128xbf16, #tpu.memory_space<vmem>>, %arg4: memref<1x128xf32, #tpu.memory_space<vmem>>, %arg5: memref<16x128xf32, #tpu.memory_space<vmem>>) attributes {dimension_semantics = [#tpu.dimension_semantics<parallel>, #tpu.dimension_semantics<parallel>], iteration_bounds = array<i64: 2, 2>, scalar_prefetch = 0 : i64, scratch_operands = 0 : i64, tpu.core_type = #tpu.core_type<tc>, window_params = [{transform_indices = @transform_0, window_bounds = array<i64: 16, 1152>}, {transform_indices = @transform_1, window_bounds = array<i64: 1152, 128>}, {transform_indices = @transform_2, window_bounds = array<i64: 1, 128>}, {transform_indices = @transform_3, window_bounds = array<i64: 16, 128>}]} {
    %c0 = arith.constant 0 : index
    %c0_0 = arith.constant 0 : index
    %0 = vector.load %arg2[%c0, %c0_0] : memref<16x1152xbf16, #tpu.memory_space<vmem>>, vector<16x1152xbf16>
    %c0_1 = arith.constant 0 : index
    %c0_2 = arith.constant 0 : index
    %1 = vector.load %arg3[%c0_1, %c0_2] : memref<1152x128xbf16, #tpu.memory_space<vmem>>, vector<1152x128xbf16>
    %cst = arith.constant dense<0.000000e+00> : vector<16x128xf32>
    %2 = tpu.matmul %0, %1, %cst {dimension_numbers = #tpu.dot_dimension_numbers<[1], [0], [0], [1], [0, 0, 1, 1], [], []>} : vector<16x1152xbf16>, vector<1152x128xbf16>, vector<16x128xf32> -> vector<16x128xf32>
    %c0_3 = arith.constant 0 : index
    %c0_4 = arith.constant 0 : index
    %3 = vector.load %arg4[%c0_3, %c0_4] : memref<1x128xf32, #tpu.memory_space<vmem>>, vector<1x128xf32>
    %4 = vector.broadcast %3 : vector<1x128xf32> to vector<16x128xf32>
    %5 = arith.addf %2, %4 : vector<16x128xf32>
    %cst_5 = arith.constant 0.000000e+00 : f32
    %6 = vector.broadcast %cst_5 : f32 to vector<16x128xf32>
    %7 = arith.maximumf %5, %6 : vector<16x128xf32>
    %c0_6 = arith.constant 0 : index
    %c0_7 = arith.constant 0 : index
    %8 = vector.load %arg5[%c0_6, %c0_7] : memref<16x128xf32, #tpu.memory_space<vmem>>, vector<16x128xf32>
    tpu.vector_store %arg5[%c0_6, %c0_7], %7 {strides = array<i32>} : memref<16x128xf32, #tpu.memory_space<vmem>>, vector<16x128xf32>,
    return
  }
  func.func @transform_0(%arg0: i32, %arg1: i32) -> (i32, i32) {
    %c0_i32 = arith.constant 0 : i32
    %c0_i32_0 = arith.constant 0 : i32
    return %arg0, %c0_i32 : i32, i32
  }
  func.func @transform_1(%arg0: i32, %arg1: i32) -> (i32, i32) {
    %c0_i32 = arith.constant 0 : i32
    %c0_i32_0 = arith.constant 0 : i32
    return %c0_i32, %arg1 : i32, i32
  }
  func.func @transform_2(%arg0: i32, %arg1: i32) -> (i32, i32) {
    %c0_i32 = arith.constant 0 : i32
    %c0_i32_0 = arith.constant 0 : i32
    return %c0_i32, %arg1 : i32, i32
  }
  func.func @transform_3(%arg0: i32, %arg1: i32) -> (i32, i32) {
    %c0_i32 = arith.constant 0 : i32
    return %arg0, %arg1 : i32, i32
  }
}

module attributes {stable_mosaic.version = 11 : i64} {
  func.func @_gemm_res_kernel(%arg0: i32, %arg1: i32, %arg2: memref<16x1152xbf16, #tpu.memory_space<vmem>>, %arg3: memref<1152x128xbf16, #tpu.memory_space<vmem>>, %arg4: memref<1x128xf32, #tpu.memory_space<vmem>>, %arg5: memref<16x128xf32, #tpu.memory_space<vmem>>, %arg6: memref<16x128xf32, #tpu.memory_space<vmem>>) attributes {dimension_semantics = [#tpu.dimension_semantics<parallel>, #tpu.dimension_semantics<parallel>], iteration_bounds = array<i64: 2, 1>, scalar_prefetch = 0 : i64, scratch_operands = 0 : i64, tpu.core_type = #tpu.core_type<tc>, window_params = [{transform_indices = @transform_0, window_bounds = array<i64: 16, 1152>}, {transform_indices = @transform_1, window_bounds = array<i64: 1152, 128>}, {transform_indices = @transform_2, window_bounds = array<i64: 1, 128>}, {transform_indices = @transform_3, window_bounds = array<i64: 16, 128>}, {transform_indices = @transform_4, window_bounds = array<i64: 16, 128>}]} {
    %c0 = arith.constant 0 : index
    %c0_0 = arith.constant 0 : index
    %0 = vector.load %arg2[%c0, %c0_0] : memref<16x1152xbf16, #tpu.memory_space<vmem>>, vector<16x1152xbf16>
    %c0_1 = arith.constant 0 : index
    %c0_2 = arith.constant 0 : index
    %1 = vector.load %arg3[%c0_1, %c0_2] : memref<1152x128xbf16, #tpu.memory_space<vmem>>, vector<1152x128xbf16>
    %cst = arith.constant dense<0.000000e+00> : vector<16x128xf32>
    %2 = tpu.matmul %0, %1, %cst {dimension_numbers = #tpu.dot_dimension_numbers<[1], [0], [0], [1], [0, 0, 1, 1], [], []>} : vector<16x1152xbf16>, vector<1152x128xbf16>, vector<16x128xf32> -> vector<16x128xf32>
    %c0_3 = arith.constant 0 : index
    %c0_4 = arith.constant 0 : index
    %3 = vector.load %arg4[%c0_3, %c0_4] : memref<1x128xf32, #tpu.memory_space<vmem>>, vector<1x128xf32>
    %4 = vector.broadcast %3 : vector<1x128xf32> to vector<16x128xf32>
    %5 = arith.addf %2, %4 : vector<16x128xf32>
    %cst_5 = arith.constant 0.000000e+00 : f32
    %6 = vector.broadcast %cst_5 : f32 to vector<16x128xf32>
    %7 = arith.maximumf %5, %6 : vector<16x128xf32>
    %c0_6 = arith.constant 0 : index
    %c0_7 = arith.constant 0 : index
    %8 = vector.load %arg5[%c0_6, %c0_7] : memref<16x128xf32, #tpu.memory_space<vmem>>, vector<16x128xf32>
    %9 = arith.addf %7, %8 : vector<16x128xf32>
    %c0_8 = arith.constant 0 : index
    %c0_9 = arith.constant 0 : index
    %10 = vector.load %arg6[%c0_8, %c0_9] : memref<16x128xf32, #tpu.memory_space<vmem>>, vector<16x128xf32>
    tpu.vector_store %arg6[%c0_8, %c0_9], %9 {strides = array<i32>} : memref<16x128xf32, #tpu.memory_space<vmem>>, vector<16x128xf32>,
    return
  }
  func.func @transform_0(%arg0: i32, %arg1: i32) -> (i32, i32) {
    %c0_i32 = arith.constant 0 : i32
    %c0_i32_0 = arith.constant 0 : i32
    return %arg0, %c0_i32 : i32, i32
  }
  func.func @transform_1(%arg0: i32, %arg1: i32) -> (i32, i32) {
    %c0_i32 = arith.constant 0 : i32
    %c0_i32_0 = arith.constant 0 : i32
    return %c0_i32, %arg1 : i32, i32
  }
  func.func @transform_2(%arg0: i32, %arg1: i32) -> (i32, i32) {
    %c0_i32 = arith.constant 0 : i32
    %c0_i32_0 = arith.constant 0 : i32
    return %c0_i32, %arg1 : i32, i32
  }
  func.func @transform_3(%arg0: i32, %arg1: i32) -> (i32, i32) {
    %c0_i32 = arith.constant 0 : i32
    return %arg0, %arg1 : i32, i32
  }
  func.func @transform_4(%arg0: i32, %arg1: i32) -> (i32, i32) {
    %c0_i32 = arith.constant 0 : i32
    return %arg0, %arg1 : i32, i32
  }
}

module attributes {stable_mosaic.version = 11 : i64} {
  func.func @_gemm_res_kernel(%arg0: i32, %arg1: i32, %arg2: memref<8x1152xbf16, #tpu.memory_space<vmem>>, %arg3: memref<1152x128xbf16, #tpu.memory_space<vmem>>, %arg4: memref<1x128xf32, #tpu.memory_space<vmem>>, %arg5: memref<8x128xf32, #tpu.memory_space<vmem>>, %arg6: memref<8x128xf32, #tpu.memory_space<vmem>>) attributes {dimension_semantics = [#tpu.dimension_semantics<parallel>, #tpu.dimension_semantics<parallel>], iteration_bounds = array<i64: 1, 1>, scalar_prefetch = 0 : i64, scratch_operands = 0 : i64, tpu.core_type = #tpu.core_type<tc>, window_params = [{transform_indices = @transform_0, window_bounds = array<i64: 8, 1152>}, {transform_indices = @transform_1, window_bounds = array<i64: 1152, 128>}, {transform_indices = @transform_2, window_bounds = array<i64: 1, 128>}, {transform_indices = @transform_3, window_bounds = array<i64: 8, 128>}, {transform_indices = @transform_4, window_bounds = array<i64: 8, 128>}]} {
    %c0 = arith.constant 0 : index
    %c0_0 = arith.constant 0 : index
    %0 = vector.load %arg2[%c0, %c0_0] : memref<8x1152xbf16, #tpu.memory_space<vmem>>, vector<8x1152xbf16>
    %c0_1 = arith.constant 0 : index
    %c0_2 = arith.constant 0 : index
    %1 = vector.load %arg3[%c0_1, %c0_2] : memref<1152x128xbf16, #tpu.memory_space<vmem>>, vector<1152x128xbf16>
    %cst = arith.constant dense<0.000000e+00> : vector<8x128xf32>
    %2 = tpu.matmul %0, %1, %cst {dimension_numbers = #tpu.dot_dimension_numbers<[1], [0], [0], [1], [0, 0, 1, 1], [], []>} : vector<8x1152xbf16>, vector<1152x128xbf16>, vector<8x128xf32> -> vector<8x128xf32>
    %c0_3 = arith.constant 0 : index
    %c0_4 = arith.constant 0 : index
    %3 = vector.load %arg4[%c0_3, %c0_4] : memref<1x128xf32, #tpu.memory_space<vmem>>, vector<1x128xf32>
    %4 = vector.broadcast %3 : vector<1x128xf32> to vector<8x128xf32>
    %5 = arith.addf %2, %4 : vector<8x128xf32>
    %cst_5 = arith.constant 0.000000e+00 : f32
    %6 = vector.broadcast %cst_5 : f32 to vector<8x128xf32>
    %7 = arith.maximumf %5, %6 : vector<8x128xf32>
    %c0_6 = arith.constant 0 : index
    %c0_7 = arith.constant 0 : index
    %8 = vector.load %arg5[%c0_6, %c0_7] : memref<8x128xf32, #tpu.memory_space<vmem>>, vector<8x128xf32>
    %9 = arith.addf %7, %8 : vector<8x128xf32>
    %c0_8 = arith.constant 0 : index
    %c0_9 = arith.constant 0 : index
    %10 = vector.load %arg6[%c0_8, %c0_9] : memref<8x128xf32, #tpu.memory_space<vmem>>, vector<8x128xf32>
    tpu.vector_store %arg6[%c0_8, %c0_9], %9 {strides = array<i32>} : memref<8x128xf32, #tpu.memory_space<vmem>>, vector<8x128xf32>,
    return
  }
  func.func @transform_0(%arg0: i32, %arg1: i32) -> (i32, i32) {
    %c0_i32 = arith.constant 0 : i32
    %c0_i32_0 = arith.constant 0 : i32
    return %arg0, %c0_i32 : i32, i32
  }
  func.func @transform_1(%arg0: i32, %arg1: i32) -> (i32, i32) {
    %c0_i32 = arith.constant 0 : i32
    %c0_i32_0 = arith.constant 0 : i32
    return %c0_i32, %arg1 : i32, i32
  }
  func.func @transform_2(%arg0: i32, %arg1: i32) -> (i32, i32) {
    %c0_i32 = arith.constant 0 : i32
    %c0_i32_0 = arith.constant 0 : i32
    return %c0_i32, %arg1 : i32, i32
  }
  func.func @transform_3(%arg0: i32, %arg1: i32) -> (i32, i32) {
    %c0_i32 = arith.constant 0 : i32
    return %arg0, %arg1 : i32, i32
  }
  func.func @transform_4(%arg0: i32, %arg1: i32) -> (i32, i32) {
    %c0_i32 = arith.constant 0 : i32
    return %arg0, %arg1 : i32, i32
  }
}

module attributes {stable_mosaic.version = 11 : i64} {
  func.func @_gemm_kernel(%arg0: i32, %arg1: i32, %arg2: memref<8x1152xbf16, #tpu.memory_space<vmem>>, %arg3: memref<1152x128xbf16, #tpu.memory_space<vmem>>, %arg4: memref<1x128xf32, #tpu.memory_space<vmem>>, %arg5: memref<8x128xf32, #tpu.memory_space<vmem>>) attributes {dimension_semantics = [#tpu.dimension_semantics<parallel>, #tpu.dimension_semantics<parallel>], iteration_bounds = array<i64: 1, 2>, scalar_prefetch = 0 : i64, scratch_operands = 0 : i64, tpu.core_type = #tpu.core_type<tc>, window_params = [{transform_indices = @transform_0, window_bounds = array<i64: 8, 1152>}, {transform_indices = @transform_1, window_bounds = array<i64: 1152, 128>}, {transform_indices = @transform_2, window_bounds = array<i64: 1, 128>}, {transform_indices = @transform_3, window_bounds = array<i64: 8, 128>}]} {
    %c0 = arith.constant 0 : index
    %c0_0 = arith.constant 0 : index
    %0 = vector.load %arg2[%c0, %c0_0] : memref<8x1152xbf16, #tpu.memory_space<vmem>>, vector<8x1152xbf16>
    %c0_1 = arith.constant 0 : index
    %c0_2 = arith.constant 0 : index
    %1 = vector.load %arg3[%c0_1, %c0_2] : memref<1152x128xbf16, #tpu.memory_space<vmem>>, vector<1152x128xbf16>
    %cst = arith.constant dense<0.000000e+00> : vector<8x128xf32>
    %2 = tpu.matmul %0, %1, %cst {dimension_numbers = #tpu.dot_dimension_numbers<[1], [0], [0], [1], [0, 0, 1, 1], [], []>} : vector<8x1152xbf16>, vector<1152x128xbf16>, vector<8x128xf32> -> vector<8x128xf32>
    %c0_3 = arith.constant 0 : index
    %c0_4 = arith.constant 0 : index
    %3 = vector.load %arg4[%c0_3, %c0_4] : memref<1x128xf32, #tpu.memory_space<vmem>>, vector<1x128xf32>
    %4 = vector.broadcast %3 : vector<1x128xf32> to vector<8x128xf32>
    %5 = arith.addf %2, %4 : vector<8x128xf32>
    %cst_5 = arith.constant 0.000000e+00 : f32
    %6 = vector.broadcast %cst_5 : f32 to vector<8x128xf32>
    %7 = arith.maximumf %5, %6 : vector<8x128xf32>
    %c0_6 = arith.constant 0 : index
    %c0_7 = arith.constant 0 : index
    %8 = vector.load %arg5[%c0_6, %c0_7] : memref<8x128xf32, #tpu.memory_space<vmem>>, vector<8x128xf32>
    tpu.vector_store %arg5[%c0_6, %c0_7], %7 {strides = array<i32>} : memref<8x128xf32, #tpu.memory_space<vmem>>, vector<8x128xf32>,
    return
  }
  func.func @transform_0(%arg0: i32, %arg1: i32) -> (i32, i32) {
    %c0_i32 = arith.constant 0 : i32
    %c0_i32_0 = arith.constant 0 : i32
    return %arg0, %c0_i32 : i32, i32
  }
  func.func @transform_1(%arg0: i32, %arg1: i32) -> (i32, i32) {
    %c0_i32 = arith.constant 0 : i32
    %c0_i32_0 = arith.constant 0 : i32
    return %c0_i32, %arg1 : i32, i32
  }
  func.func @transform_2(%arg0: i32, %arg1: i32) -> (i32, i32) {
    %c0_i32 = arith.constant 0 : i32
    %c0_i32_0 = arith.constant 0 : i32
    return %c0_i32, %arg1 : i32, i32
  }
  func.func @transform_3(%arg0: i32, %arg1: i32) -> (i32, i32) {
    %c0_i32 = arith.constant 0 : i32
    return %arg0, %arg1 : i32, i32
  }
}

module attributes {stable_mosaic.version = 11 : i64} {
  func.func @_mlp_kernel(%arg0: i32, %arg1: memref<2x128xbf16, #tpu.memory_space<vmem>>, %arg2: memref<128x256xbf16, #tpu.memory_space<vmem>>, %arg3: memref<1x256xf32, #tpu.memory_space<vmem>>, %arg4: memref<256x256xbf16, #tpu.memory_space<vmem>>, %arg5: memref<1x256xf32, #tpu.memory_space<vmem>>, %arg6: memref<256x128xbf16, #tpu.memory_space<vmem>>, %arg7: memref<1x128xf32, #tpu.memory_space<vmem>>, %arg8: memref<2x128xf32, #tpu.memory_space<vmem>>) attributes {dimension_semantics = [#tpu.dimension_semantics<arbitrary>], iteration_bounds = array<i64: 1>, scalar_prefetch = 0 : i64, scratch_operands = 0 : i64, tpu.core_type = #tpu.core_type<tc>, window_params = [{pipeline_mode = #tpu.pipeline_mode<synchronous>, transform_indices = @transform_0, window_bounds = array<i64: 2, 128>}, {pipeline_mode = #tpu.pipeline_mode<synchronous>, transform_indices = @transform_1, window_bounds = array<i64: 128, 256>}, {pipeline_mode = #tpu.pipeline_mode<synchronous>, transform_indices = @transform_2, window_bounds = array<i64: 1, 256>}, {pipeline_mode = #tpu.pipeline_mode<synchronous>, transform_indices = @transform_3, window_bounds = array<i64: 256, 256>}, {pipeline_mode = #tpu.pipeline_mode<synchronous>, transform_indices = @transform_4, window_bounds = array<i64: 1, 256>}, {pipeline_mode = #tpu.pipeline_mode<synchronous>, transform_indices = @transform_5, window_bounds = array<i64: 256, 128>}, {pipeline_mode = #tpu.pipeline_mode<synchronous>, transform_indices = @transform_6, window_bounds = array<i64: 1, 128>}, {pipeline_mode = #tpu.pipeline_mode<synchronous>, transform_indices = @transform_7, window_bounds = array<i64: 2, 128>}]} {
    %c0 = arith.constant 0 : index
    %c0_0 = arith.constant 0 : index
    %0 = vector.load %arg1[%c0, %c0_0] : memref<2x128xbf16, #tpu.memory_space<vmem>>, vector<2x128xbf16>
    %c0_1 = arith.constant 0 : index
    %c0_2 = arith.constant 0 : index
    %1 = vector.load %arg2[%c0_1, %c0_2] : memref<128x256xbf16, #tpu.memory_space<vmem>>, vector<128x256xbf16>
    %cst = arith.constant dense<0.000000e+00> : vector<2x256xf32>
    %2 = tpu.matmul %0, %1, %cst {dimension_numbers = #tpu.dot_dimension_numbers<[1], [0], [0], [1], [0, 0, 1, 1], [], []>} : vector<2x128xbf16>, vector<128x256xbf16>, vector<2x256xf32> -> vector<2x256xf32>
    %c0_3 = arith.constant 0 : index
    %c0_4 = arith.constant 0 : index
    %3 = vector.load %arg3[%c0_3, %c0_4] : memref<1x256xf32, #tpu.memory_space<vmem>>, vector<1x256xf32>
    %4 = vector.broadcast %3 : vector<1x256xf32> to vector<2x256xf32>
    %5 = arith.addf %2, %4 : vector<2x256xf32>
    %cst_5 = arith.constant 0.000000e+00 : f32
    %6 = vector.broadcast %cst_5 : f32 to vector<2x256xf32>
    %7 = arith.maximumf %5, %6 : vector<2x256xf32>
    %8 = arith.truncf %7 : vector<2x256xf32> to vector<2x256xbf16>
    %c0_6 = arith.constant 0 : index
    %c0_7 = arith.constant 0 : index
    %9 = vector.load %arg4[%c0_6, %c0_7] : memref<256x256xbf16, #tpu.memory_space<vmem>>, vector<256x256xbf16>
    %cst_8 = arith.constant dense<0.000000e+00> : vector<2x256xf32>
    %10 = tpu.matmul %8, %9, %cst_8 {dimension_numbers = #tpu.dot_dimension_numbers<[1], [0], [0], [1], [0, 0, 1, 1], [], []>} : vector<2x256xbf16>, vector<256x256xbf16>, vector<2x256xf32> -> vector<2x256xf32>
    %c0_9 = arith.constant 0 : index
    %c0_10 = arith.constant 0 : index
    %11 = vector.load %arg5[%c0_9, %c0_10] : memref<1x256xf32, #tpu.memory_space<vmem>>, vector<1x256xf32>
    %12 = vector.broadcast %11 : vector<1x256xf32> to vector<2x256xf32>
    %13 = arith.addf %10, %12 : vector<2x256xf32>
    %cst_11 = arith.constant 0.000000e+00 : f32
    %14 = vector.broadcast %cst_11 : f32 to vector<2x256xf32>
    %15 = arith.maximumf %13, %14 : vector<2x256xf32>
    %16 = arith.truncf %15 : vector<2x256xf32> to vector<2x256xbf16>
    %c0_12 = arith.constant 0 : index
    %c0_13 = arith.constant 0 : index
    %17 = vector.load %arg6[%c0_12, %c0_13] : memref<256x128xbf16, #tpu.memory_space<vmem>>, vector<256x128xbf16>
    %cst_14 = arith.constant dense<0.000000e+00> : vector<2x128xf32>
    %18 = tpu.matmul %16, %17, %cst_14 {dimension_numbers = #tpu.dot_dimension_numbers<[1], [0], [0], [1], [0, 0, 1, 1], [], []>} : vector<2x256xbf16>, vector<256x128xbf16>, vector<2x128xf32> -> vector<2x128xf32>
    %c0_15 = arith.constant 0 : index
    %c0_16 = arith.constant 0 : index
    %19 = vector.load %arg7[%c0_15, %c0_16] : memref<1x128xf32, #tpu.memory_space<vmem>>, vector<1x128xf32>
    %20 = vector.broadcast %19 : vector<1x128xf32> to vector<2x128xf32>
    %21 = arith.addf %18, %20 : vector<2x128xf32>
    %c0_17 = arith.constant 0 : index
    %c0_18 = arith.constant 0 : index
    %22 = vector.load %arg8[%c0_17, %c0_18] : memref<2x128xf32, #tpu.memory_space<vmem>>, vector<2x128xf32>
    tpu.vector_store %arg8[%c0_17, %c0_18], %21 {strides = array<i32>} : memref<2x128xf32, #tpu.memory_space<vmem>>, vector<2x128xf32>,
    return
  }
  func.func @transform_0(%arg0: i32) -> (i32, i32) {
    %c0_i32 = arith.constant 0 : i32
    %c0_i32_0 = arith.constant 0 : i32
    %c0_i32_1 = arith.constant 0 : i32
    return %c0_i32, %c0_i32_0 : i32, i32
  }
  func.func @transform_1(%arg0: i32) -> (i32, i32) {
    %c0_i32 = arith.constant 0 : i32
    %c0_i32_0 = arith.constant 0 : i32
    %c0_i32_1 = arith.constant 0 : i32
    return %c0_i32, %c0_i32_0 : i32, i32
  }
  func.func @transform_2(%arg0: i32) -> (i32, i32) {
    %c0_i32 = arith.constant 0 : i32
    %c0_i32_0 = arith.constant 0 : i32
    %c0_i32_1 = arith.constant 0 : i32
    return %c0_i32, %c0_i32_0 : i32, i32
  }
  func.func @transform_3(%arg0: i32) -> (i32, i32) {
    %c0_i32 = arith.constant 0 : i32
    %c0_i32_0 = arith.constant 0 : i32
    %c0_i32_1 = arith.constant 0 : i32
    return %c0_i32, %c0_i32_0 : i32, i32
  }
  func.func @transform_4(%arg0: i32) -> (i32, i32) {
    %c0_i32 = arith.constant 0 : i32
    %c0_i32_0 = arith.constant 0 : i32
    %c0_i32_1 = arith.constant 0 : i32
    return %c0_i32, %c0_i32_0 : i32, i32
  }
  func.func @transform_5(%arg0: i32) -> (i32, i32) {
    %c0_i32 = arith.constant 0 : i32
    %c0_i32_0 = arith.constant 0 : i32
    %c0_i32_1 = arith.constant 0 : i32
    return %c0_i32, %c0_i32_0 : i32, i32
  }
  func.func @transform_6(%arg0: i32) -> (i32, i32) {
    %c0_i32 = arith.constant 0 : i32
    %c0_i32_0 = arith.constant 0 : i32
    %c0_i32_1 = arith.constant 0 : i32
    return %c0_i32, %c0_i32_0 : i32, i32
  }
  func.func @transform_7(%arg0: i32) -> (i32, i32) {
    %c0_i32 = arith.constant 0 : i32
    %c0_i32_0 = arith.constant 0 : i32
    %c0_i32_1 = arith.constant 0 : i32
    return %c0_i32, %c0_i32_0 : i32, i32
  }
}

</mosaic_0001>

<bundles_post_ra>
// kernel: forward.8
= control target key start
LH: loop header
LB: loop body
LE: loop exit
PB: predicated region body
PF: predicated region fallthrough
CT: control target
= control target key end

     0   :  { %s739_s12 = smov 0   ;;  %s741_s13 = smov 0   ;;  %s817_s0 = inlined_call_operand.vmem [shape: bf16[512,49], index: 0, kind: input, shape index: {}]   ;;  %s818_s1 = inlined_call_operand.vmem [shape: bf16[49,128], index: 1, kind: input, shape index: {}]   ;;  %s819_s2 = inlined_call_operand.vmem [shape: f32[1,128], index: 2, kind: input, shape index: {}]   ;;  %s820_s3 = inlined_call_operand.vmem [shape: f32[512,128], index: 3, kind: output, shape index: {}]  }
   0x1   :  { %s743_s14 = smov 0  }
   0x2 LB: > { %s25_s15 = sadd.s32 1, %s712_s13  ;;  %p585_p0 = scmp.ge.s32.totalorder %s716_s14, 1  ;;  %s716_s14 = sphi %s743_s14, %s13_s14   ;;  %s712_s13 = sphi %s741_s13, %s822_s13   ;;  %s708_s12 = sphi %s739_s12, %s821_s12  }
   0x3   : > { %p27_p1 = scmp.ge.s32.totalorder %s25_s15, 4  ;;  %p169_p2 = scmp.lt.s32.totalorder %s716_s14, 5 }
   0x5   : > { %s824_s15 = smov (%p27_p1, %s25_s15), 0  ;;  %p170_p3 = pnand %p585_p0, %p169_p2 }
   0x6   : > { %v682_v0 = vld [vmem:[%s818_s1] sm:$0xff] (!%p170_p3)   ;;  %v683_v1 = vld [vmem:[%s818_s1 + $0x8] sm:$0xff] (!%p170_p3)   ;;  %vm342_vm0 = vcmask (!%p170_p3), 1040384   ;;  %s586_s20 = sshll.u32 (!%p170_p3), %s708_s12, 4  ;;  %v684_v2 = vld [vmem:[%s818_s1 + $0x10] sm:$0xff] (!%p170_p3)   ;;  %v718_v4 = vmov (!%p170_p3), 0  }
   0x7   : > { %173 = sbr.rel (%p170_p3) target bundleno = 251 (0xfb), region = 32  ;;  %625 = vmatprep.subr.bf16.mxu0 (!%p170_p3), %v682_v0  ;;  %649 = vmatprep.subr.bf16.mxu1 (!%p170_p3), %v682_v0  ;;  %v685_v3 = vld [vmem:[%s818_s1 + $0x18] ss:$0 sps:$4 sm:$0x11] (!%p170_p3)   ;;  %p204_p4 = scmp.lt.s32.totalorder (!%p170_p3), %s586_s20, 63  ;;  %v344_v5 = vsel (!%p170_p3), %vm342_vm0, 65535, %v718_v4 }
   0x8   : > { %626 = vmatpush3.bf16.msra.mxu0 (!%p170_p3), %v682_v0  ;;  %653 = vmatpush3.bf16.msra.mxu1 (!%p170_p3), %v682_v0  ;;  %v346_v6 = vand.u32 (!%p170_p3), %v685_v3, %v344_v5  ;;  %vm317_vm1 = vcmask (!%p170_p3), 400384   ;;  %v590_v15 = vld [vmem:[%s819_s2] ss:$0 sm:$0xff] (!%p170_p3) }
   0x9   : > { %627 = vmatprep.subr.bf16.mxu0 (!%p170_p3), %v683_v1  ;;  %650 = vmatprep.subr.bf16.mxu1 (!%p170_p3), %v683_v1 }
   0xc   : > { %628 = vmatpush3.bf16.msra.mxu0 (!%p170_p3), %v683_v1  ;;  %654 = vmatpush3.bf16.msra.mxu1 (!%p170_p3), %v683_v1 }
   0xd   : > { %629 = vmatprep.subr.bf16.mxu0 (!%p170_p3), %v684_v2  ;;  %651 = vmatprep.subr.bf16.mxu1 (!%p170_p3), %v684_v2 }
   0xe   : > { %s826_s20 = smov (!%p204_p4, %s586_s20), 63 }
   0xf   : > { %s587_s25 = sshll.u32 %s826_s20, 2  ;;  %s589_s4 = sshll.u32 %s826_s20, 3 }
  0x10   : > { %s207_s28 = scalar_lea.vmem %s817_s0, %s587_s25  ;;  %630 = vmatpush3.bf16.msra.mxu0 %v684_v2  ;;  %655 = vmatpush3.bf16.msra.mxu1 %v684_v2  ;;  %s790_s7 = scalar_lea.vmem %s820_s3, %s589_s4 }
  0x11   : > { %v686_v7 = vld [vmem:[%s207_s28] sm:$0xff]   ;;  %631 = vmatprep.subr.bf16.mxu0 %v346_v6  ;;  %652 = vmatprep.subr.bf16.mxu1 %v346_v6  ;;  %v688_v9 = vld [vmem:[%s207_s28 + $0x8] sm:$0xff]   ;;  %v690_v11 = vld [vmem:[%s207_s28 + $0x10] sm:$0xff]  }
  0x12   : > { %v687_v8 = vld [vmem:[%s207_s28 + $0x20] sm:$0xff]   ;;  %633 = vmatprep.mubr.msk.bf16.mxu0 %vm317_vm1, %v686_v7  ;;  %v689_v10 = vld [vmem:[%s207_s28 + $0x28] sm:$0xff]   ;;  %v691_v12 = vld [vmem:[%s207_s28 + $0x30] sm:$0xff]  }
  0x13   : > { %641 = vmatprep.mubr.msk.bf16.mxu1 %vm317_vm1, %v687_v8  ;;  %v692_v13 = vld [vmem:[%s207_s28 + $0x18] sm:$0xff]  }
  0x14   : > { %632 = vmatpush3.bf16.msra.mxu0 %v346_v6  ;;  %656 = vmatpush3.bf16.msra.mxu1 %v346_v6  ;;  %v693_v14 = vld [vmem:[%s207_s28 + $0x38] sm:$0xff]  }
  0x17   : > { %634 = vmatmul.mubr.msk.bf16.vlgmr.msra.gmra.mrb[0].mxu0 %vm317_vm1, %v688_v9  ;;  %642 = vmatmul.mubr.msk.bf16.vlgmr.msra.gmra.mrb[0].mxu1 %vm317_vm1, %v689_v10 }
  0x18   : > { %637 = vmatprep.mubr.msk.bf16.mxu0 %vm317_vm1, %v690_v11  ;;  %645 = vmatprep.mubr.msk.bf16.mxu1 %vm317_vm1, %v691_v12 }
  0x1f   : > { %638 = vmatmul.mubr.msk.bf16.gmra.mrb[4].mxu0 %vm317_vm1, %v692_v13  ;;  %646 = vmatmul.mubr.msk.bf16.gmra.mrb[4].mxu1 %vm317_vm1, %v693_v14 }
  0xea   : > { %v635_v16 = vpop.f32.mrb[0].mxu0  ;;  %v643_v17 = vpop.f32.mrb[0].mxu1 }
  0xeb   : > { %v391_v18 = vadd.f32 %v635_v16, %v590_v15  ;;  %v423_v19 = vadd.f32 %v643_v17, %v590_v15  ;;  %v382_v20 = vpop.f32.mrb[1].mxu0  ;;  %v414_v21 = vpop.f32.mrb[1].mxu1 }
  0xec   : > { %v383_v22 = vadd.f32 %v590_v15, %v382_v20  ;;  %v415_v23 = vadd.f32 %v590_v15, %v414_v21  ;;  %v636_v24 = vpop.f32.mrb[2].mxu0  ;;  %v644_v25 = vpop.f32.mrb[2].mxu1 }
  0xed   : > { %v447_v26 = vmax.f32 %v391_v18, 0.0  ;;  %v455_v27 = vmax.f32 %v423_v19, 0.0  ;;  %v394_v28 = vadd.f32 %v636_v24, %v590_v15  ;;  %v426_v29 = vadd.f32 %v644_v25, %v590_v15  ;;  %v385_v30 = vpop.f32.mrb[3].mxu0  ;;  %v417_v31 = vpop.f32.mrb[3].mxu1 }
  0xee   : > { %v445_v32 = vmax.f32 %v383_v22, 0.0  ;;  %v453_v33 = vmax.f32 %v415_v23, 0.0  ;;  %v386_v34 = vadd.f32 %v590_v15, %v385_v30  ;;  %v418_v35 = vadd.f32 %v590_v15, %v417_v31 }
  0xef   : > { %463 = vst [vmem:[%s790_s7 + $0x10] sm:$0xff] %v447_v26  ;;  %471 = vst [vmem:[%s790_s7 + $0x50] sm:$0xff] %v455_v27  ;;  %v448_v36 = vmax.f32 %v394_v28, 0.0  ;;  %v456_v37 = vmax.f32 %v426_v29, 0.0 }
  0xf0   : > { %461 = vst [vmem:[%s790_s7] sm:$0xff] %v445_v32  ;;  %469 = vst [vmem:[%s790_s7 + $0x40] sm:$0xff] %v453_v33  ;;  %v446_v38 = vmax.f32 %v386_v34, 0.0  ;;  %v454_v39 = vmax.f32 %v418_v35, 0.0 }
  0xf1   : > { %464 = vst [vmem:[%s790_s7 + $0x18] sm:$0xff] %v448_v36  ;;  %472 = vst [vmem:[%s790_s7 + $0x58] sm:$0xff] %v456_v37 }
  0xf2   : > { %462 = vst [vmem:[%s790_s7 + $0x8] sm:$0xff] %v446_v38  ;;  %470 = vst [vmem:[%s790_s7 + $0x48] sm:$0xff] %v454_v39  ;;  %v639_v40 = vpop.f32.mrb[4].mxu0  ;;  %v647_v41 = vpop.f32.mrb[4].mxu1 }
  0xf3   : > { %v407_v42 = vadd.f32 %v639_v40, %v590_v15  ;;  %v439_v43 = vadd.f32 %v647_v41, %v590_v15  ;;  %v398_v44 = vpop.f32.mrb[5].mxu0  ;;  %v430_v45 = vpop.f32.mrb[5].mxu1 }
  0xf4   : > { %v399_v46 = vadd.f32 %v590_v15, %v398_v44  ;;  %v431_v47 = vadd.f32 %v590_v15, %v430_v45  ;;  %v640_v48 = vpop.f32.mrb[6].mxu0  ;;  %v648_v49 = vpop.f32.mrb[6].mxu1 }
  0xf5   : > { %v451_v50 = vmax.f32 %v407_v42, 0.0  ;;  %v459_v51 = vmax.f32 %v439_v43, 0.0  ;;  %v410_v52 = vadd.f32 %v640_v48, %v590_v15  ;;  %v442_v53 = vadd.f32 %v648_v49, %v590_v15  ;;  %v401_v54 = vpop.f32.mrb[7].mxu0  ;;  %v433_v55 = vpop.f32.mrb[7].mxu1 }
  0xf6   : > { %v449_v56 = vmax.f32 %v399_v46, 0.0  ;;  %v457_v57 = vmax.f32 %v431_v47, 0.0  ;;  %v402_v58 = vadd.f32 %v590_v15, %v401_v54  ;;  %v434_v59 = vadd.f32 %v590_v15, %v433_v55 }
  0xf7   : > { %467 = vst [vmem:[%s790_s7 + $0x30] sm:$0xff] %v451_v50  ;;  %475 = vst [vmem:[%s790_s7 + $0x70] sm:$0xff] %v459_v51  ;;  %v452_v60 = vmax.f32 %v410_v52, 0.0  ;;  %v460_v61 = vmax.f32 %v442_v53, 0.0 }
  0xf8   : > { %465 = vst [vmem:[%s790_s7 + $0x20] sm:$0xff] %v449_v56  ;;  %473 = vst [vmem:[%s790_s7 + $0x60] sm:$0xff] %v457_v57  ;;  %v450_v62 = vmax.f32 %v402_v58, 0.0  ;;  %v458_v63 = vmax.f32 %v434_v59, 0.0 }
  0xf9   : > { %468 = vst [vmem:[%s790_s7 + $0x38] sm:$0xff] %v452_v60  ;;  %476 = vst [vmem:[%s790_s7 + $0x78] sm:$0xff] %v460_v61 }
  0xfa   : > { %466 = vst [vmem:[%s790_s7 + $0x28] sm:$0xff] %v450_v62  ;;  %474 = vst [vmem:[%s790_s7 + $0x68] sm:$0xff] %v458_v63 }
  0xfb PF: > { %s13_s14 = sadd.s32 1, %s716_s14   ;;  %s821_s12 = smov %s712_s13 }
  0xfc   : > { %p10_p5 = scmp.ge.s32.totalorder %s13_s14, 6   ;;  %s822_s13 = smov %s824_s15 }
  0xfe   :  { %12 = sbr.rel (!%p10_p5) target bundleno = 2 (0x2), region = 68 }

// kernel: forward.10
= control target key start
LH: loop header
LB: loop body
LE: loop exit
PB: predicated region body
PF: predicated region fallthrough
CT: control target
= control target key end

     0   :  { %s2104_s15 = smov 0   ;;  %s2106_s16 = smov 0   ;;  %s2427_s0 = inlined_call_operand.vmem [shape: bf16[128,1152], index: 0, kind: input, shape index: {}]   ;;  %s2428_s1 = inlined_call_operand.vmem [shape: bf16[1152,128], index: 1, kind: input, shape index: {}]   ;;  %s2429_s2 = inlined_call_operand.vmem [shape: f32[1,128], index: 2, kind: input, shape index: {}]   ;;  %s2430_s3 = inlined_call_operand.vmem [shape: f32[128,128], index: 3, kind: input, shape index: {}]   ;;  %s2431_s4 = inlined_call_operand.vmem [shape: f32[128,128], index: 4, kind: output, shape index: {}]  }
   0x1   :  { %s2108_s17 = smov 0  }
   0x2 LB: > { %s26_s18 = sadd.s32 1, %s2073_s16  ;;  %p1576_p0 = scmp.ge.s32.totalorder %s2077_s17, 1  ;;  %s2077_s17 = sphi %s2108_s17, %s14_s17   ;;  %s2073_s16 = sphi %s2106_s16, %s2433_s16   ;;  %s2069_s15 = sphi %s2104_s15, %s2432_s15  }
   0x3   : > { %p28_p1 = scmp.ge.s32.totalorder %s26_s18, 2  ;;  %p211_p2 = scmp.lt.s32.totalorder %s2077_s17, 3 }
   0x5   : > { %s2435_s18 = smov (%p28_p1, %s26_s18), 0  ;;  %p212_p3 = pnand %p1576_p0, %p211_p2 }
   0x6   : > { %v1931_v0 = vld [vmem:[%s2428_s1 + $0x40] sm:$0xff] (!%p212_p3)   ;;  %v1935_v4 = vld [vmem:[%s2428_s1 + $0x48] sm:$0xff] (!%p212_p3)   ;;  %v1939_v8 = vld [vmem:[%s2428_s1 + $0x50] sm:$0xff] (!%p212_p3)   ;;  %s1577_s27 = sshll.u32 (!%p212_p3), %s2069_s15, 3 }
   0x7   : > { %215 = sbr.rel (%p212_p3) target bundleno = 328 (0x148), region = 36  ;;  %v1932_v1 = vld [vmem:[%s2428_s1 + $0xc0] sm:$0xff] (!%p212_p3)   ;;  %1694 = vmatprep.subr.bf16.mxu0 (!%p212_p3), %v1931_v0  ;;  %v1936_v5 = vld [vmem:[%s2428_s1 + $0xc8] sm:$0xff] (!%p212_p3)   ;;  %v1940_v9 = vld [vmem:[%s2428_s1 + $0xd0] sm:$0xff] (!%p212_p3)   ;;  %p257_p4 = scmp.lt.s32.totalorder (!%p212_p3), %s1577_s27, 15 }
   0x8   : > { %v1933_v2 = vld [vmem:[%s2428_s1] sm:$0xff] (!%p212_p3)   ;;  %1734 = vmatprep.subr.bf16.mxu1 (!%p212_p3), %v1932_v1  ;;  %v1937_v6 = vld [vmem:[%s2428_s1 + $0x8] sm:$0xff] (!%p212_p3)   ;;  %v1941_v10 = vld [vmem:[%s2428_s1 + $0x10] sm:$0xff] (!%p212_p3)  }
   0x9   : > { %v1934_v3 = vld [vmem:[%s2428_s1 + $0x80] sm:$0xff] (!%p212_p3)   ;;  %1695 = vmatpush3.bf16.msra.mxu0 (!%p212_p3), %v1933_v2  ;;  %v1938_v7 = vld [vmem:[%s2428_s1 + $0x88] sm:$0xff] (!%p212_p3)   ;;  %v1942_v11 = vld [vmem:[%s2428_s1 + $0x90] sm:$0xff] (!%p212_p3)  }
   0xa   : > { %1735 = vmatpush3.bf16.msra.mxu1 (!%p212_p3), %v1934_v3  ;;  %1696 = vmatprep.subr.bf16.mxu0 (!%p212_p3), %v1935_v4  ;;  %v1943_v12 = vld [vmem:[%s2428_s1 + $0x58] sm:$0xff] (!%p212_p3)   ;;  %v1947_v16 = vld [vmem:[%s2428_s1 + $0x60] sm:$0xff] (!%p212_p3)   ;;  %v1951_v20 = vld [vmem:[%s2428_s1 + $0x68] sm:$0xff] (!%p212_p3)  }
   0xb   : > { %1736 = vmatprep.subr.bf16.mxu1 (!%p212_p3), %v1936_v5  ;;  %v1944_v13 = vld [vmem:[%s2428_s1 + $0xd8] sm:$0xff] (!%p212_p3)   ;;  %v1948_v17 = vld [vmem:[%s2428_s1 + $0xe0] sm:$0xff] (!%p212_p3)   ;;  %v1952_v21 = vld [vmem:[%s2428_s1 + $0xe8] sm:$0xff] (!%p212_p3)  }
   0xc   : > { %v1945_v14 = vld [vmem:[%s2428_s1 + $0x18] sm:$0xff] (!%p212_p3)   ;;  %v1949_v18 = vld [vmem:[%s2428_s1 + $0x20] sm:$0xff] (!%p212_p3)   ;;  %v1953_v22 = vld [vmem:[%s2428_s1 + $0x28] sm:$0xff] (!%p212_p3)  }
   0xd   : > { %1697 = vmatpush3.bf16.msra.mxu0 (!%p212_p3), %v1937_v6  ;;  %v1946_v15 = vld [vmem:[%s2428_s1 + $0x98] sm:$0xff] (!%p212_p3)   ;;  %v1950_v19 = vld [vmem:[%s2428_s1 + $0xa0] sm:$0xff] (!%p212_p3)   ;;  %v1954_v23 = vld [vmem:[%s2428_s1 + $0xa8] sm:$0xff] (!%p212_p3)  }
   0xe   : > { %1737 = vmatpush3.bf16.msra.mxu1 %v1938_v7  ;;  %1698 = vmatprep.subr.bf16.mxu0 %v1939_v8  ;;  %s2437_s27 = smov (!%p257_p4, %s1577_s27), 15  ;;  %v1955_v24 = vld [vmem:[%s2428_s1 + $0x70] sm:$0xff]   ;;  %v1959_v28 = vld [vmem:[%s2428_s1 + $0x78] sm:$0xff]   ;;  %v1969_v36 = vld [vmem:[%s2428_s1 + $0x140] sm:$0xff]  }
   0xf   : > { %1738 = vmatprep.subr.bf16.mxu1 %v1940_v9  ;;  %v1956_v25 = vld [vmem:[%s2428_s1 + $0xf0] sm:$0xff]   ;;  %s1906_s28 = smul.u32 36, %s2437_s27  ;;  %v1960_v29 = vld [vmem:[%s2428_s1 + $0xf8] sm:$0xff]   ;;  %v1970_v37 = vld [vmem:[%s2428_s1 + $0x1c0] sm:$0xff]  }
  0x10   : > { %v1957_v26 = vld [vmem:[%s2428_s1 + $0x30] sm:$0xff]   ;;  %v1961_v30 = vld [vmem:[%s2428_s1 + $0x38] sm:$0xff]   ;;  %v1971_v38 = vld [vmem:[%s2428_s1 + $0x100] sm:$0xff]  }
  0x11   : > { %1699 = vmatpush3.bf16.msra.mxu0 %v1941_v10  ;;  %v1958_v27 = vld [vmem:[%s2428_s1 + $0xb0] sm:$0xff]   ;;  %s2221_s12 = scalar_lea.vmem %s2427_s0, %s1906_s28  ;;  %v1962_v31 = vld [vmem:[%s2428_s1 + $0xb8] sm:$0xff]   ;;  %v1972_v39 = vld [vmem:[%s2428_s1 + $0x180] sm:$0xff]  }
  0x12   : > { %1739 = vmatpush3.bf16.msra.mxu1 %v1942_v11  ;;  %1700 = vmatprep.subr.bf16.mxu0 %v1943_v12  ;;  %v1963_v32 = vld [vmem:[%s2221_s12] ss:$36 sps:$4 sm:$0xff]   ;;  %v1966_v34 = vld [vmem:[%s2221_s12 + $0x8] ss:$36 sps:$4 sm:$0xff]   ;;  %v1979_v45 = vld [vmem:[%s2221_s12 + $0x54] ss:$36 sps:$4 sm:$0xff]  }
  0x13   : > { %1740 = vmatprep.subr.bf16.mxu1 %v1944_v13  ;;  %v1965_v33 = vld [vmem:[%s2221_s12 + $0x4] ss:$36 sps:$4 sm:$0xff]   ;;  %v1968_v35 = vld [vmem:[%s2221_s12 + $0xc] ss:$36 sps:$4 sm:$0xff]   ;;  %v1987_v52 = vld [vmem:[%s2428_s1 + $0x158] sm:$0xff]  }
  0x14   : > { %1128 = vmatprep.mubr.bf16.mxu0 %v1965_v33  ;;  %1193 = vmatprep.mubr.bf16.mxu1 %v1968_v35  ;;  %v1973_v40 = vld [vmem:[%s2428_s1 + $0x148] sm:$0xff]   ;;  %v1982_v47 = vld [vmem:[%s2221_s12 + $0x50] ss:$36 sps:$4 sm:$0xff]   ;;  %v1988_v53 = vld [vmem:[%s2428_s1 + $0x1d8] sm:$0xff]  }
  0x15   : > { %1701 = vmatpush3.bf16.msra.mxu0 %v1945_v14  ;;  %v1974_v41 = vld [vmem:[%s2428_s1 + $0x1c8] sm:$0xff]   ;;  %v1983_v48 = vld [vmem:[%s2428_s1 + $0x150] sm:$0xff]   ;;  %v1989_v54 = vld [vmem:[%s2428_s1 + $0x118] sm:$0xff]  }
  0x16   : > { %1741 = vmatpush3.bf16.msra.mxu1 %v1946_v15  ;;  %1702 = vmatprep.subr.bf16.mxu0 %v1947_v16  ;;  %v1975_v42 = vld [vmem:[%s2428_s1 + $0x108] sm:$0xff]   ;;  %v1984_v49 = vld [vmem:[%s2428_s1 + $0x1d0] sm:$0xff]   ;;  %v1990_v55 = vld [vmem:[%s2428_s1 + $0x198] sm:$0xff]  }
  0x17   : > { %1742 = vmatprep.subr.bf16.mxu1 %v1948_v17  ;;  %v1976_v43 = vld [vmem:[%s2428_s1 + $0x188] sm:$0xff]   ;;  %v1985_v50 = vld [vmem:[%s2428_s1 + $0x110] sm:$0xff]   ;;  %v1993_v57 = vld [vmem:[%s2221_s12 + $0x9c] ss:$36 sps:$4 sm:$0xff]  }
  0x18   : > { %v1977_v44 = vld [vmem:[%s2221_s12 + $0x4c] ss:$36 sps:$4 sm:$0xff]   ;;  %v1991_v56 = vld [vmem:[%s2221_s12 + $0x94] ss:$36 sps:$4 sm:$0xff]   ;;  %v1997_v60 = vld [vmem:[%s2428_s1 + $0x160] sm:$0xff]  }
  0x19   : > { %1703 = vmatpush3.bf16.msra.mxu0 %v1949_v18  ;;  %v1981_v46 = vld [vmem:[%s2221_s12 + $0x48] ss:$36 sps:$4 sm:$0xff]   ;;  %v1986_v51 = vld [vmem:[%s2428_s1 + $0x190] sm:$0xff]   ;;  %v1996_v59 = vld [vmem:[%s2221_s12 + $0x98] ss:$36 sps:$4 sm:$0xff]  }
  0x1a   : > { %1743 = vmatpush3.bf16.msra.mxu1 %v1950_v19  ;;  %1704 = vmatprep.subr.bf16.mxu0 %v1951_v20  ;;  %v1995_v58 = vld [vmem:[%s2221_s12 + $0x90] ss:$36 sps:$4 sm:$0xff]   ;;  %v1998_v61 = vld [vmem:[%s2428_s1 + $0x1e0] sm:$0xff]   ;;  %v2001_v0 = vld [vmem:[%s2428_s1 + $0x168] sm:$0xff]  }
  0x1b   : > { %1744 = vmatprep.subr.bf16.mxu1 %v1952_v21  ;;  %v1999_v62 = vld [vmem:[%s2428_s1 + $0x120] sm:$0xff]   ;;  %v2002_v1 = vld [vmem:[%s2428_s1 + $0x1e8] sm:$0xff]   ;;  %v2009_v6 = vld [vmem:[%s2221_s12 + $0xd8] ss:$36 sps:$4 sm:$0xff]  }
  0x1c   : > { %v2000_v63 = vld [vmem:[%s2428_s1 + $0x1a0] sm:$0xff]   ;;  %v2003_v2 = vld [vmem:[%s2428_s1 + $0x128] sm:$0xff]   ;;  %v2011_v8 = vld [vmem:[%s2428_s1 + $0x170] sm:$0xff]  }
  0x1d   : > { %1705 = vmatpush3.bf16.msra.mxu0 %v1953_v22  ;;  %v2004_v3 = vld [vmem:[%s2428_s1 + $0x1a8] sm:$0xff]   ;;  %v2005_v4 = vld [vmem:[%s2221_s12 + $0xdc] ss:$36 sps:$4 sm:$0xff]   ;;  %v2012_v9 = vld [vmem:[%s2428_s1 + $0x1f0] sm:$0xff]  }
  0x1e   : > { %1745 = vmatpush3.bf16.msra.mxu1 %v1954_v23  ;;  %1706 = vmatprep.subr.bf16.mxu0 %v1955_v24  ;;  %v2007_v5 = vld [vmem:[%s2221_s12 + $0xe4] ss:$36 sps:$4 sm:$0xff]   ;;  %v2013_v10 = vld [vmem:[%s2428_s1 + $0x130] sm:$0xff]   ;;  %v2015_v12 = vld [vmem:[%s2428_s1 + $0x178] sm:$0xff]  }
  0x1f   : > { %1746 = vmatprep.subr.bf16.mxu1 %v1956_v25  ;;  %v2010_v7 = vld [vmem:[%s2221_s12 + $0xe0] ss:$36 sps:$4 sm:$0xff]   ;;  %v2014_v11 = vld [vmem:[%s2428_s1 + $0x1b0] sm:$0xff]   ;;  %v2016_v13 = vld [vmem:[%s2428_s1 + $0x1f8] sm:$0xff]  }
  0x20   : > { %v2017_v14 = vld [vmem:[%s2428_s1 + $0x138] sm:$0xff]   ;;  %v2019_v16 = vld [vmem:[%s2221_s12 + $0x10] ss:$36 sps:$4 sm:$0xff]   ;;  %v2025_v20 = vld [vmem:[%s2428_s1 + $0x200] sm:$0xff]  }
  0x21   : > { %1707 = vmatpush3.bf16.msra.mxu0 %v1957_v26  ;;  %v2018_v15 = vld [vmem:[%s2428_s1 + $0x1b8] sm:$0xff]   ;;  %v2026_v21 = vld [vmem:[%s2428_s1 + $0x208] sm:$0xff]   ;;  %v2032_v25 = vld [vmem:[%s2221_s12 + $0x60] ss:$36 sps:$4 sm:$0xff]  }
  0x22   : > { %1747 = vmatpush3.bf16.msra.mxu1 %v1958_v27  ;;  %1708 = vmatprep.subr.bf16.mxu0 %v1959_v28  ;;  %v2021_v17 = vld [vmem:[%s2221_s12 + $0x14] ss:$36 sps:$4 sm:$0xff]   ;;  %v2024_v19 = vld [vmem:[%s2221_s12 + $0x1c] ss:$36 sps:$4 sm:$0xff]   ;;  %v2029_v23 = vld [vmem:[%s2221_s12 + $0x64] ss:$36 sps:$4 sm:$0xff]  }
  0x23   : > { %1748 = vmatprep.subr.bf16.mxu1 %v1960_v29  ;;  %v2022_v18 = vld [vmem:[%s2221_s12 + $0x18] ss:$36 sps:$4 sm:$0xff]   ;;  %v2033_v26 = vld [vmem:[%s2428_s1 + $0x210] sm:$0xff]   ;;  %v2035_v27 = vld [vmem:[%s2221_s12 + $0xa4] ss:$36 sps:$4 sm:$0xff]  }
  0x24   : > { %v2027_v22 = vld [vmem:[%s2221_s12 + $0x5c] ss:$36 sps:$4 sm:$0xff]   ;;  %v2037_v28 = vld [vmem:[%s2221_s12 + $0xac] ss:$36 sps:$4 sm:$0xff]  }
  0x25   : > { %1709 = vmatpush3.bf16.msra.mxu0 %v1961_v30  ;;  %v2031_v24 = vld [vmem:[%s2221_s12 + $0x58] ss:$36 sps:$4 sm:$0xff]   ;;  %v2039_v30 = vld [vmem:[%s2221_s12 + $0xa0] ss:$36 sps:$4 sm:$0xff]   ;;  %v2043_v33 = vld [vmem:[%s2221_s12 + $0xec] ss:$36 sps:$4 sm:$0xff]  }
  0x26   : > { %1749 = vmatpush3.bf16.msra.mxu1 %v1962_v31  ;;  %1774 = vmatprep.subr.bf16.mxu0 %v1969_v36  ;;  %v2034_v29 = vld [vmem:[%s2428_s1 + $0x218] sm:$0xff]   ;;  %v2040_v31 = vld [vmem:[%s2221_s12 + $0xa8] ss:$36 sps:$4 sm:$0xff]  }
  0x27   : > { %1814 = vmatprep.subr.bf16.mxu1 %v1970_v37  ;;  %v2042_v35 = vld [vmem:[%s2428_s1 + $0x228] sm:$0xff]   ;;  %v2049_v37 = vld [vmem:[%s2428_s1 + $0x230] sm:$0xff]  }
  0x28   : > { %1129 = vmatmul.mubr.bf16.vlgmr.msra.gmra.mrb[0].mxu0 %v1963_v32  ;;  %v2041_v32 = vld [vmem:[%s2428_s1 + $0x220] sm:$0xff]   ;;  %v2047_v36 = vld [vmem:[%s2221_s12 + $0xe8] ss:$36 sps:$4 sm:$0xff]  }
  0x29   : > { %1194 = vmatmul.mubr.bf16.vlgmr.msra.gmra.mrb[0].mxu1 %v1966_v34  ;;  %1775 = vmatpush3.bf16.msra.mxu0 %v1971_v38  ;;  %v2045_v34 = vld [vmem:[%s2221_s12 + $0xf4] ss:$36 sps:$4 sm:$0xff]  }
  0x2a   : > { %1815 = vmatpush3.bf16.msra.mxu1 %v1972_v39  ;;  %1776 = vmatprep.subr.bf16.mxu0 %v1973_v40  ;;  %v2048_v38 = vld [vmem:[%s2221_s12 + $0xf0] ss:$36 sps:$4 sm:$0xff]   ;;  %v2051_v39 = vld [vmem:[%s2221_s12 + $0x20] ss:$36 sps:$4 sm:$0xff]  }
  0x2b   : > { %1816 = vmatprep.subr.bf16.mxu1 %v1974_v41  ;;  %1136 = vmatprep.mubr.bf16.mxu0 %v1977_v44  ;;  %v2052_v40 = vld [vmem:[%s2221_s12 + $0xb0] ss:$36 sps:$4 sm:$0xff]   ;;  %v2050_v41 = vld [vmem:[%s2428_s1 + $0x238] sm:$0xff]  }
  0x2c   : > { %1201 = vmatprep.mubr.bf16.mxu1 %v1979_v45 }
  0x2d   : > { %1777 = vmatpush3.bf16.msra.mxu0 %v1975_v42  ;;  %v2053_v42 = vld [vmem:[%s2221_s12 + $0x68] ss:$36 sps:$4 sm:$0xff]  }
  0x2e   : > { %1817 = vmatpush3.bf16.msra.mxu1 %v1976_v43  ;;  %1778 = vmatprep.subr.bf16.mxu0 %v1983_v48  ;;  %v2054_v43 = vld [vmem:[%s2221_s12 + $0xf8] ss:$36 sps:$4 sm:$0xff]   ;;  %s1580_s12 = sshll.u32 %s2437_s27, 3 }
  0x2f   : > { %1818 = vmatprep.subr.bf16.mxu1 %v1984_v49  ;;  %s2394_s21 = scalar_lea.vmem %s2430_s3, %s1580_s12  ;;  %s2402_s23 = scalar_lea.vmem %s2431_s4, %s1580_s12 }
  0x30   : > { %1137 = vmatmul.mubr.bf16.gmra.mrb[4].mxu0 %v1981_v46  ;;  %v1583_v46 = vld [vmem:[%s2429_s2] ss:$0 sm:$0xff] }
  0x31   : > { %1202 = vmatmul.mubr.bf16.gmra.mrb[4].mxu1 %v1982_v47  ;;  %1779 = vmatpush3.bf16.msra.mxu0 %v1985_v50 }
  0x32   : > { %1819 = vmatpush3.bf16.msra.mxu1 %v1986_v51  ;;  %1780 = vmatprep.subr.bf16.mxu0 %v1987_v52 }
  0x33   : > { %1820 = vmatprep.subr.bf16.mxu1 %v1988_v53  ;;  %1144 = vmatprep.mubr.bf16.mxu0 %v1991_v56 }
  0x34   : > { %1209 = vmatprep.mubr.bf16.mxu1 %v1993_v57 }
  0x35   : > { %1781 = vmatpush3.bf16.msra.mxu0 %v1989_v54 }
  0x36   : > { %1821 = vmatpush3.bf16.msra.mxu1 %v1990_v55  ;;  %1782 = vmatprep.subr.bf16.mxu0 %v1997_v60 }
  0x37   : > { %1822 = vmatprep.subr.bf16.mxu1 %v1998_v61 }
  0x38   : > { %1145 = vmatmul.mubr.bf16.gmra.mrb[8].mxu0 %v1995_v58 }
  0x39   : > { %1210 = vmatmul.mubr.bf16.gmra.mrb[8].mxu1 %v1996_v59  ;;  %1783 = vmatpush3.bf16.msra.mxu0 %v1999_v62 }
  0x3a   : > { %1823 = vmatpush3.bf16.msra.mxu1 %v2000_v63  ;;  %1784 = vmatprep.subr.bf16.mxu0 %v2001_v0 }
  0x3b   : > { %1824 = vmatprep.subr.bf16.mxu1 %v2002_v1  ;;  %1152 = vmatprep.mubr.bf16.mxu0 %v2005_v4 }
  0x3c   : > { %1217 = vmatprep.mubr.bf16.mxu1 %v2007_v5 }
  0x3d   : > { %1785 = vmatpush3.bf16.msra.mxu0 %v2003_v2 }
  0x3e   : > { %1825 = vmatpush3.bf16.msra.mxu1 %v2004_v3  ;;  %1786 = vmatprep.subr.bf16.mxu0 %v2011_v8 }
  0x3f   : > { %1826 = vmatprep.subr.bf16.mxu1 %v2012_v9 }
  0x40   : > { %1153 = vmatmul.mubr.bf16.gmra.mrb[12].mxu0 %v2009_v6 }
  0x41   : > { %1218 = vmatmul.mubr.bf16.gmra.mrb[12].mxu1 %v2010_v7  ;;  %1787 = vmatpush3.bf16.msra.mxu0 %v2013_v10 }
  0x42   : > { %1827 = vmatpush3.bf16.msra.mxu1 %v2014_v11  ;;  %1788 = vmatprep.subr.bf16.mxu0 %v2015_v12 }
  0x43   : > { %1828 = vmatprep.subr.bf16.mxu1 %v2016_v13  ;;  %1258 = vmatprep.mubr.bf16.mxu0 %v2021_v17 }
  0x44   : > { %1323 = vmatprep.mubr.bf16.mxu1 %v2024_v19 }
  0x45   : > { %1789 = vmatpush3.bf16.msra.mxu0 %v2017_v14 }
  0x46   : > { %1829 = vmatpush3.bf16.msra.mxu1 %v2018_v15  ;;  %1866 = vmatprep.subr.bf16.mxu0 %v2025_v20 }
  0x47   : > { %1890 = vmatprep.subr.bf16.mxu1 %v2025_v20 }
  0x48   : > { %1259 = vmatmul.mubr.bf16.vlgmr.msra.gmra.mrb[16].mxu0 %v2019_v16 }
  0x49   : > { %1324 = vmatmul.mubr.bf16.vlgmr.msra.gmra.mrb[16].mxu1 %v2022_v18  ;;  %1867 = vmatpush3.bf16.msra.mxu0 %v2025_v20 }
  0x4a   : > { %1898 = vmatpush3.bf16.msra.mxu1 %v2025_v20  ;;  %1868 = vmatprep.subr.bf16.mxu0 %v2026_v21 }
  0x4b   : > { %1891 = vmatprep.subr.bf16.mxu1 %v2026_v21  ;;  %1266 = vmatprep.mubr.bf16.mxu0 %v2027_v22 }
  0x4c   : > { %1331 = vmatprep.mubr.bf16.mxu1 %v2029_v23 }
  0x4d   : > { %1869 = vmatpush3.bf16.msra.mxu0 %v2026_v21 }
  0x4e   : > { %1899 = vmatpush3.bf16.msra.mxu1 %v2026_v21  ;;  %1870 = vmatprep.subr.bf16.mxu0 %v2033_v26 }
  0x4f   : > { %1892 = vmatprep.subr.bf16.mxu1 %v2033_v26 }
  0x50   : > { %1267 = vmatmul.mubr.bf16.gmra.mrb[20].mxu0 %v2031_v24 }
  0x51   : > { %1332 = vmatmul.mubr.bf16.gmra.mrb[20].mxu1 %v2032_v25  ;;  %1274 = vmatprep.mubr.bf16.mxu0 %v2035_v27 }
  0x52   : > { %1871 = vmatpush3.bf16.msra.mxu0 %v2033_v26  ;;  %1339 = vmatprep.mubr.bf16.mxu1 %v2037_v28 }
  0x53   : > { %1900 = vmatpush3.bf16.msra.mxu1 %v2033_v26  ;;  %1872 = vmatprep.subr.bf16.mxu0 %v2034_v29 }
  0x54   : > { %1893 = vmatprep.subr.bf16.mxu1 %v2034_v29 }
  0x56   : > { %1873 = vmatpush3.bf16.msra.mxu0 %v2034_v29 }
  0x57   : > { %1901 = vmatpush3.bf16.msra.mxu1 %v2034_v29  ;;  %1874 = vmatprep.subr.bf16.mxu0 %v2041_v32 }
  0x58   : > { %1275 = vmatmul.mubr.bf16.gmra.mrb[24].mxu0 %v2039_v30  ;;  %1894 = vmatprep.subr.bf16.mxu1 %v2041_v32 }
  0x59   : > { %1340 = vmatmul.mubr.bf16.gmra.mrb[24].mxu1 %v2040_v31  ;;  %1282 = vmatprep.mubr.bf16.mxu0 %v2043_v33 }
  0x5a   : > { %1875 = vmatpush3.bf16.msra.mxu0 %v2041_v32  ;;  %1347 = vmatprep.mubr.bf16.mxu1 %v2045_v34 }
  0x5b   : > { %1902 = vmatpush3.bf16.msra.mxu1 %v2041_v32  ;;  %1876 = vmatprep.subr.bf16.mxu0 %v2042_v35 }
  0x5c   : > { %1895 = vmatprep.subr.bf16.mxu1 %v2042_v35 }
  0x5e   : > { %1877 = vmatpush3.bf16.msra.mxu0 %v2042_v35 }
  0x5f   : > { %1903 = vmatpush3.bf16.msra.mxu1 %v2042_v35  ;;  %1878 = vmatprep.subr.bf16.mxu0 %v2049_v37 }
  0x60   : > { %1283 = vmatmul.mubr.bf16.gmra.mrb[28].mxu0 %v2047_v36  ;;  %1896 = vmatprep.subr.bf16.mxu1 %v2049_v37 }
  0x61   : > { %1348 = vmatmul.mubr.bf16.gmra.mrb[28].mxu1 %v2048_v38  ;;  %1882 = vmatprep.mubr.bf16.mxu0 %v2051_v39 }
  0x62   : > { %1879 = vmatpush3.bf16.msra.mxu0 %v2049_v37  ;;  %1886 = vmatprep.mubr.bf16.mxu1 %v2052_v40 }
  0x63   : > { %1904 = vmatpush3.bf16.msra.mxu1 %v2049_v37  ;;  %1880 = vmatprep.subr.bf16.mxu0 %v2050_v41 }
  0x64   : > { %1897 = vmatprep.subr.bf16.mxu1 %v2050_v41 }
  0x66   : > { %1881 = vmatpush3.bf16.msra.mxu0 %v2050_v41 }
  0x67   : > { %1905 = vmatpush3.bf16.msra.mxu1 %v2050_v41 }
  0x69   : > { %1883 = vmatmul.mubr.bf16.vlgmr.msra.gmra.mrb[32].mxu0 %v2053_v42 }
  0x6a   : > { %1887 = vmatmul.mubr.bf16.vlgmr.msra.gmra.mrb[32].mxu1 %v2054_v43 }
  0xfb   : > { %v1710_v44 = vpop.f32.mrb[0].mxu0 }
  0xfc   : > { %v1750_v45 = vpop.f32.mrb[0].mxu1  ;;  %v1711_v47 = vpop.f32.mrb[1].mxu0 }
  0xfd   : > { %v1712_v48 = vadd.f32 %v1711_v47, %v1710_v44  ;;  %v1751_v49 = vpop.f32.mrb[1].mxu1  ;;  %v1713_v50 = vpop.f32.mrb[2].mxu0 }
  0xfe   : > { %v1752_v51 = vadd.f32 %v1751_v49, %v1750_v45  ;;  %v1753_v52 = vpop.f32.mrb[2].mxu1  ;;  %v1714_v53 = vpop.f32.mrb[3].mxu0 }
  0xff   : > { %v1131_v54 = vadd.f32 %v1712_v48, %v1583_v46  ;;  %v1715_v55 = vadd.f32 %v1714_v53, %v1713_v50  ;;  %v1754_v56 = vpop.f32.mrb[3].mxu1 }
 0x100   : > { %v1755_v57 = vadd.f32 %v1754_v56, %v1753_v52 }
 0x101   : > { %v1196_v58 = vadd.f32 %v1752_v51, %v1131_v54  ;;  %v1134_v59 = vadd.f32 %v1715_v55, %v1583_v46 }
 0x103   : > { %v1199_v60 = vadd.f32 %v1755_v57, %v1134_v59  ;;  %v1716_v61 = vpop.f32.mrb[4].mxu0 }
 0x104   : > { %v1756_v62 = vpop.f32.mrb[4].mxu1  ;;  %v1717_v63 = vpop.f32.mrb[5].mxu0 }
 0x105   : > { %v1718_v0 = vadd.f32 %v1717_v63, %v1716_v61  ;;  %v1757_v1 = vpop.f32.mrb[5].mxu1  ;;  %v1719_v2 = vpop.f32.mrb[6].mxu0 }
 0x106   : > { %v1758_v3 = vadd.f32 %v1757_v1, %v1756_v62  ;;  %v1759_v4 = vpop.f32.mrb[6].mxu1  ;;  %v1720_v5 = vpop.f32.mrb[7].mxu0 }
 0x107   : > { %v1139_v6 = vadd.f32 %v1718_v0, %v1583_v46  ;;  %v1721_v7 = vadd.f32 %v1720_v5, %v1719_v2  ;;  %v1760_v8 = vpop.f32.mrb[7].mxu1 }
 0x108   : > { %v1761_v9 = vadd.f32 %v1760_v8, %v1759_v4 }
 0x109   : > { %v1204_v10 = vadd.f32 %v1758_v3, %v1139_v6  ;;  %v1142_v11 = vadd.f32 %v1721_v7, %v1583_v46 }
 0x10b   : > { %v1207_v12 = vadd.f32 %v1761_v9, %v1142_v11  ;;  %v1722_v13 = vpop.f32.mrb[8].mxu0 }
 0x10c   : > { %v1762_v14 = vpop.f32.mrb[8].mxu1  ;;  %v1723_v15 = vpop.f32.mrb[9].mxu0 }
 0x10d   : > { %v1724_v16 = vadd.f32 %v1723_v15, %v1722_v13  ;;  %v1763_v17 = vpop.f32.mrb[9].mxu1  ;;  %v1725_v18 = vpop.f32.mrb[10].mxu0 }
 0x10e   : > { %v1764_v19 = vadd.f32 %v1763_v17, %v1762_v14  ;;  %v1765_v20 = vpop.f32.mrb[10].mxu1  ;;  %v1726_v21 = vpop.f32.mrb[11].mxu0 }
 0x10f   : > { %v1147_v22 = vadd.f32 %v1724_v16, %v1583_v46  ;;  %v1727_v23 = vadd.f32 %v1726_v21, %v1725_v18  ;;  %v1766_v24 = vpop.f32.mrb[11].mxu1 }
 0x110   : > { %v1767_v25 = vadd.f32 %v1766_v24, %v1765_v20 }
 0x111   : > { %v1212_v26 = vadd.f32 %v1764_v19, %v1147_v22  ;;  %v1150_v27 = vadd.f32 %v1727_v23, %v1583_v46 }
 0x113   : > { %v1215_v28 = vadd.f32 %v1767_v25, %v1150_v27  ;;  %v1728_v29 = vpop.f32.mrb[12].mxu0 }
 0x114   : > { %v1768_v30 = vpop.f32.mrb[12].mxu1  ;;  %v1729_v31 = vpop.f32.mrb[13].mxu0 }
 0x115   : > { %v1769_v32 = vpop.f32.mrb[13].mxu1  ;;  %v1730_v33 = vadd.f32 %v1729_v31, %v1728_v29  ;;  %v1731_v35 = vpop.f32.mrb[14].mxu0 }
 0x116   : > { %v1770_v34 = vadd.f32 %v1769_v32, %v1768_v30  ;;  %v1771_v36 = vpop.f32.mrb[14].mxu1  ;;  %v1732_v37 = vpop.f32.mrb[15].mxu0 }
 0x117   : > { %v1772_v38 = vpop.f32.mrb[15].mxu1  ;;  %v1155_v39 = vadd.f32 %v1730_v33, %v1583_v46  ;;  %v1733_v40 = vadd.f32 %v1732_v37, %v1731_v35 }
 0x118   : > { %v1773_v41 = vadd.f32 %v1772_v38, %v1771_v36 }
 0x119   : > { %v1220_v42 = vadd.f32 %v1770_v34, %v1155_v39  ;;  %v1158_v43 = vadd.f32 %v1733_v40, %v1583_v46 }
 0x11b   : > { %v1223_v44 = vadd.f32 %v1773_v41, %v1158_v43  ;;  %v1790_v45 = vpop.f32.mrb[16].mxu0 }
 0x11c   : > { %v1791_v47 = vpop.f32.mrb[17].mxu0  ;;  %v1830_v48 = vpop.f32.mrb[16].mxu1 }
 0x11d   : > { %v1792_v49 = vadd.f32 %v1791_v47, %v1790_v45  ;;  %v1793_v50 = vpop.f32.mrb[18].mxu0  ;;  %v1831_v51 = vpop.f32.mrb[17].mxu1 }
 0x11e   : > { %v1794_v52 = vpop.f32.mrb[19].mxu0  ;;  %v1832_v54 = vadd.f32 %v1831_v51, %v1830_v48  ;;  %v1833_v55 = vpop.f32.mrb[18].mxu1  ;;  %v1431_v51 = vld [vmem:[%s2394_s21 + $0x10] sm:$0xff] }
 0x11f   : > { %v1261_v53 = vadd.f32 %v1792_v49, %v1196_v58  ;;  %v1795_v56 = vadd.f32 %v1794_v52, %v1793_v50  ;;  %v1834_v57 = vpop.f32.mrb[19].mxu1 }
 0x120   : > { %v1835_v61 = vadd.f32 %v1834_v57, %v1833_v55  ;;  %v1429_v57 = vld [vmem:[%s2394_s21] sm:$0xff] }
 0x121   : > { %v1264_v59 = vadd.f32 %v1795_v56, %v1199_v60  ;;  %v1326_v62 = vadd.f32 %v1832_v54, %v1261_v53  ;;  %v1435_v56 = vld [vmem:[%s2394_s21 + $0x30] sm:$0xff] }
 0x123   : > { %v1796_v63 = vpop.f32.mrb[20].mxu0  ;;  %v2388_v0 = vadd.f32 %v1835_v61, %v1264_v59 }
 0x124   : > { %v1797_v46 = vpop.f32.mrb[21].mxu0  ;;  %v1836_v1 = vpop.f32.mrb[20].mxu1 }
 0x125   : > { %v1798_v2 = vadd.f32 %v1797_v46, %v1796_v63  ;;  %v1799_v3 = vpop.f32.mrb[22].mxu0  ;;  %v1837_v4 = vpop.f32.mrb[21].mxu1 }
 0x126   : > { %v1800_v5 = vpop.f32.mrb[23].mxu0  ;;  %v1838_v7 = vadd.f32 %v1837_v4, %v1836_v1  ;;  %v1839_v8 = vpop.f32.mrb[22].mxu1 }
 0x127   : > { %v1269_v6 = vadd.f32 %v1798_v2, %v1204_v10  ;;  %v1801_v58 = vadd.f32 %v1800_v5, %v1799_v3  ;;  %v1840_v9 = vpop.f32.mrb[23].mxu1  ;;  %v1432_v3 = vld [vmem:[%s2394_s21 + $0x18] sm:$0xff] }
 0x128   : > { %v1841_v13 = vadd.f32 %v1840_v9, %v1839_v8  ;;  %v1436_v9 = vld [vmem:[%s2394_s21 + $0x38] sm:$0xff] }
 0x129   : > { %v1272_v11 = vadd.f32 %v1801_v58, %v1207_v12  ;;  %v1334_v14 = vadd.f32 %v1838_v7, %v1269_v6 }
 0x12b   : > { %v1802_v60 = vpop.f32.mrb[24].mxu0  ;;  %v1337_v15 = vadd.f32 %v1841_v13, %v1272_v11  ;;  %v1430_v11 = vld [vmem:[%s2394_s21 + $0x8] sm:$0xff] }
 0x12c   : > { %v1803_v16 = vpop.f32.mrb[25].mxu0  ;;  %v1842_v17 = vpop.f32.mrb[24].mxu1 }
 0x12d   : > { %v1804_v18 = vadd.f32 %v1803_v16, %v1802_v60  ;;  %v1805_v19 = vpop.f32.mrb[26].mxu0  ;;  %v1843_v20 = vpop.f32.mrb[25].mxu1 }
 0x12e   : > { %v1806_v21 = vpop.f32.mrb[27].mxu0  ;;  %v1844_v23 = vadd.f32 %v1843_v20, %v1842_v17  ;;  %v1845_v24 = vpop.f32.mrb[26].mxu1  ;;  %v1434_v17 = vld [vmem:[%s2394_s21 + $0x28] sm:$0xff] }
 0x12f   : > { %v1277_v22 = vadd.f32 %v1804_v18, %v1212_v26  ;;  %v1807_v25 = vadd.f32 %v1806_v21, %v1805_v19  ;;  %v1846_v10 = vpop.f32.mrb[27].mxu1 }
 0x130   : > { %v1847_v29 = vadd.f32 %v1846_v10, %v1845_v24 }
 0x131   : > { %v1280_v27 = vadd.f32 %v1807_v25, %v1215_v28  ;;  %v1342_v30 = vadd.f32 %v1844_v23, %v1277_v22 }
 0x133   : > { %v1808_v12 = vpop.f32.mrb[28].mxu0  ;;  %v1345_v31 = vadd.f32 %v1847_v29, %v1280_v27 }
 0x134   : > { %v1809_v32 = vpop.f32.mrb[29].mxu0  ;;  %v1848_v33 = vpop.f32.mrb[28].mxu1 }
 0x135   : > { %v1810_v34 = vadd.f32 %v1809_v32, %v1808_v12  ;;  %v1811_v35 = vpop.f32.mrb[30].mxu0  ;;  %v1849_v36 = vpop.f32.mrb[29].mxu1 }
 0x136   : > { %v1812_v37 = vpop.f32.mrb[31].mxu0  ;;  %v1850_v39 = vadd.f32 %v1849_v36, %v1848_v33  ;;  %v1851_v40 = vpop.f32.mrb[30].mxu1 }
 0x137   : > { %v1285_v38 = vadd.f32 %v1810_v34, %v1220_v42  ;;  %v1813_v26 = vadd.f32 %v1812_v37, %v1811_v35  ;;  %v1852_v41 = vpop.f32.mrb[31].mxu1 }
 0x138   : > { %v1853_v45 = vadd.f32 %v1852_v41, %v1851_v40 }
 0x139   : > { %v1288_v43 = vadd.f32 %v1813_v26, %v1223_v44  ;;  %v1350_v28 = vadd.f32 %v1850_v39, %v1285_v38 }
 0x13b   : > { %v1353_v47 = vadd.f32 %v1853_v45, %v1288_v43 }
 0x13c   : > { %v1884_v48 = vpop.f32.mrb[32].mxu0 }
 0x13d   : > { %v1399_v49 = vadd.f32 %v1884_v48, %v1334_v14  ;;  %v1888_v42 = vpop.f32.mrb[32].mxu1  ;;  %v1390_v50 = vpop.f32.mrb[33].mxu0 }
 0x13e   : > { %v1415_v44 = vadd.f32 %v1888_v42, %v1350_v28  ;;  %v1391_v52 = vadd.f32 %v1390_v50, %v1326_v62  ;;  %v1406_v53 = vpop.f32.mrb[33].mxu1  ;;  %v1885_v54 = vpop.f32.mrb[34].mxu0  ;;  %v1433_v62 = vld [vmem:[%s2394_s21 + $0x20] sm:$0xff] }
 0x13f   : > { %v1423_v55 = vmax.f32 %v1399_v49, 0.0  ;;  %v1407_v59 = vadd.f32 %v1406_v53, %v1342_v30  ;;  %v1402_v61 = vadd.f32 %v1885_v54, %v1337_v15  ;;  %v1889_v63 = vpop.f32.mrb[34].mxu1  ;;  %v1393_v46 = vpop.f32.mrb[35].mxu0 }
 0x140   : > { %v1427_v1 = vmax.f32 %v1415_v44, 0.0  ;;  %v1421_v2 = vmax.f32 %v1391_v52, 0.0  ;;  %v1418_v4 = vadd.f32 %v1889_v63, %v1353_v47  ;;  %v1394_v5 = vadd.f32 %v1393_v46, %v2388_v0  ;;  %v1409_v6 = vpop.f32.mrb[35].mxu1 }
 0x141   : > { %v1439_v7 = vadd.f32 %v1431_v51, %v1423_v55  ;;  %v1425_v8 = vmax.f32 %v1407_v59, 0.0  ;;  %v1424_v58 = vmax.f32 %v1402_v61, 0.0  ;;  %v1410_v13 = vadd.f32 %v1409_v6, %v1345_v31 }
 0x142   : > { %v1443_v14 = vadd.f32 %v1435_v56, %v1427_v1  ;;  %v1437_v60 = vadd.f32 %v1429_v57, %v1421_v2  ;;  %v1428_v15 = vmax.f32 %v1418_v4, 0.0  ;;  %v1422_v16 = vmax.f32 %v1394_v5, 0.0 }
 0x143   : > { %1447 = vst [vmem:[%s2402_s23 + $0x10] sm:$0xff] %v1439_v7  ;;  %v1441_v0 = vadd.f32 %v1433_v62, %v1425_v8  ;;  %v1440_v18 = vadd.f32 %v1432_v3, %v1424_v58  ;;  %v1426_v19 = vmax.f32 %v1410_v13, 0.0 }
 0x144   : > { %1451 = vst [vmem:[%s2402_s23 + $0x30] sm:$0xff] %v1443_v14  ;;  %1445 = vst [vmem:[%s2402_s23] sm:$0xff] %v1437_v60  ;;  %v1444_v20 = vadd.f32 %v1436_v9, %v1428_v15  ;;  %v1438_v21 = vadd.f32 %v1430_v11, %v1422_v16 }
 0x145   : > { %1449 = vst [vmem:[%s2402_s23 + $0x20] sm:$0xff] %v1441_v0  ;;  %1448 = vst [vmem:[%s2402_s23 + $0x18] sm:$0xff] %v1440_v18  ;;  %v1442_v22 = vadd.f32 %v1434_v17, %v1426_v19 }
 0x146   : > { %1452 = vst [vmem:[%s2402_s23 + $0x38] sm:$0xff] %v1444_v20  ;;  %1446 = vst [vmem:[%s2402_s23 + $0x8] sm:$0xff] %v1438_v21 }
 0x147   : > { %1450 = vst [vmem:[%s2402_s23 + $0x28] sm:$0xff] %v1442_v22 }
 0x148 PF: > { %s14_s17 = sadd.s32 1, %s2077_s17   ;;  %s2432_s15 = smov %s2073_s16 }
 0x149   : > { %p11_p5 = scmp.ge.s32.totalorder %s14_s17, 4   ;;  %s2433_s16 = smov %s2435_s18 }
 0x14b   :  { %13 = sbr.rel (!%p11_p5) target bundleno = 2 (0x2), region = 75 }

// kernel: forward.9
= control target key start
LH: loop header
LB: loop body
LE: loop exit
PB: predicated region body
PF: predicated region fallthrough
CT: control target
= control target key end

     0   :  { %s2772_s12 = smov 0   ;;  %s2774_s13 = smov 0   ;;  %s3306_s0 = inlined_call_operand.vmem [shape: bf16[128,1152], index: 0, kind: input, shape index: {}]   ;;  %s3307_s1 = inlined_call_operand.vmem [shape: bf16[1152,256], index: 1, kind: input, shape index: {}]   ;;  %s3308_s2 = inlined_call_operand.vmem [shape: f32[1,256], index: 2, kind: input, shape index: {}]   ;;  %s3309_s3 = inlined_call_operand.vmem [shape: f32[128,256], index: 3, kind: output, shape index: {}]  }
   0x1   :  { %s2776_s14 = smov 0   ;;  %s2778_s15 = smov 0  }
   0x2   :  { %s2780_s16 = smov 0   ;;  %s2782_s17 = smov 0  }
   0x3   :  { %s2784_s18 = smov 0   ;;  %s2786_s19 = smov 0  }
   0x4   :  { %s2788_s20 = smov 0  }
   0x5 LB: > { %s2144_s21 = sadd.s32 4294967295, %s2750_s20   ;;  %s22_s22 = sadd.s32 1, %s2742_s18  ;;  %s2750_s20 = sphi %s2788_s20, %s13_s20   ;;  %s2746_s19 = sphi %s2786_s19, %s3318_s19   ;;  %s2742_s18 = sphi %s2784_s18, %s3317_s18   ;;  %s2738_s17 = sphi %s2782_s17, %s3316_s17   ;;  %s2734_s16 = sphi %s2780_s16, %s3315_s16   ;;  %s2730_s15 = sphi %s2778_s15, %s3314_s15   ;;  %s2726_s14 = sphi %s2776_s14, %s3313_s14   ;;  %s2722_s13 = sphi %s2774_s13, %s3312_s13   ;;  %s2718_s12 = sphi %s2772_s12, %s3311_s12  }
   0x6   : > { %p23_p0 = scmp.ge.s32.totalorder %s22_s22, 2  ;;  %s25_s23 = sadd.s32 1, %s2746_s19 }
   0x7   : > { %s58_s24 = sadd.s32 1, %s2730_s15  ;;  %p65_p1 = scmp.ne.s32.totalorder %s2730_s15, %s2726_s14 }
   0x8   : > { %s3320_s22 = smov (%p23_p0, %s22_s22), 0  ;;  %s3322_s23 = smov (!%p23_p0, %s25_s23), %s2746_s19 }
   0x9   : > { %s55_s25 = ssub.s32 %s2742_s18, %s3320_s22  ;;  %p66_p2 = scmp.eq.s32.totalorder %s2750_s20, 0 }
   0xa   : > { %p27_p3 = scmp.ge.s32.totalorder %s3322_s23, 2  ;;  %p56_p4 = scmp.eq.s32.totalorder %s55_s25, 0 }
   0xb   : > { %p67_p5 = por %p66_p2, %p65_p1  ;;  %s112_s26 = sadd.s32 1, %s2722_s13 }
   0xc   : > { %s3324_s23 = smov (%p27_p3, %s3322_s23), 0  ;;  %p122_p6 = scmp.ne.s32.totalorder %s2722_s13, %s2718_s12 }
   0xd   : > { %s2833_s27 = scalar_select %p56_p4, %s2730_s15, %s58_s24  }
   0xe   : > { %s107_s28 = ssub.s32 %s2746_s19, %s3324_s23  ;;  %p123_p7 = scmp.eq.s32.totalorder %s2144_s21, 3 }
   0xf   : > { %s109_s29 = sor.u32 %s107_s28, %s55_s25  ;;  %p2147_p10 = scmp.ge.s32.totalorder %s2750_s20, 4 }
  0x10   : > { %p110_p8 = scmp.eq.s32.totalorder %s109_s29, 0  ;;  %p2839_p9 = por %p123_p7, %p122_p6 }
  0x11   : > { %145 = sbr.rel (%p2147_p10) target bundleno = 124 (0x7c), region = 16 }
  0x12   : > { %s2844_s4 = scalar_select %p110_p8, %s2722_s13, %s112_s26  }
  0x18   : > { %158 = sbr.rel (!%p67_p5) target bundleno = 124 (0x7c), region = 24  ;;  %s160_s5 = sand.u32 (%p67_p5), 1, %s2730_s15  }
  0x19   : > { %s2148_s6 = sshll.u32 (%p67_p5), %s2742_s18, 2  ;;  %s2481_s7 = smul.u32 (%p67_p5), 576, %s160_s5 }
  0x1a   : > { %s2852_s10 = scalar_lea.vmem (%p67_p5), %s3307_s1, %s2148_s6 }
  0x1b   : > { %v180_v0 = vld [vmem:[%s2852_s10] sm:$0xf] (%p67_p5)  ;;  %v182_v1 = vld [vmem:[%s2852_s10 + $0x8] sm:$0xf] (%p67_p5)  ;;  %v184_v2 = vld [vmem:[%s2852_s10 + $0x10] sm:$0xf] (%p67_p5) }
  0x1c   : > { %v186_v3 = vld [vmem:[%s2852_s10 + $0x18] sm:$0xf] (%p67_p5)  ;;  %v188_v4 = vld [vmem:[%s2852_s10 + $0x20] sm:$0xf] (%p67_p5)  ;;  %s2859_s11 = scalar_lea.vmem (%p67_p5), [#allocation2], %s2481_s7 }
  0x1d   : > { %181 = vst [vmem:[%s2859_s11] sm:$0xf] (%p67_p5), %v180_v0  ;;  %183 = vst [vmem:[%s2859_s11 + $0x4] sm:$0xf] (%p67_p5), %v182_v1  ;;  %v190_v5 = vld [vmem:[%s2852_s10 + $0x28] sm:$0xf] (%p67_p5) }
  0x1e   : > { %185 = vst [vmem:[%s2859_s11 + $0x8] sm:$0xf] (%p67_p5), %v184_v2  ;;  %187 = vst [vmem:[%s2859_s11 + $0xc] sm:$0xf] (%p67_p5), %v186_v3  ;;  %v192_v6 = vld [vmem:[%s2852_s10 + $0x30] sm:$0xf] (%p67_p5) }
  0x1f   : > { %189 = vst [vmem:[%s2859_s11 + $0x10] sm:$0xf] %v188_v4  ;;  %v194_v7 = vld [vmem:[%s2852_s10 + $0x38] sm:$0xf]  ;;  %191 = vst [vmem:[%s2859_s11 + $0x14] sm:$0xf] %v190_v5 }
  0x20   : > { %193 = vst [vmem:[%s2859_s11 + $0x18] sm:$0xf] %v192_v6  ;;  %195 = vst [vmem:[%s2859_s11 + $0x1c] sm:$0xf] %v194_v7  ;;  %v196_v8 = vld [vmem:[%s2852_s10 + $0x40] sm:$0xf] }
  0x21   : > { %v198_v9 = vld [vmem:[%s2852_s10 + $0x48] sm:$0xf]  ;;  %v200_v10 = vld [vmem:[%s2852_s10 + $0x50] sm:$0xf]  ;;  %197 = vst [vmem:[%s2859_s11 + $0x20] sm:$0xf] %v196_v8 }
  0x22   : > { %199 = vst [vmem:[%s2859_s11 + $0x24] sm:$0xf] %v198_v9  ;;  %201 = vst [vmem:[%s2859_s11 + $0x28] sm:$0xf] %v200_v10  ;;  %v202_v11 = vld [vmem:[%s2852_s10 + $0x58] sm:$0xf] }
  0x23   : > { %v204_v12 = vld [vmem:[%s2852_s10 + $0x60] sm:$0xf]  ;;  %v206_v13 = vld [vmem:[%s2852_s10 + $0x68] sm:$0xf]  ;;  %203 = vst [vmem:[%s2859_s11 + $0x2c] sm:$0xf] %v202_v11 }
  0x24   : > { %205 = vst [vmem:[%s2859_s11 + $0x30] sm:$0xf] %v204_v12  ;;  %207 = vst [vmem:[%s2859_s11 + $0x34] sm:$0xf] %v206_v13  ;;  %v208_v14 = vld [vmem:[%s2852_s10 + $0x70] sm:$0xf] }
  0x25   : > { %v210_v15 = vld [vmem:[%s2852_s10 + $0x78] sm:$0xf]  ;;  %v212_v16 = vld [vmem:[%s2852_s10 + $0x80] sm:$0xf]  ;;  %209 = vst [vmem:[%s2859_s11 + $0x38] sm:$0xf] %v208_v14 }
  0x26   : > { %211 = vst [vmem:[%s2859_s11 + $0x3c] sm:$0xf] %v210_v15  ;;  %213 = vst [vmem:[%s2859_s11 + $0x40] sm:$0xf] %v212_v16  ;;  %v214_v17 = vld [vmem:[%s2852_s10 + $0x88] sm:$0xf] }
  0x27   : > { %v216_v18 = vld [vmem:[%s2852_s10 + $0x90] sm:$0xf]  ;;  %v218_v19 = vld [vmem:[%s2852_s10 + $0x98] sm:$0xf]  ;;  %215 = vst [vmem:[%s2859_s11 + $0x44] sm:$0xf] %v214_v17 }
  0x28   : > { %217 = vst [vmem:[%s2859_s11 + $0x48] sm:$0xf] %v216_v18  ;;  %219 = vst [vmem:[%s2859_s11 + $0x4c] sm:$0xf] %v218_v19  ;;  %v220_v20 = vld [vmem:[%s2852_s10 + $0xa0] sm:$0xf] }
  0x29   : > { %v222_v21 = vld [vmem:[%s2852_s10 + $0xa8] sm:$0xf]  ;;  %v224_v22 = vld [vmem:[%s2852_s10 + $0xb0] sm:$0xf]  ;;  %221 = vst [vmem:[%s2859_s11 + $0x50] sm:$0xf] %v220_v20 }
  0x2a   : > { %223 = vst [vmem:[%s2859_s11 + $0x54] sm:$0xf] %v222_v21  ;;  %225 = vst [vmem:[%s2859_s11 + $0x58] sm:$0xf] %v224_v22  ;;  %v226_v23 = vld [vmem:[%s2852_s10 + $0xb8] sm:$0xf] }
  0x2b   : > { %v228_v24 = vld [vmem:[%s2852_s10 + $0xc0] sm:$0xf]  ;;  %v230_v25 = vld [vmem:[%s2852_s10 + $0xc8] sm:$0xf]  ;;  %227 = vst [vmem:[%s2859_s11 + $0x5c] sm:$0xf] %v226_v23 }
  0x2c   : > { %229 = vst [vmem:[%s2859_s11 + $0x60] sm:$0xf] %v228_v24  ;;  %231 = vst [vmem:[%s2859_s11 + $0x64] sm:$0xf] %v230_v25  ;;  %v232_v26 = vld [vmem:[%s2852_s10 + $0xd0] sm:$0xf] }
  0x2d   : > { %v234_v27 = vld [vmem:[%s2852_s10 + $0xd8] sm:$0xf]  ;;  %v236_v28 = vld [vmem:[%s2852_s10 + $0xe0] sm:$0xf]  ;;  %233 = vst [vmem:[%s2859_s11 + $0x68] sm:$0xf] %v232_v26 }
  0x2e   : > { %235 = vst [vmem:[%s2859_s11 + $0x6c] sm:$0xf] %v234_v27  ;;  %237 = vst [vmem:[%s2859_s11 + $0x70] sm:$0xf] %v236_v28  ;;  %v238_v29 = vld [vmem:[%s2852_s10 + $0xe8] sm:$0xf] }
  0x2f   : > { %v240_v30 = vld [vmem:[%s2852_s10 + $0xf0] sm:$0xf]  ;;  %v242_v31 = vld [vmem:[%s2852_s10 + $0xf8] sm:$0xf]  ;;  %239 = vst [vmem:[%s2859_s11 + $0x74] sm:$0xf] %v238_v29 }
  0x30   : > { %241 = vst [vmem:[%s2859_s11 + $0x78] sm:$0xf] %v240_v30  ;;  %243 = vst [vmem:[%s2859_s11 + $0x7c] sm:$0xf] %v242_v31  ;;  %v244_v32 = vld [vmem:[%s2852_s10 + $0x100] sm:$0xf] }
  0x31   : > { %v246_v33 = vld [vmem:[%s2852_s10 + $0x108] sm:$0xf]  ;;  %v248_v34 = vld [vmem:[%s2852_s10 + $0x110] sm:$0xf]  ;;  %245 = vst [vmem:[%s2859_s11 + $0x80] sm:$0xf] %v244_v32 }
  0x32   : > { %247 = vst [vmem:[%s2859_s11 + $0x84] sm:$0xf] %v246_v33  ;;  %249 = vst [vmem:[%s2859_s11 + $0x88] sm:$0xf] %v248_v34  ;;  %v250_v35 = vld [vmem:[%s2852_s10 + $0x118] sm:$0xf] }
  0x33   : > { %v252_v36 = vld [vmem:[%s2852_s10 + $0x120] sm:$0xf]  ;;  %v254_v37 = vld [vmem:[%s2852_s10 + $0x128] sm:$0xf]  ;;  %251 = vst [vmem:[%s2859_s11 + $0x8c] sm:$0xf] %v250_v35 }
  0x34   : > { %253 = vst [vmem:[%s2859_s11 + $0x90] sm:$0xf] %v252_v36  ;;  %255 = vst [vmem:[%s2859_s11 + $0x94] sm:$0xf] %v254_v37  ;;  %v256_v38 = vld [vmem:[%s2852_s10 + $0x130] sm:$0xf] }
  0x35   : > { %v258_v39 = vld [vmem:[%s2852_s10 + $0x138] sm:$0xf]  ;;  %v260_v40 = vld [vmem:[%s2852_s10 + $0x140] sm:$0xf]  ;;  %257 = vst [vmem:[%s2859_s11 + $0x98] sm:$0xf] %v256_v38 }
  0x36   : > { %259 = vst [vmem:[%s2859_s11 + $0x9c] sm:$0xf] %v258_v39  ;;  %261 = vst [vmem:[%s2859_s11 + $0xa0] sm:$0xf] %v260_v40  ;;  %v262_v41 = vld [vmem:[%s2852_s10 + $0x148] sm:$0xf] }
  0x37   : > { %v264_v42 = vld [vmem:[%s2852_s10 + $0x150] sm:$0xf]  ;;  %v266_v43 = vld [vmem:[%s2852_s10 + $0x158] sm:$0xf]  ;;  %263 = vst [vmem:[%s2859_s11 + $0xa4] sm:$0xf] %v262_v41 }
  0x38   : > { %265 = vst [vmem:[%s2859_s11 + $0xa8] sm:$0xf] %v264_v42  ;;  %267 = vst [vmem:[%s2859_s11 + $0xac] sm:$0xf] %v266_v43  ;;  %v268_v44 = vld [vmem:[%s2852_s10 + $0x160] sm:$0xf] }
  0x39   : > { %v270_v45 = vld [vmem:[%s2852_s10 + $0x168] sm:$0xf]  ;;  %v272_v46 = vld [vmem:[%s2852_s10 + $0x170] sm:$0xf]  ;;  %269 = vst [vmem:[%s2859_s11 + $0xb0] sm:$0xf] %v268_v44 }
  0x3a   : > { %271 = vst [vmem:[%s2859_s11 + $0xb4] sm:$0xf] %v270_v45  ;;  %273 = vst [vmem:[%s2859_s11 + $0xb8] sm:$0xf] %v272_v46  ;;  %v274_v47 = vld [vmem:[%s2852_s10 + $0x178] sm:$0xf] }
  0x3b   : > { %v276_v48 = vld [vmem:[%s2852_s10 + $0x180] sm:$0xf]  ;;  %v278_v49 = vld [vmem:[%s2852_s10 + $0x188] sm:$0xf]  ;;  %275 = vst [vmem:[%s2859_s11 + $0xbc] sm:$0xf] %v274_v47 }
  0x3c   : > { %277 = vst [vmem:[%s2859_s11 + $0xc0] sm:$0xf] %v276_v48  ;;  %279 = vst [vmem:[%s2859_s11 + $0xc4] sm:$0xf] %v278_v49  ;;  %v280_v50 = vld [vmem:[%s2852_s10 + $0x190] sm:$0xf] }
  0x3d   : > { %v282_v51 = vld [vmem:[%s2852_s10 + $0x198] sm:$0xf]  ;;  %v284_v52 = vld [vmem:[%s2852_s10 + $0x1a0] sm:$0xf]  ;;  %281 = vst [vmem:[%s2859_s11 + $0xc8] sm:$0xf] %v280_v50 }
  0x3e   : > { %283 = vst [vmem:[%s2859_s11 + $0xcc] sm:$0xf] %v282_v51  ;;  %285 = vst [vmem:[%s2859_s11 + $0xd0] sm:$0xf] %v284_v52  ;;  %v286_v53 = vld [vmem:[%s2852_s10 + $0x1a8] sm:$0xf] }
  0x3f   : > { %v288_v54 = vld [vmem:[%s2852_s10 + $0x1b0] sm:$0xf]  ;;  %v290_v55 = vld [vmem:[%s2852_s10 + $0x1b8] sm:$0xf]  ;;  %287 = vst [vmem:[%s2859_s11 + $0xd4] sm:$0xf] %v286_v53 }
  0x40   : > { %289 = vst [vmem:[%s2859_s11 + $0xd8] sm:$0xf] %v288_v54  ;;  %291 = vst [vmem:[%s2859_s11 + $0xdc] sm:$0xf] %v290_v55  ;;  %v292_v56 = vld [vmem:[%s2852_s10 + $0x1c0] sm:$0xf] }
  0x41   : > { %v294_v57 = vld [vmem:[%s2852_s10 + $0x1c8] sm:$0xf]  ;;  %v296_v58 = vld [vmem:[%s2852_s10 + $0x1d0] sm:$0xf]  ;;  %293 = vst [vmem:[%s2859_s11 + $0xe0] sm:$0xf] %v292_v56 }
  0x42   : > { %295 = vst [vmem:[%s2859_s11 + $0xe4] sm:$0xf] %v294_v57  ;;  %297 = vst [vmem:[%s2859_s11 + $0xe8] sm:$0xf] %v296_v58  ;;  %v298_v59 = vld [vmem:[%s2852_s10 + $0x1d8] sm:$0xf] }
  0x43   : > { %v300_v60 = vld [vmem:[%s2852_s10 + $0x1e0] sm:$0xf]  ;;  %v302_v61 = vld [vmem:[%s2852_s10 + $0x1e8] sm:$0xf]  ;;  %299 = vst [vmem:[%s2859_s11 + $0xec] sm:$0xf] %v298_v59 }
  0x44   : > { %301 = vst [vmem:[%s2859_s11 + $0xf0] sm:$0xf] %v300_v60  ;;  %303 = vst [vmem:[%s2859_s11 + $0xf4] sm:$0xf] %v302_v61  ;;  %v304_v62 = vld [vmem:[%s2852_s10 + $0x1f0] sm:$0xf] }
  0x45   : > { %v306_v63 = vld [vmem:[%s2852_s10 + $0x1f8] sm:$0xf]  ;;  %v308_v0 = vld [vmem:[%s2852_s10 + $0x200] sm:$0xf]  ;;  %305 = vst [vmem:[%s2859_s11 + $0xf8] sm:$0xf] %v304_v62 }
  0x46   : > { %307 = vst [vmem:[%s2859_s11 + $0xfc] sm:$0xf] %v306_v63  ;;  %309 = vst [vmem:[%s2859_s11 + $0x100] sm:$0xf] %v308_v0  ;;  %v310_v1 = vld [vmem:[%s2852_s10 + $0x208] sm:$0xf] }
  0x47   : > { %v312_v2 = vld [vmem:[%s2852_s10 + $0x210] sm:$0xf]  ;;  %v314_v3 = vld [vmem:[%s2852_s10 + $0x218] sm:$0xf]  ;;  %311 = vst [vmem:[%s2859_s11 + $0x104] sm:$0xf] %v310_v1 }
  0x48   : > { %313 = vst [vmem:[%s2859_s11 + $0x108] sm:$0xf] %v312_v2  ;;  %315 = vst [vmem:[%s2859_s11 + $0x10c] sm:$0xf] %v314_v3  ;;  %v316_v4 = vld [vmem:[%s2852_s10 + $0x220] sm:$0xf] }
  0x49   : > { %v318_v5 = vld [vmem:[%s2852_s10 + $0x228] sm:$0xf]  ;;  %v320_v6 = vld [vmem:[%s2852_s10 + $0x230] sm:$0xf]  ;;  %317 = vst [vmem:[%s2859_s11 + $0x110] sm:$0xf] %v316_v4 }
  0x4a   : > { %319 = vst [vmem:[%s2859_s11 + $0x114] sm:$0xf] %v318_v5  ;;  %321 = vst [vmem:[%s2859_s11 + $0x118] sm:$0xf] %v320_v6  ;;  %v322_v7 = vld [vmem:[%s2852_s10 + $0x238] sm:$0xf] }
  0x4b   : > { %v324_v8 = vld [vmem:[%s2852_s10 + $0x240] sm:$0xf]  ;;  %v326_v9 = vld [vmem:[%s2852_s10 + $0x248] sm:$0xf]  ;;  %323 = vst [vmem:[%s2859_s11 + $0x11c] sm:$0xf] %v322_v7 }
  0x4c   : > { %325 = vst [vmem:[%s2859_s11 + $0x120] sm:$0xf] %v324_v8  ;;  %327 = vst [vmem:[%s2859_s11 + $0x124] sm:$0xf] %v326_v9  ;;  %v328_v10 = vld [vmem:[%s2852_s10 + $0x250] sm:$0xf] }
  0x4d   : > { %v330_v11 = vld [vmem:[%s2852_s10 + $0x258] sm:$0xf]  ;;  %v332_v12 = vld [vmem:[%s2852_s10 + $0x260] sm:$0xf]  ;;  %329 = vst [vmem:[%s2859_s11 + $0x128] sm:$0xf] %v328_v10 }
  0x4e   : > { %331 = vst [vmem:[%s2859_s11 + $0x12c] sm:$0xf] %v330_v11  ;;  %333 = vst [vmem:[%s2859_s11 + $0x130] sm:$0xf] %v332_v12  ;;  %v334_v13 = vld [vmem:[%s2852_s10 + $0x268] sm:$0xf] }
  0x4f   : > { %v336_v14 = vld [vmem:[%s2852_s10 + $0x270] sm:$0xf]  ;;  %v338_v15 = vld [vmem:[%s2852_s10 + $0x278] sm:$0xf]  ;;  %335 = vst [vmem:[%s2859_s11 + $0x134] sm:$0xf] %v334_v13 }
  0x50   : > { %337 = vst [vmem:[%s2859_s11 + $0x138] sm:$0xf] %v336_v14  ;;  %339 = vst [vmem:[%s2859_s11 + $0x13c] sm:$0xf] %v338_v15  ;;  %v340_v16 = vld [vmem:[%s2852_s10 + $0x280] sm:$0xf] }
  0x51   : > { %v342_v17 = vld [vmem:[%s2852_s10 + $0x288] sm:$0xf]  ;;  %v344_v18 = vld [vmem:[%s2852_s10 + $0x290] sm:$0xf]  ;;  %341 = vst [vmem:[%s2859_s11 + $0x140] sm:$0xf] %v340_v16 }
  0x52   : > { %343 = vst [vmem:[%s2859_s11 + $0x144] sm:$0xf] %v342_v17  ;;  %345 = vst [vmem:[%s2859_s11 + $0x148] sm:$0xf] %v344_v18  ;;  %v346_v19 = vld [vmem:[%s2852_s10 + $0x298] sm:$0xf] }
  0x53   : > { %v348_v20 = vld [vmem:[%s2852_s10 + $0x2a0] sm:$0xf]  ;;  %v350_v21 = vld [vmem:[%s2852_s10 + $0x2a8] sm:$0xf]  ;;  %347 = vst [vmem:[%s2859_s11 + $0x14c] sm:$0xf] %v346_v19 }
  0x54   : > { %349 = vst [vmem:[%s2859_s11 + $0x150] sm:$0xf] %v348_v20  ;;  %351 = vst [vmem:[%s2859_s11 + $0x154] sm:$0xf] %v350_v21  ;;  %v352_v22 = vld [vmem:[%s2852_s10 + $0x2b0] sm:$0xf] }
  0x55   : > { %v354_v23 = vld [vmem:[%s2852_s10 + $0x2b8] sm:$0xf]  ;;  %v356_v24 = vld [vmem:[%s2852_s10 + $0x2c0] sm:$0xf]  ;;  %353 = vst [vmem:[%s2859_s11 + $0x158] sm:$0xf] %v352_v22 }
  0x56   : > { %355 = vst [vmem:[%s2859_s11 + $0x15c] sm:$0xf] %v354_v23  ;;  %357 = vst [vmem:[%s2859_s11 + $0x160] sm:$0xf] %v356_v24  ;;  %v358_v25 = vld [vmem:[%s2852_s10 + $0x2c8] sm:$0xf] }
  0x57   : > { %v360_v26 = vld [vmem:[%s2852_s10 + $0x2d0] sm:$0xf]  ;;  %v362_v27 = vld [vmem:[%s2852_s10 + $0x2d8] sm:$0xf]  ;;  %359 = vst [vmem:[%s2859_s11 + $0x164] sm:$0xf] %v358_v25 }
  0x58   : > { %361 = vst [vmem:[%s2859_s11 + $0x168] sm:$0xf] %v360_v26  ;;  %363 = vst [vmem:[%s2859_s11 + $0x16c] sm:$0xf] %v362_v27  ;;  %v364_v28 = vld [vmem:[%s2852_s10 + $0x2e0] sm:$0xf] }
  0x59   : > { %v366_v29 = vld [vmem:[%s2852_s10 + $0x2e8] sm:$0xf]  ;;  %v368_v30 = vld [vmem:[%s2852_s10 + $0x2f0] sm:$0xf]  ;;  %365 = vst [vmem:[%s2859_s11 + $0x170] sm:$0xf] %v364_v28 }
  0x5a   : > { %367 = vst [vmem:[%s2859_s11 + $0x174] sm:$0xf] %v366_v29  ;;  %369 = vst [vmem:[%s2859_s11 + $0x178] sm:$0xf] %v368_v30  ;;  %v370_v31 = vld [vmem:[%s2852_s10 + $0x2f8] sm:$0xf] }
  0x5b   : > { %v372_v32 = vld [vmem:[%s2852_s10 + $0x300] sm:$0xf]  ;;  %v374_v33 = vld [vmem:[%s2852_s10 + $0x308] sm:$0xf]  ;;  %371 = vst [vmem:[%s2859_s11 + $0x17c] sm:$0xf] %v370_v31 }
  0x5c   : > { %373 = vst [vmem:[%s2859_s11 + $0x180] sm:$0xf] %v372_v32  ;;  %375 = vst [vmem:[%s2859_s11 + $0x184] sm:$0xf] %v374_v33  ;;  %v376_v34 = vld [vmem:[%s2852_s10 + $0x310] sm:$0xf] }
  0x5d   : > { %v378_v35 = vld [vmem:[%s2852_s10 + $0x318] sm:$0xf]  ;;  %v380_v36 = vld [vmem:[%s2852_s10 + $0x320] sm:$0xf]  ;;  %377 = vst [vmem:[%s2859_s11 + $0x188] sm:$0xf] %v376_v34 }
  0x5e   : > { %379 = vst [vmem:[%s2859_s11 + $0x18c] sm:$0xf] %v378_v35  ;;  %381 = vst [vmem:[%s2859_s11 + $0x190] sm:$0xf] %v380_v36  ;;  %v382_v37 = vld [vmem:[%s2852_s10 + $0x328] sm:$0xf] }
  0x5f   : > { %v384_v38 = vld [vmem:[%s2852_s10 + $0x330] sm:$0xf]  ;;  %v386_v39 = vld [vmem:[%s2852_s10 + $0x338] sm:$0xf]  ;;  %383 = vst [vmem:[%s2859_s11 + $0x194] sm:$0xf] %v382_v37 }
  0x60   : > { %385 = vst [vmem:[%s2859_s11 + $0x198] sm:$0xf] %v384_v38  ;;  %387 = vst [vmem:[%s2859_s11 + $0x19c] sm:$0xf] %v386_v39  ;;  %v388_v40 = vld [vmem:[%s2852_s10 + $0x340] sm:$0xf] }
  0x61   : > { %v390_v41 = vld [vmem:[%s2852_s10 + $0x348] sm:$0xf]  ;;  %v392_v42 = vld [vmem:[%s2852_s10 + $0x350] sm:$0xf]  ;;  %389 = vst [vmem:[%s2859_s11 + $0x1a0] sm:$0xf] %v388_v40 }
  0x62   : > { %391 = vst [vmem:[%s2859_s11 + $0x1a4] sm:$0xf] %v390_v41  ;;  %393 = vst [vmem:[%s2859_s11 + $0x1a8] sm:$0xf] %v392_v42  ;;  %v394_v43 = vld [vmem:[%s2852_s10 + $0x358] sm:$0xf] }
  0x63   : > { %v396_v44 = vld [vmem:[%s2852_s10 + $0x360] sm:$0xf]  ;;  %v398_v45 = vld [vmem:[%s2852_s10 + $0x368] sm:$0xf]  ;;  %395 = vst [vmem:[%s2859_s11 + $0x1ac] sm:$0xf] %v394_v43 }
  0x64   : > { %397 = vst [vmem:[%s2859_s11 + $0x1b0] sm:$0xf] %v396_v44  ;;  %399 = vst [vmem:[%s2859_s11 + $0x1b4] sm:$0xf] %v398_v45  ;;  %v400_v46 = vld [vmem:[%s2852_s10 + $0x370] sm:$0xf] }
  0x65   : > { %v402_v47 = vld [vmem:[%s2852_s10 + $0x378] sm:$0xf]  ;;  %v404_v48 = vld [vmem:[%s2852_s10 + $0x380] sm:$0xf]  ;;  %401 = vst [vmem:[%s2859_s11 + $0x1b8] sm:$0xf] %v400_v46 }
  0x66   : > { %403 = vst [vmem:[%s2859_s11 + $0x1bc] sm:$0xf] %v402_v47  ;;  %405 = vst [vmem:[%s2859_s11 + $0x1c0] sm:$0xf] %v404_v48  ;;  %v406_v49 = vld [vmem:[%s2852_s10 + $0x388] sm:$0xf] }
  0x67   : > { %v408_v50 = vld [vmem:[%s2852_s10 + $0x390] sm:$0xf]  ;;  %v410_v51 = vld [vmem:[%s2852_s10 + $0x398] sm:$0xf]  ;;  %407 = vst [vmem:[%s2859_s11 + $0x1c4] sm:$0xf] %v406_v49 }
  0x68   : > { %409 = vst [vmem:[%s2859_s11 + $0x1c8] sm:$0xf] %v408_v50  ;;  %411 = vst [vmem:[%s2859_s11 + $0x1cc] sm:$0xf] %v410_v51  ;;  %v412_v52 = vld [vmem:[%s2852_s10 + $0x3a0] sm:$0xf] }
  0x69   : > { %v414_v53 = vld [vmem:[%s2852_s10 + $0x3a8] sm:$0xf]  ;;  %v416_v54 = vld [vmem:[%s2852_s10 + $0x3b0] sm:$0xf]  ;;  %413 = vst [vmem:[%s2859_s11 + $0x1d0] sm:$0xf] %v412_v52 }
  0x6a   : > { %415 = vst [vmem:[%s2859_s11 + $0x1d4] sm:$0xf] %v414_v53  ;;  %417 = vst [vmem:[%s2859_s11 + $0x1d8] sm:$0xf] %v416_v54  ;;  %v418_v55 = vld [vmem:[%s2852_s10 + $0x3b8] sm:$0xf] }
  0x6b   : > { %v420_v56 = vld [vmem:[%s2852_s10 + $0x3c0] sm:$0xf]  ;;  %v422_v57 = vld [vmem:[%s2852_s10 + $0x3c8] sm:$0xf]  ;;  %419 = vst [vmem:[%s2859_s11 + $0x1dc] sm:$0xf] %v418_v55 }
  0x6c   : > { %421 = vst [vmem:[%s2859_s11 + $0x1e0] sm:$0xf] %v420_v56  ;;  %423 = vst [vmem:[%s2859_s11 + $0x1e4] sm:$0xf] %v422_v57  ;;  %v424_v58 = vld [vmem:[%s2852_s10 + $0x3d0] sm:$0xf] }
  0x6d   : > { %v426_v59 = vld [vmem:[%s2852_s10 + $0x3d8] sm:$0xf]  ;;  %v428_v60 = vld [vmem:[%s2852_s10 + $0x3e0] sm:$0xf]  ;;  %425 = vst [vmem:[%s2859_s11 + $0x1e8] sm:$0xf] %v424_v58 }
  0x6e   : > { %427 = vst [vmem:[%s2859_s11 + $0x1ec] sm:$0xf] %v426_v59  ;;  %429 = vst [vmem:[%s2859_s11 + $0x1f0] sm:$0xf] %v428_v60  ;;  %v430_v61 = vld [vmem:[%s2852_s10 + $0x3e8] sm:$0xf] }
  0x6f   : > { %v432_v62 = vld [vmem:[%s2852_s10 + $0x3f0] sm:$0xf]  ;;  %v434_v63 = vld [vmem:[%s2852_s10 + $0x3f8] sm:$0xf]  ;;  %431 = vst [vmem:[%s2859_s11 + $0x1f4] sm:$0xf] %v430_v61 }
  0x70   : > { %433 = vst [vmem:[%s2859_s11 + $0x1f8] sm:$0xf] %v432_v62  ;;  %435 = vst [vmem:[%s2859_s11 + $0x1fc] sm:$0xf] %v434_v63  ;;  %v436_v0 = vld [vmem:[%s2852_s10 + $0x400] sm:$0xf] }
  0x71   : > { %v438_v1 = vld [vmem:[%s2852_s10 + $0x408] sm:$0xf]  ;;  %v440_v2 = vld [vmem:[%s2852_s10 + $0x410] sm:$0xf]  ;;  %437 = vst [vmem:[%s2859_s11 + $0x200] sm:$0xf] %v436_v0 }
  0x72   : > { %439 = vst [vmem:[%s2859_s11 + $0x204] sm:$0xf] %v438_v1  ;;  %441 = vst [vmem:[%s2859_s11 + $0x208] sm:$0xf] %v440_v2  ;;  %v442_v3 = vld [vmem:[%s2852_s10 + $0x418] sm:$0xf] }
  0x73   : > { %v444_v4 = vld [vmem:[%s2852_s10 + $0x420] sm:$0xf]  ;;  %v446_v5 = vld [vmem:[%s2852_s10 + $0x428] sm:$0xf]  ;;  %443 = vst [vmem:[%s2859_s11 + $0x20c] sm:$0xf] %v442_v3 }
  0x74   : > { %445 = vst [vmem:[%s2859_s11 + $0x210] sm:$0xf] %v444_v4  ;;  %447 = vst [vmem:[%s2859_s11 + $0x214] sm:$0xf] %v446_v5  ;;  %v448_v6 = vld [vmem:[%s2852_s10 + $0x430] sm:$0xf] }
  0x75   : > { %v450_v7 = vld [vmem:[%s2852_s10 + $0x438] sm:$0xf]  ;;  %v452_v8 = vld [vmem:[%s2852_s10 + $0x440] sm:$0xf]  ;;  %449 = vst [vmem:[%s2859_s11 + $0x218] sm:$0xf] %v448_v6 }
  0x76   : > { %451 = vst [vmem:[%s2859_s11 + $0x21c] sm:$0xf] %v450_v7  ;;  %453 = vst [vmem:[%s2859_s11 + $0x220] sm:$0xf] %v452_v8  ;;  %v454_v9 = vld [vmem:[%s2852_s10 + $0x448] sm:$0xf] }
  0x77   : > { %v456_v10 = vld [vmem:[%s2852_s10 + $0x450] sm:$0xf]  ;;  %v458_v11 = vld [vmem:[%s2852_s10 + $0x458] sm:$0xf]  ;;  %455 = vst [vmem:[%s2859_s11 + $0x224] sm:$0xf] %v454_v9 }
  0x78   : > { %457 = vst [vmem:[%s2859_s11 + $0x228] sm:$0xf] %v456_v10  ;;  %459 = vst [vmem:[%s2859_s11 + $0x22c] sm:$0xf] %v458_v11  ;;  %v460_v12 = vld [vmem:[%s2852_s10 + $0x460] sm:$0xf] }
  0x79   : > { %v462_v13 = vld [vmem:[%s2852_s10 + $0x468] sm:$0xf]  ;;  %v464_v14 = vld [vmem:[%s2852_s10 + $0x470] sm:$0xf]  ;;  %461 = vst [vmem:[%s2859_s11 + $0x230] sm:$0xf] %v460_v12 }
  0x7a   : > { %463 = vst [vmem:[%s2859_s11 + $0x234] sm:$0xf] %v462_v13  ;;  %465 = vst [vmem:[%s2859_s11 + $0x238] sm:$0xf] %v464_v14  ;;  %v466_v15 = vld [vmem:[%s2852_s10 + $0x478] sm:$0xf] }
  0x7b   : > { %467 = vst [vmem:[%s2859_s11 + $0x23c] sm:$0xf] %v466_v15 }
  0x7c PF: > { %p2149_p11 = scmp.ge.s32.totalorder %s2750_s20, 1  ;;  %p783_p12 = scmp.lt.s32.totalorder %s2750_s20, 5 }
  0x7e   : > { %p784_p13 = pnand %p2149_p11, %p783_p12 }
  0x7f   : > { %s790_s21 = sand.u32 (!%p784_p13), 1, %s2726_s14   ;;  %s2151_s14 = sshll.u32 (!%p784_p13), %s2738_s17, 3 }
  0x80   : > { %787 = sbr.rel (%p784_p13) target bundleno = 460 (0x1cc), region = 69  ;;  %p822_p0 = scmp.lt.s32.totalorder (!%p784_p13), %s2151_s14, 15 }
  0x81   : > { %s2482_s24 = smul.u32 (!%p784_p13), 576, %s790_s21  ;;  %p828_p1 = scmp.lt.s32.totalorder (!%p784_p13), %s2734_s16, 1 }
  0x82   : > { %s818_s10 = sand.u32 (!%p784_p13), 1, %s2718_s12  }
  0x83   : > { %s3147_s25 = scalar_lea.vmem (!%p784_p13), [#allocation2], %s2482_s24  ;;  %s2150_s11 = sshll.u32 (!%p784_p13), %s818_s10, 6 }
  0x84   : > { %v2556_v16 = vld [vmem:[%s3147_s25 + $0x40] sm:$0xff] (!%p784_p13)   ;;  %v2560_v20 = vld [vmem:[%s3147_s25 + $0x48] sm:$0xff] (!%p784_p13)   ;;  %v2564_v24 = vld [vmem:[%s3147_s25 + $0x50] sm:$0xff] (!%p784_p13)   ;;  %s820_s12 = scalar_lea.vmem (!%p784_p13), [#allocation3], %s2150_s11 }
  0x85   : > { %v2557_v17 = vld [vmem:[%s3147_s25 + $0xc0] sm:$0xff] (!%p784_p13)   ;;  %2269 = vmatprep.subr.bf16.mxu0 (!%p784_p13), %v2556_v16  ;;  %v2561_v21 = vld [vmem:[%s3147_s25 + $0xc8] sm:$0xff] (!%p784_p13)   ;;  %v2565_v25 = vld [vmem:[%s3147_s25 + $0xd0] sm:$0xff] (!%p784_p13)  }
  0x86   : > { %v2558_v18 = vld [vmem:[%s3147_s25] sm:$0xff] (!%p784_p13)   ;;  %2309 = vmatprep.subr.bf16.mxu1 (!%p784_p13), %v2557_v17  ;;  %v2562_v22 = vld [vmem:[%s3147_s25 + $0x8] sm:$0xff] (!%p784_p13)   ;;  %v2566_v26 = vld [vmem:[%s3147_s25 + $0x10] sm:$0xff] (!%p784_p13)  }
  0x87   : > { %v2559_v19 = vld [vmem:[%s3147_s25 + $0x80] sm:$0xff]   ;;  %2270 = vmatpush3.bf16.msra.mxu0 %v2558_v18  ;;  %v2563_v23 = vld [vmem:[%s3147_s25 + $0x88] sm:$0xff]   ;;  %v2567_v27 = vld [vmem:[%s3147_s25 + $0x90] sm:$0xff]   ;;  %s3326_s14 = smov (!%p822_p0, %s2151_s14), 15  ;;  %s2268_s21 = sshll.u32 (%p2839_p9), %s2738_s17, 4 }
  0x88   : > { %2310 = vmatpush3.bf16.msra.mxu1 %v2559_v19  ;;  %2271 = vmatprep.subr.bf16.mxu0 %v2560_v20  ;;  %v2568_v28 = vld [vmem:[%s3147_s25 + $0x58] sm:$0xff]   ;;  %v2572_v32 = vld [vmem:[%s3147_s25 + $0x60] sm:$0xff]   ;;  %v2576_v36 = vld [vmem:[%s3147_s25 + $0x68] sm:$0xff]   ;;  %s2483_s26 = smul.u32 36, %s3326_s14  ;;  %s1990_s24 = sadd.s32 (%p2839_p9), %s2734_s16, %s2268_s21 }
  0x89   : > { %2311 = vmatprep.subr.bf16.mxu1 %v2561_v21  ;;  %v2569_v29 = vld [vmem:[%s3147_s25 + $0xd8] sm:$0xff]   ;;  %v2573_v33 = vld [vmem:[%s3147_s25 + $0xe0] sm:$0xff]   ;;  %v2577_v37 = vld [vmem:[%s3147_s25 + $0xe8] sm:$0xff]   ;;  %s829_s6 = scalar_select %p828_p1, %s2734_s16, 1 }
  0x8a   : > { %v2570_v30 = vld [vmem:[%s3147_s25 + $0x18] sm:$0xff]   ;;  %v2574_v34 = vld [vmem:[%s3147_s25 + $0x20] sm:$0xff]   ;;  %v2578_v38 = vld [vmem:[%s3147_s25 + $0x28] sm:$0xff]   ;;  %s3183_s5 = scalar_lea.vmem %s3306_s0, %s2483_s26 }
  0x8b   : > { %2272 = vmatpush3.bf16.msra.mxu0 %v2562_v22  ;;  %v2571_v31 = vld [vmem:[%s3147_s25 + $0x98] sm:$0xff]   ;;  %v2575_v35 = vld [vmem:[%s3147_s25 + $0xa0] sm:$0xff]   ;;  %v2579_v39 = vld [vmem:[%s3147_s25 + $0xa8] sm:$0xff]   ;;  %s830_s9 = scalar_lea.vmem %s3308_s2, %s829_s6 }
  0x8c   : > { %2312 = vmatpush3.bf16.msra.mxu1 %v2563_v23  ;;  %2273 = vmatprep.subr.bf16.mxu0 %v2564_v24  ;;  %v2580_v40 = vld [vmem:[%s3147_s25 + $0x70] sm:$0xff]   ;;  %v2584_v44 = vld [vmem:[%s3147_s25 + $0x78] sm:$0xff]   ;;  %v2588_v48 = vld [vmem:[%s3183_s5] ss:$36 sps:$4 sm:$0xff]  }
  0x8d   : > { %2313 = vmatprep.subr.bf16.mxu1 %v2565_v25  ;;  %v2581_v41 = vld [vmem:[%s3147_s25 + $0xf0] sm:$0xff]   ;;  %v2585_v45 = vld [vmem:[%s3147_s25 + $0xf8] sm:$0xff]   ;;  %v2590_v49 = vld [vmem:[%s3183_s5 + $0x4] ss:$36 sps:$4 sm:$0xff]  }
  0x8e   : > { %v2582_v42 = vld [vmem:[%s3147_s25 + $0x30] sm:$0xff]   ;;  %v2586_v46 = vld [vmem:[%s3147_s25 + $0x38] sm:$0xff]   ;;  %v2591_v50 = vld [vmem:[%s3183_s5 + $0x8] ss:$36 sps:$4 sm:$0xff]   ;;  %1672 = vmatprep.mubr.bf16.mxu0 %v2590_v49 }
  0x8f   : > { %2274 = vmatpush3.bf16.msra.mxu0 %v2566_v26  ;;  %v2583_v43 = vld [vmem:[%s3147_s25 + $0xb0] sm:$0xff]   ;;  %v2587_v47 = vld [vmem:[%s3147_s25 + $0xb8] sm:$0xff]   ;;  %v2594_v52 = vld [vmem:[%s3147_s25 + $0x140] sm:$0xff]  }
  0x90   : > { %2314 = vmatpush3.bf16.msra.mxu1 %v2567_v27  ;;  %2275 = vmatprep.subr.bf16.mxu0 %v2568_v28  ;;  %v2593_v51 = vld [vmem:[%s3183_s5 + $0xc] ss:$36 sps:$4 sm:$0xff]   ;;  %v2595_v53 = vld [vmem:[%s3147_s25 + $0x1c0] sm:$0xff]   ;;  %v2604_v61 = vld [vmem:[%s3183_s5 + $0x54] ss:$36 sps:$4 sm:$0xff]  }
  0x91   : > { %2315 = vmatprep.subr.bf16.mxu1 %v2569_v29  ;;  %1737 = vmatprep.mubr.bf16.mxu1 %v2593_v51  ;;  %v2596_v54 = vld [vmem:[%s3147_s25 + $0x100] sm:$0xff]   ;;  %v2598_v56 = vld [vmem:[%s3147_s25 + $0x148] sm:$0xff]   ;;  %v2607_v63 = vld [vmem:[%s3183_s5 + $0x50] ss:$36 sps:$4 sm:$0xff]  }
  0x92   : > { %v2597_v55 = vld [vmem:[%s3147_s25 + $0x180] sm:$0xff]   ;;  %v2599_v57 = vld [vmem:[%s3147_s25 + $0x1c8] sm:$0xff]   ;;  %v2608_v0 = vld [vmem:[%s3147_s25 + $0x150] sm:$0xff]  }
  0x93   : > { %2276 = vmatpush3.bf16.msra.mxu0 %v2570_v30  ;;  %v2600_v58 = vld [vmem:[%s3147_s25 + $0x108] sm:$0xff]   ;;  %v2609_v1 = vld [vmem:[%s3147_s25 + $0x1d0] sm:$0xff]   ;;  %v2612_v4 = vld [vmem:[%s3147_s25 + $0x158] sm:$0xff]  }
  0x94   : > { %2316 = vmatpush3.bf16.msra.mxu1 %v2571_v31  ;;  %2277 = vmatprep.subr.bf16.mxu0 %v2572_v32  ;;  %v2601_v59 = vld [vmem:[%s3147_s25 + $0x188] sm:$0xff]   ;;  %v2610_v2 = vld [vmem:[%s3147_s25 + $0x110] sm:$0xff]   ;;  %v2613_v5 = vld [vmem:[%s3147_s25 + $0x1d8] sm:$0xff]  }
  0x95   : > { %2317 = vmatprep.subr.bf16.mxu1 %v2573_v33  ;;  %v2602_v60 = vld [vmem:[%s3183_s5 + $0x4c] ss:$36 sps:$4 sm:$0xff]   ;;  %v2614_v6 = vld [vmem:[%s3147_s25 + $0x118] sm:$0xff]   ;;  %v2622_v12 = vld [vmem:[%s3147_s25 + $0x160] sm:$0xff]  }
  0x96   : > { %v2606_v62 = vld [vmem:[%s3183_s5 + $0x48] ss:$36 sps:$4 sm:$0xff]   ;;  %v2611_v3 = vld [vmem:[%s3147_s25 + $0x190] sm:$0xff]   ;;  %v2615_v7 = vld [vmem:[%s3147_s25 + $0x198] sm:$0xff]  }
  0x97   : > { %2278 = vmatpush3.bf16.msra.mxu0 %v2574_v34  ;;  %v2616_v8 = vld [vmem:[%s3183_s5 + $0x94] ss:$36 sps:$4 sm:$0xff]   ;;  %v2618_v9 = vld [vmem:[%s3183_s5 + $0x9c] ss:$36 sps:$4 sm:$0xff]   ;;  %v2626_v16 = vld [vmem:[%s3147_s25 + $0x168] sm:$0xff]  }
  0x98   : > { %2318 = vmatpush3.bf16.msra.mxu1 %v2575_v35  ;;  %2279 = vmatprep.subr.bf16.mxu0 %v2576_v36  ;;  %v2620_v10 = vld [vmem:[%s3183_s5 + $0x90] ss:$36 sps:$4 sm:$0xff]   ;;  %v2621_v11 = vld [vmem:[%s3183_s5 + $0x98] ss:$36 sps:$4 sm:$0xff]   ;;  %v2623_v13 = vld [vmem:[%s3147_s25 + $0x1e0] sm:$0xff]  }
  0x99   : > { %2319 = vmatprep.subr.bf16.mxu1 %v2577_v37  ;;  %v2624_v14 = vld [vmem:[%s3147_s25 + $0x120] sm:$0xff]   ;;  %v2627_v17 = vld [vmem:[%s3147_s25 + $0x1e8] sm:$0xff]   ;;  %v2634_v22 = vld [vmem:[%s3183_s5 + $0xd8] ss:$36 sps:$4 sm:$0xff]  }
  0x9a   : > { %v2625_v15 = vld [vmem:[%s3147_s25 + $0x1a0] sm:$0xff]   ;;  %v2628_v18 = vld [vmem:[%s3147_s25 + $0x128] sm:$0xff]   ;;  %v2636_v24 = vld [vmem:[%s3147_s25 + $0x170] sm:$0xff]  }
  0x9b   : > { %2280 = vmatpush3.bf16.msra.mxu0 %v2578_v38  ;;  %v2629_v19 = vld [vmem:[%s3147_s25 + $0x1a8] sm:$0xff]   ;;  %v2630_v20 = vld [vmem:[%s3183_s5 + $0xdc] ss:$36 sps:$4 sm:$0xff]   ;;  %v2637_v25 = vld [vmem:[%s3147_s25 + $0x1f0] sm:$0xff]  }
  0x9c   : > { %2320 = vmatpush3.bf16.msra.mxu1 %v2579_v39  ;;  %2281 = vmatprep.subr.bf16.mxu0 %v2580_v40  ;;  %v2632_v21 = vld [vmem:[%s3183_s5 + $0xe4] ss:$36 sps:$4 sm:$0xff]   ;;  %v2638_v26 = vld [vmem:[%s3147_s25 + $0x130] sm:$0xff]   ;;  %v2640_v28 = vld [vmem:[%s3147_s25 + $0x178] sm:$0xff]  }
  0x9d   : > { %2321 = vmatprep.subr.bf16.mxu1 %v2581_v41  ;;  %v2635_v23 = vld [vmem:[%s3183_s5 + $0xe0] ss:$36 sps:$4 sm:$0xff]   ;;  %v2639_v27 = vld [vmem:[%s3147_s25 + $0x1b0] sm:$0xff]   ;;  %v2641_v29 = vld [vmem:[%s3147_s25 + $0x1f8] sm:$0xff]  }
  0x9e   : > { %v2642_v30 = vld [vmem:[%s3147_s25 + $0x138] sm:$0xff]   ;;  %v2644_v32 = vld [vmem:[%s3183_s5 + $0x10] ss:$36 sps:$4 sm:$0xff]   ;;  %v2650_v36 = vld [vmem:[%s3147_s25 + $0x200] sm:$0xff]  }
  0x9f   : > { %2282 = vmatpush3.bf16.msra.mxu0 %v2582_v42  ;;  %v2643_v31 = vld [vmem:[%s3147_s25 + $0x1b8] sm:$0xff]   ;;  %v2651_v37 = vld [vmem:[%s3147_s25 + $0x208] sm:$0xff]   ;;  %v2657_v41 = vld [vmem:[%s3183_s5 + $0x60] ss:$36 sps:$4 sm:$0xff]  }
  0xa0   : > { %2322 = vmatpush3.bf16.msra.mxu1 %v2583_v43  ;;  %2283 = vmatprep.subr.bf16.mxu0 %v2584_v44  ;;  %v2646_v33 = vld [vmem:[%s3183_s5 + $0x14] ss:$36 sps:$4 sm:$0xff]   ;;  %v2649_v35 = vld [vmem:[%s3183_s5 + $0x1c] ss:$36 sps:$4 sm:$0xff]   ;;  %v2654_v39 = vld [vmem:[%s3183_s5 + $0x64] ss:$36 sps:$4 sm:$0xff]  }
  0xa1   : > { %2323 = vmatprep.subr.bf16.mxu1 %v2585_v45  ;;  %v2647_v34 = vld [vmem:[%s3183_s5 + $0x18] ss:$36 sps:$4 sm:$0xff]   ;;  %v2658_v42 = vld [vmem:[%s3147_s25 + $0x210] sm:$0xff]   ;;  %v2660_v43 = vld [vmem:[%s3183_s5 + $0xa4] ss:$36 sps:$4 sm:$0xff]  }
  0xa2   : > { %v2652_v38 = vld [vmem:[%s3183_s5 + $0x5c] ss:$36 sps:$4 sm:$0xff]   ;;  %v2662_v44 = vld [vmem:[%s3183_s5 + $0xac] ss:$36 sps:$4 sm:$0xff]  }
  0xa3   : > { %2284 = vmatpush3.bf16.msra.mxu0 %v2586_v46  ;;  %v2656_v40 = vld [vmem:[%s3183_s5 + $0x58] ss:$36 sps:$4 sm:$0xff]   ;;  %v2664_v46 = vld [vmem:[%s3183_s5 + $0xa0] ss:$36 sps:$4 sm:$0xff]   ;;  %v2668_v49 = vld [vmem:[%s3183_s5 + $0xec] ss:$36 sps:$4 sm:$0xff]  }
  0xa4   : > { %2324 = vmatpush3.bf16.msra.mxu1 %v2587_v47  ;;  %2349 = vmatprep.subr.bf16.mxu0 %v2594_v52  ;;  %v2659_v45 = vld [vmem:[%s3147_s25 + $0x218] sm:$0xff]   ;;  %v2665_v47 = vld [vmem:[%s3183_s5 + $0xa8] ss:$36 sps:$4 sm:$0xff]  }
  0xa5   : > { %2389 = vmatprep.subr.bf16.mxu1 %v2595_v53  ;;  %v2667_v51 = vld [vmem:[%s3147_s25 + $0x228] sm:$0xff]   ;;  %v2674_v53 = vld [vmem:[%s3147_s25 + $0x230] sm:$0xff]  }
  0xa6   : > { %1673 = vmatmul.mubr.bf16.vlgmr.msra.gmra.mrb[0].mxu0 %v2588_v48  ;;  %v2666_v48 = vld [vmem:[%s3147_s25 + $0x220] sm:$0xff]   ;;  %v2672_v52 = vld [vmem:[%s3183_s5 + $0xe8] ss:$36 sps:$4 sm:$0xff]  }
  0xa7   : > { %1738 = vmatmul.mubr.bf16.vlgmr.msra.gmra.mrb[0].mxu1 %v2591_v50  ;;  %2350 = vmatpush3.bf16.msra.mxu0 %v2596_v54  ;;  %v2670_v50 = vld [vmem:[%s3183_s5 + $0xf4] ss:$36 sps:$4 sm:$0xff]  }
  0xa8   : > { %2390 = vmatpush3.bf16.msra.mxu1 %v2597_v55  ;;  %2351 = vmatprep.subr.bf16.mxu0 %v2598_v56  ;;  %v2673_v54 = vld [vmem:[%s3183_s5 + $0xf0] ss:$36 sps:$4 sm:$0xff]   ;;  %v2676_v55 = vld [vmem:[%s3183_s5 + $0x20] ss:$36 sps:$4 sm:$0xff]  }
  0xa9   : > { %2391 = vmatprep.subr.bf16.mxu1 %v2599_v57  ;;  %1680 = vmatprep.mubr.bf16.mxu0 %v2602_v60  ;;  %v2677_v56 = vld [vmem:[%s3183_s5 + $0xb0] ss:$36 sps:$4 sm:$0xff]   ;;  %v2675_v57 = vld [vmem:[%s3147_s25 + $0x238] sm:$0xff]   ;;  %s2265_s25 = sshll.u32 (%p2839_p9), %s1990_s24, 3 }
  0xaa   : > { %1745 = vmatprep.mubr.bf16.mxu1 %v2604_v61  ;;  %s1992_s28 = scalar_lea.vmem (%p2839_p9), %s3309_s3, %s2265_s25 }
  0xab   : > { %2352 = vmatpush3.bf16.msra.mxu0 %v2600_v58  ;;  %v2678_v58 = vld [vmem:[%s3183_s5 + $0x68] ss:$36 sps:$4 sm:$0xff]  }
  0xac   : > { %2392 = vmatpush3.bf16.msra.mxu1 %v2601_v59  ;;  %2353 = vmatprep.subr.bf16.mxu0 %v2608_v0  ;;  %v2679_v59 = vld [vmem:[%s3183_s5 + $0xf8] ss:$36 sps:$4 sm:$0xff]  }
  0xad   : > { %2393 = vmatprep.subr.bf16.mxu1 %v2609_v1 }
  0xae   : > { %1681 = vmatmul.mubr.bf16.gmra.mrb[4].mxu0 %v2606_v62  ;;  %v2153_v62 = vld [vmem:[%s830_s9] ss:$0 sm:$0xff] }
  0xaf   : > { %1746 = vmatmul.mubr.bf16.gmra.mrb[4].mxu1 %v2607_v63  ;;  %2354 = vmatpush3.bf16.msra.mxu0 %v2610_v2 }
  0xb0   : > { %2394 = vmatpush3.bf16.msra.mxu1 %v2611_v3  ;;  %2355 = vmatprep.subr.bf16.mxu0 %v2612_v4 }
  0xb1   : > { %2395 = vmatprep.subr.bf16.mxu1 %v2613_v5  ;;  %1688 = vmatprep.mubr.bf16.mxu0 %v2616_v8 }
  0xb2   : > { %1753 = vmatprep.mubr.bf16.mxu1 %v2618_v9 }
  0xb3   : > { %2356 = vmatpush3.bf16.msra.mxu0 %v2614_v6 }
  0xb4   : > { %2396 = vmatpush3.bf16.msra.mxu1 %v2615_v7  ;;  %2357 = vmatprep.subr.bf16.mxu0 %v2622_v12 }
  0xb5   : > { %2397 = vmatprep.subr.bf16.mxu1 %v2623_v13 }
  0xb6   : > { %1689 = vmatmul.mubr.bf16.gmra.mrb[8].mxu0 %v2620_v10 }
  0xb7   : > { %1754 = vmatmul.mubr.bf16.gmra.mrb[8].mxu1 %v2621_v11  ;;  %2358 = vmatpush3.bf16.msra.mxu0 %v2624_v14 }
  0xb8   : > { %2398 = vmatpush3.bf16.msra.mxu1 %v2625_v15  ;;  %2359 = vmatprep.subr.bf16.mxu0 %v2626_v16 }
  0xb9   : > { %2399 = vmatprep.subr.bf16.mxu1 %v2627_v17  ;;  %1696 = vmatprep.mubr.bf16.mxu0 %v2630_v20 }
  0xba   : > { %1761 = vmatprep.mubr.bf16.mxu1 %v2632_v21 }
  0xbb   : > { %2360 = vmatpush3.bf16.msra.mxu0 %v2628_v18 }
  0xbc   : > { %2400 = vmatpush3.bf16.msra.mxu1 %v2629_v19  ;;  %2361 = vmatprep.subr.bf16.mxu0 %v2636_v24 }
  0xbd   : > { %2401 = vmatprep.subr.bf16.mxu1 %v2637_v25 }
  0xbe   : > { %1697 = vmatmul.mubr.bf16.gmra.mrb[12].mxu0 %v2634_v22 }
  0xbf   : > { %1762 = vmatmul.mubr.bf16.gmra.mrb[12].mxu1 %v2635_v23  ;;  %2362 = vmatpush3.bf16.msra.mxu0 %v2638_v26 }
  0xc0   : > { %2402 = vmatpush3.bf16.msra.mxu1 %v2639_v27  ;;  %2363 = vmatprep.subr.bf16.mxu0 %v2640_v28 }
  0xc1   : > { %2403 = vmatprep.subr.bf16.mxu1 %v2641_v29  ;;  %1802 = vmatprep.mubr.bf16.mxu0 %v2646_v33 }
  0xc2   : > { %1867 = vmatprep.mubr.bf16.mxu1 %v2649_v35 }
  0xc3   : > { %2364 = vmatpush3.bf16.msra.mxu0 %v2642_v30 }
  0xc4   : > { %2404 = vmatpush3.bf16.msra.mxu1 %v2643_v31  ;;  %2441 = vmatprep.subr.bf16.mxu0 %v2650_v36 }
  0xc5   : > { %2465 = vmatprep.subr.bf16.mxu1 %v2650_v36 }
  0xc6   : > { %1803 = vmatmul.mubr.bf16.vlgmr.msra.gmra.mrb[16].mxu0 %v2644_v32 }
  0xc7   : > { %1868 = vmatmul.mubr.bf16.vlgmr.msra.gmra.mrb[16].mxu1 %v2647_v34  ;;  %2442 = vmatpush3.bf16.msra.mxu0 %v2650_v36 }
  0xc8   : > { %2473 = vmatpush3.bf16.msra.mxu1 %v2650_v36  ;;  %2443 = vmatprep.subr.bf16.mxu0 %v2651_v37 }
  0xc9   : > { %2466 = vmatprep.subr.bf16.mxu1 %v2651_v37  ;;  %1810 = vmatprep.mubr.bf16.mxu0 %v2652_v38 }
  0xca   : > { %1875 = vmatprep.mubr.bf16.mxu1 %v2654_v39 }
  0xcb   : > { %2444 = vmatpush3.bf16.msra.mxu0 %v2651_v37 }
  0xcc   : > { %2474 = vmatpush3.bf16.msra.mxu1 %v2651_v37  ;;  %2445 = vmatprep.subr.bf16.mxu0 %v2658_v42 }
  0xcd   : > { %2467 = vmatprep.subr.bf16.mxu1 %v2658_v42 }
  0xce   : > { %1811 = vmatmul.mubr.bf16.gmra.mrb[20].mxu0 %v2656_v40 }
  0xcf   : > { %1876 = vmatmul.mubr.bf16.gmra.mrb[20].mxu1 %v2657_v41  ;;  %1818 = vmatprep.mubr.bf16.mxu0 %v2660_v43 }
  0xd0   : > { %2446 = vmatpush3.bf16.msra.mxu0 %v2658_v42  ;;  %1883 = vmatprep.mubr.bf16.mxu1 %v2662_v44 }
  0xd1   : > { %2475 = vmatpush3.bf16.msra.mxu1 %v2658_v42  ;;  %2447 = vmatprep.subr.bf16.mxu0 %v2659_v45 }
  0xd2   : > { %2468 = vmatprep.subr.bf16.mxu1 %v2659_v45 }
  0xd4   : > { %2448 = vmatpush3.bf16.msra.mxu0 %v2659_v45 }
  0xd5   : > { %2476 = vmatpush3.bf16.msra.mxu1 %v2659_v45  ;;  %2449 = vmatprep.subr.bf16.mxu0 %v2666_v48 }
  0xd6   : > { %1819 = vmatmul.mubr.bf16.gmra.mrb[24].mxu0 %v2664_v46  ;;  %2469 = vmatprep.subr.bf16.mxu1 %v2666_v48 }
  0xd7   : > { %1884 = vmatmul.mubr.bf16.gmra.mrb[24].mxu1 %v2665_v47  ;;  %1826 = vmatprep.mubr.bf16.mxu0 %v2668_v49 }
  0xd8   : > { %2450 = vmatpush3.bf16.msra.mxu0 %v2666_v48  ;;  %1891 = vmatprep.mubr.bf16.mxu1 %v2670_v50 }
  0xd9   : > { %2477 = vmatpush3.bf16.msra.mxu1 %v2666_v48  ;;  %2451 = vmatprep.subr.bf16.mxu0 %v2667_v51 }
  0xda   : > { %2470 = vmatprep.subr.bf16.mxu1 %v2667_v51 }
  0xdc   : > { %2452 = vmatpush3.bf16.msra.mxu0 %v2667_v51 }
  0xdd   : > { %2478 = vmatpush3.bf16.msra.mxu1 %v2667_v51  ;;  %2453 = vmatprep.subr.bf16.mxu0 %v2674_v53 }
  0xde   : > { %1827 = vmatmul.mubr.bf16.gmra.mrb[28].mxu0 %v2672_v52  ;;  %2471 = vmatprep.subr.bf16.mxu1 %v2674_v53 }
  0xdf   : > { %1892 = vmatmul.mubr.bf16.gmra.mrb[28].mxu1 %v2673_v54  ;;  %2457 = vmatprep.mubr.bf16.mxu0 %v2676_v55 }
  0xe0   : > { %2454 = vmatpush3.bf16.msra.mxu0 %v2674_v53  ;;  %2461 = vmatprep.mubr.bf16.mxu1 %v2677_v56 }
  0xe1   : > { %2479 = vmatpush3.bf16.msra.mxu1 %v2674_v53  ;;  %2455 = vmatprep.subr.bf16.mxu0 %v2675_v57 }
  0xe2   : > { %2472 = vmatprep.subr.bf16.mxu1 %v2675_v57 }
  0xe4   : > { %2456 = vmatpush3.bf16.msra.mxu0 %v2675_v57 }
  0xe5   : > { %2480 = vmatpush3.bf16.msra.mxu1 %v2675_v57 }
  0xe7   : > { %2458 = vmatmul.mubr.bf16.vlgmr.msra.gmra.mrb[32].mxu0 %v2678_v58 }
  0xe8   : > { %2462 = vmatmul.mubr.bf16.vlgmr.msra.gmra.mrb[32].mxu1 %v2679_v59 }
 0x179   : > { %v2285_v60 = vpop.f32.mrb[0].mxu0 }
 0x17a   : > { %v2325_v61 = vpop.f32.mrb[0].mxu1  ;;  %v2286_v63 = vpop.f32.mrb[1].mxu0 }
 0x17b   : > { %v2287_v0 = vadd.f32 %v2286_v63, %v2285_v60  ;;  %v2326_v1 = vpop.f32.mrb[1].mxu1  ;;  %v2288_v2 = vpop.f32.mrb[2].mxu0 }
 0x17c   : > { %v2327_v3 = vadd.f32 %v2326_v1, %v2325_v61  ;;  %v2328_v4 = vpop.f32.mrb[2].mxu1  ;;  %v2289_v5 = vpop.f32.mrb[3].mxu0 }
 0x17d   : > { %v1675_v6 = vadd.f32 %v2287_v0, %v2153_v62  ;;  %v2290_v7 = vadd.f32 %v2289_v5, %v2288_v2  ;;  %v2329_v8 = vpop.f32.mrb[3].mxu1 }
 0x17e   : > { %v2330_v9 = vadd.f32 %v2329_v8, %v2328_v4 }
 0x17f   : > { %v1740_v10 = vadd.f32 %v2327_v3, %v1675_v6  ;;  %v1678_v11 = vadd.f32 %v2290_v7, %v2153_v62 }
 0x181   : > { %v1743_v12 = vadd.f32 %v2330_v9, %v1678_v11  ;;  %v2291_v13 = vpop.f32.mrb[4].mxu0 }
 0x182   : > { %v2331_v14 = vpop.f32.mrb[4].mxu1  ;;  %v2292_v15 = vpop.f32.mrb[5].mxu0 }
 0x183   : > { %v2293_v16 = vadd.f32 %v2292_v15, %v2291_v13  ;;  %v2332_v17 = vpop.f32.mrb[5].mxu1  ;;  %v2294_v18 = vpop.f32.mrb[6].mxu0 }
 0x184   : > { %v2333_v19 = vadd.f32 %v2332_v17, %v2331_v14  ;;  %v2334_v20 = vpop.f32.mrb[6].mxu1  ;;  %v2295_v21 = vpop.f32.mrb[7].mxu0 }
 0x185   : > { %v1683_v22 = vadd.f32 %v2293_v16, %v2153_v62  ;;  %v2296_v23 = vadd.f32 %v2295_v21, %v2294_v18  ;;  %v2335_v24 = vpop.f32.mrb[7].mxu1 }
 0x186   : > { %v2336_v25 = vadd.f32 %v2335_v24, %v2334_v20 }
 0x187   : > { %v1748_v26 = vadd.f32 %v2333_v19, %v1683_v22  ;;  %v1686_v27 = vadd.f32 %v2296_v23, %v2153_v62 }
 0x189   : > { %v1751_v28 = vadd.f32 %v2336_v25, %v1686_v27  ;;  %v2297_v29 = vpop.f32.mrb[8].mxu0 }
 0x18a   : > { %v2337_v30 = vpop.f32.mrb[8].mxu1  ;;  %v2298_v31 = vpop.f32.mrb[9].mxu0 }
 0x18b   : > { %v2299_v32 = vadd.f32 %v2298_v31, %v2297_v29  ;;  %v2338_v33 = vpop.f32.mrb[9].mxu1  ;;  %v2300_v34 = vpop.f32.mrb[10].mxu0 }
 0x18c   : > { %v2339_v35 = vadd.f32 %v2338_v33, %v2337_v30  ;;  %v2340_v36 = vpop.f32.mrb[10].mxu1  ;;  %v2301_v37 = vpop.f32.mrb[11].mxu0 }
 0x18d   : > { %v1691_v38 = vadd.f32 %v2299_v32, %v2153_v62  ;;  %v2302_v39 = vadd.f32 %v2301_v37, %v2300_v34  ;;  %v2341_v40 = vpop.f32.mrb[11].mxu1 }
 0x18e   : > { %v2342_v41 = vadd.f32 %v2341_v40, %v2340_v36 }
 0x18f   : > { %v1756_v42 = vadd.f32 %v2339_v35, %v1691_v38  ;;  %v1694_v43 = vadd.f32 %v2302_v39, %v2153_v62 }
 0x191   : > { %v1759_v44 = vadd.f32 %v2342_v41, %v1694_v43  ;;  %v2303_v45 = vpop.f32.mrb[12].mxu0 }
 0x192   : > { %v2343_v46 = vpop.f32.mrb[12].mxu1  ;;  %v2304_v47 = vpop.f32.mrb[13].mxu0 }
 0x193   : > { %v2344_v48 = vpop.f32.mrb[13].mxu1  ;;  %v2305_v49 = vadd.f32 %v2304_v47, %v2303_v45  ;;  %v2306_v51 = vpop.f32.mrb[14].mxu0 }
 0x194   : > { %v2345_v50 = vadd.f32 %v2344_v48, %v2343_v46  ;;  %v2346_v52 = vpop.f32.mrb[14].mxu1  ;;  %v2307_v53 = vpop.f32.mrb[15].mxu0 }
 0x195   : > { %v2347_v54 = vpop.f32.mrb[15].mxu1  ;;  %v1699_v55 = vadd.f32 %v2305_v49, %v2153_v62  ;;  %v2308_v56 = vadd.f32 %v2307_v53, %v2306_v51 }
 0x196   : > { %v2348_v57 = vadd.f32 %v2347_v54, %v2346_v52 }
 0x197   : > { %v1764_v58 = vadd.f32 %v2345_v50, %v1699_v55  ;;  %v1702_v59 = vadd.f32 %v2308_v56, %v2153_v62 }
 0x199   : > { %v1767_v60 = vadd.f32 %v2348_v57, %v1702_v59  ;;  %v2365_v61 = vpop.f32.mrb[16].mxu0 }
 0x19a   : > { %v2366_v63 = vpop.f32.mrb[17].mxu0  ;;  %v2405_v0 = vpop.f32.mrb[16].mxu1 }
 0x19b   : > { %v2367_v1 = vadd.f32 %v2366_v63, %v2365_v61  ;;  %v2368_v2 = vpop.f32.mrb[18].mxu0  ;;  %v2406_v3 = vpop.f32.mrb[17].mxu1 }
 0x19c   : > { %v2369_v4 = vpop.f32.mrb[19].mxu0  ;;  %v2407_v6 = vadd.f32 %v2406_v3, %v2405_v0  ;;  %v2408_v7 = vpop.f32.mrb[18].mxu1 }
 0x19d   : > { %v1805_v5 = vadd.f32 %v2367_v1, %v1740_v10  ;;  %v2370_v8 = vadd.f32 %v2369_v4, %v2368_v2  ;;  %v2409_v9 = vpop.f32.mrb[19].mxu1 }
 0x19e   : > { %v2410_v13 = vadd.f32 %v2409_v9, %v2408_v7 }
 0x19f   : > { %v1808_v11 = vadd.f32 %v2370_v8, %v1743_v12  ;;  %v1870_v14 = vadd.f32 %v2407_v6, %v1805_v5 }
 0x1a1   : > { %v2371_v15 = vpop.f32.mrb[20].mxu0  ;;  %v3268_v16 = vadd.f32 %v2410_v13, %v1808_v11 }
 0x1a2   : > { %v2372_v62 = vpop.f32.mrb[21].mxu0  ;;  %v2411_v17 = vpop.f32.mrb[20].mxu1 }
 0x1a3   : > { %v2373_v18 = vadd.f32 %v2372_v62, %v2371_v15  ;;  %v2374_v19 = vpop.f32.mrb[22].mxu0  ;;  %v2412_v20 = vpop.f32.mrb[21].mxu1 }
 0x1a4   : > { %v2375_v21 = vpop.f32.mrb[23].mxu0  ;;  %v2413_v23 = vadd.f32 %v2412_v20, %v2411_v17  ;;  %v2414_v24 = vpop.f32.mrb[22].mxu1 }
 0x1a5   : > { %v1813_v22 = vadd.f32 %v2373_v18, %v1748_v26  ;;  %v2376_v10 = vadd.f32 %v2375_v21, %v2374_v19  ;;  %v2415_v25 = vpop.f32.mrb[23].mxu1 }
 0x1a6   : > { %v2416_v29 = vadd.f32 %v2415_v25, %v2414_v24 }
 0x1a7   : > { %v1816_v27 = vadd.f32 %v2376_v10, %v1751_v28  ;;  %v1878_v30 = vadd.f32 %v2413_v23, %v1813_v22 }
 0x1a9   : > { %v2377_v12 = vpop.f32.mrb[24].mxu0  ;;  %v1881_v31 = vadd.f32 %v2416_v29, %v1816_v27 }
 0x1aa   : > { %v2378_v32 = vpop.f32.mrb[25].mxu0  ;;  %v2417_v33 = vpop.f32.mrb[24].mxu1 }
 0x1ab   : > { %v2379_v34 = vadd.f32 %v2378_v32, %v2377_v12  ;;  %v2380_v35 = vpop.f32.mrb[26].mxu0  ;;  %v2418_v36 = vpop.f32.mrb[25].mxu1 }
 0x1ac   : > { %v2381_v37 = vpop.f32.mrb[27].mxu0  ;;  %v2419_v39 = vadd.f32 %v2418_v36, %v2417_v33  ;;  %v2420_v40 = vpop.f32.mrb[26].mxu1 }
 0x1ad   : > { %v1821_v38 = vadd.f32 %v2379_v34, %v1756_v42  ;;  %v2382_v41 = vadd.f32 %v2381_v37, %v2380_v35  ;;  %v2421_v26 = vpop.f32.mrb[27].mxu1 }
 0x1ae   : > { %v2422_v45 = vadd.f32 %v2421_v26, %v2420_v40 }
 0x1af   : > { %v1824_v43 = vadd.f32 %v2382_v41, %v1759_v44  ;;  %v1886_v46 = vadd.f32 %v2419_v39, %v1821_v38 }
 0x1b1   : > { %v2383_v28 = vpop.f32.mrb[28].mxu0  ;;  %v1889_v47 = vadd.f32 %v2422_v45, %v1824_v43 }
 0x1b2   : > { %v2384_v48 = vpop.f32.mrb[29].mxu0  ;;  %v2423_v49 = vpop.f32.mrb[28].mxu1 }
 0x1b3   : > { %v2385_v50 = vadd.f32 %v2384_v48, %v2383_v28  ;;  %v2386_v51 = vpop.f32.mrb[30].mxu0  ;;  %v2424_v52 = vpop.f32.mrb[29].mxu1 }
 0x1b4   : > { %v2387_v53 = vpop.f32.mrb[31].mxu0  ;;  %v2425_v55 = vadd.f32 %v2424_v52, %v2423_v49  ;;  %v2426_v56 = vpop.f32.mrb[30].mxu1 }
 0x1b5   : > { %v1829_v54 = vadd.f32 %v2385_v50, %v1764_v58  ;;  %v2388_v42 = vadd.f32 %v2387_v53, %v2386_v51  ;;  %v2427_v57 = vpop.f32.mrb[31].mxu1 }
 0x1b6   : > { %v2428_v61 = vadd.f32 %v2427_v57, %v2426_v56 }
 0x1b7   : > { %v1832_v59 = vadd.f32 %v2388_v42, %v1767_v60  ;;  %v1894_v44 = vadd.f32 %v2425_v55, %v1829_v54 }
 0x1b9   : > { %v1897_v63 = vadd.f32 %v2428_v61, %v1832_v59 }
 0x1ba   : > { %v2459_v0 = vpop.f32.mrb[32].mxu0 }
 0x1bb   : > { %v1943_v1 = vadd.f32 %v2459_v0, %v1878_v30  ;;  %v2463_v2 = vpop.f32.mrb[32].mxu1  ;;  %v1934_v3 = vpop.f32.mrb[33].mxu0 }
 0x1bc   : > { %v1959_v4 = vadd.f32 %v2463_v2, %v1894_v44  ;;  %v1935_v5 = vadd.f32 %v1934_v3, %v1870_v14  ;;  %v1950_v6 = vpop.f32.mrb[33].mxu1  ;;  %v2460_v7 = vpop.f32.mrb[34].mxu0 }
 0x1bd   : > { %v1967_v8 = vmax.f32 %v1943_v1, 0.0  ;;  %v1951_v58 = vadd.f32 %v1950_v6, %v1886_v46  ;;  %v1946_v9 = vadd.f32 %v2460_v7, %v1881_v31  ;;  %v2464_v11 = vpop.f32.mrb[34].mxu1  ;;  %v1937_v13 = vpop.f32.mrb[35].mxu0  ;;  %1987 = sbr.rel (!%p2839_p9) target bundleno = 460 (0x1cc), region = 77 }
 0x1be   : > { %v1971_v15 = vmax.f32 %v1959_v4, 0.0  ;;  %v1965_v60 = vmax.f32 %v1935_v5, 0.0  ;;  %v1962_v62 = vadd.f32 %v2464_v11, %v1897_v63  ;;  %v1938_v17 = vadd.f32 %v1937_v13, %v3268_v16  ;;  %v1953_v18 = vpop.f32.mrb[35].mxu1 }
 0x1bf   : > { %1975 = vst [vmem:[%s820_s12 + $0x10] sm:$0xff] %v1967_v8  ;;  %v1969_v19 = vmax.f32 %v1951_v58, 0.0  ;;  %v1968_v20 = vmax.f32 %v1946_v9, 0.0  ;;  %v1954_v21 = vadd.f32 %v1953_v18, %v1889_v47 }
 0x1c0   : > { %1979 = vst [vmem:[%s820_s12 + $0x30] sm:$0xff] %v1971_v15  ;;  %1973 = vst [vmem:[%s820_s12] sm:$0xff] %v1965_v60  ;;  %v1972_v14 = vmax.f32 %v1962_v62, 0.0  ;;  %v1966_v22 = vmax.f32 %v1938_v17, 0.0 }
 0x1c1   : > { %1977 = vst [vmem:[%s820_s12 + $0x20] sm:$0xff] %v1969_v19  ;;  %1976 = vst [vmem:[%s820_s12 + $0x18] sm:$0xff] %v1968_v20  ;;  %v1970_v23 = vmax.f32 %v1954_v21, 0.0 }
 0x1c2   : > { %1980 = vst [vmem:[%s820_s12 + $0x38] sm:$0xff] %v1972_v14  ;;  %1974 = vst [vmem:[%s820_s12 + $0x8] sm:$0xff] %v1966_v22 }
 0x1c3   : > { %1978 = vst [vmem:[%s820_s12 + $0x28] sm:$0xff] %v1970_v23 }
 0x1c6   : > { %v2038_v10 = vld [vmem:[%s820_s12 + $0x10] sm:$0xff] }
 0x1c7   : > { %v2034_v16 = vld [vmem:[%s820_s12] sm:$0xff]  ;;  %v2046_v30 = vld [vmem:[%s820_s12 + $0x30] sm:$0xff]  ;;  %2039 = vst [vmem:[%s1992_s28 + $0x20] sm:$0xff] %v2038_v10 }
 0x1c8   : > { %v2040_v25 = vld [vmem:[%s820_s12 + $0x18] sm:$0xff]  ;;  %v2042_v27 = vld [vmem:[%s820_s12 + $0x20] sm:$0xff]  ;;  %2035 = vst [vmem:[%s1992_s28] sm:$0xff] %v2034_v16  ;;  %2047 = vst [vmem:[%s1992_s28 + $0x60] sm:$0xff] %v2046_v30 }
 0x1c9   : > { %v2036_v24 = vld [vmem:[%s820_s12 + $0x8] sm:$0xff]  ;;  %v2048_v12 = vld [vmem:[%s820_s12 + $0x38] sm:$0xff]  ;;  %2041 = vst [vmem:[%s1992_s28 + $0x30] sm:$0xff] %v2040_v25  ;;  %2043 = vst [vmem:[%s1992_s28 + $0x40] sm:$0xff] %v2042_v27 }
 0x1ca   : > { %v2044_v29 = vld [vmem:[%s820_s12 + $0x28] sm:$0xff]  ;;  %2037 = vst [vmem:[%s1992_s28 + $0x10] sm:$0xff] %v2036_v24  ;;  %2049 = vst [vmem:[%s1992_s28 + $0x70] sm:$0xff] %v2048_v12 }
 0x1cb   : > { %2045 = vst [vmem:[%s1992_s28 + $0x50] sm:$0xff] %v2044_v29 }
 0x1cc PF: > { %s13_s20 = sadd.s32 1, %s2750_s20   ;;  %s3311_s12 = smov %s2722_s13 }
 0x1cd   : > { %p10_p2 = scmp.ge.s32.totalorder %s13_s20, 6   ;;  %s3312_s13 = smov %s2844_s4 }
 0x1ce   : > { %s3313_s14 = smov %s2730_s15  ;;  %s3314_s15 = smov %s2833_s27 }
 0x1cf   : > { %s3315_s16 = smov %s2742_s18  ;;  %s3316_s17 = smov %s2746_s19 }
 0x1d0   : > { %s3317_s18 = smov %s3320_s22  ;;  %s3318_s19 = smov %s3324_s23 }
 0x1d1   :  { %12 = sbr.rel (!%p10_p2) target bundleno = 5 (0x5), region = 152 }

// kernel: forward.11
= control target key start
LH: loop header
LB: loop body
LE: loop exit
PB: predicated region body
PF: predicated region fallthrough
CT: control target
= control target key end

     0   :  { %s2291_s12 = smov 0   ;;  %s2293_s13 = smov 0   ;;  %s2795_s0 = inlined_call_operand.vmem [shape: bf16[32,1152], index: 0, kind: input, shape index: {}]   ;;  %s2796_s1 = inlined_call_operand.vmem [shape: bf16[1152,256], index: 1, kind: input, shape index: {}]   ;;  %s2797_s2 = inlined_call_operand.vmem [shape: f32[1,256], index: 2, kind: input, shape index: {}]   ;;  %s2798_s3 = inlined_call_operand.vmem [shape: f32[32,256], index: 3, kind: output, shape index: {}]  }
   0x1   :  { %s2295_s14 = smov 0   ;;  %s2297_s15 = smov 0  }
   0x2   :  { %s2299_s16 = smov 0   ;;  %s2301_s17 = smov 0  }
   0x3   :  { %s2303_s18 = smov 0   ;;  %s2305_s19 = smov 0  }
   0x4   :  { %s2307_s20 = smov 0  }
   0x5 LB: > { %s1820_s21 = sadd.s32 4294967295, %s2267_s20   ;;  %s22_s22 = sadd.s32 1, %s2259_s18  ;;  %s2267_s20 = sphi %s2307_s20, %s13_s20   ;;  %s2263_s19 = sphi %s2305_s19, %s2807_s19   ;;  %s2259_s18 = sphi %s2303_s18, %s2806_s18   ;;  %s2255_s17 = sphi %s2301_s17, %s2805_s17   ;;  %s2251_s16 = sphi %s2299_s16, %s2804_s16   ;;  %s2247_s15 = sphi %s2297_s15, %s2803_s15   ;;  %s2243_s14 = sphi %s2295_s14, %s2802_s14   ;;  %s2239_s13 = sphi %s2293_s13, %s2801_s13   ;;  %s2235_s12 = sphi %s2291_s12, %s2800_s12  }
   0x6   : > { %p23_p0 = scmp.ge.s32.totalorder %s22_s22, 2  ;;  %s25_s23 = sadd.s32 1, %s2263_s19 }
   0x7   : > { %s58_s24 = sadd.s32 1, %s2247_s15  ;;  %p65_p1 = scmp.ne.s32.totalorder %s2247_s15, %s2243_s14 }
   0x8   : > { %s2809_s22 = smov (%p23_p0, %s22_s22), 0  ;;  %s2811_s23 = smov (!%p23_p0, %s25_s23), %s2263_s19 }
   0x9   : > { %s55_s25 = ssub.s32 %s2259_s18, %s2809_s22  ;;  %p66_p2 = scmp.eq.s32.totalorder %s2267_s20, 0 }
   0xa   : > { %p27_p3 = scmp.ge.s32.totalorder %s2811_s23, 2  ;;  %p56_p4 = scmp.eq.s32.totalorder %s55_s25, 0 }
   0xb   : > { %p67_p5 = por %p66_p2, %p65_p1  ;;  %s112_s26 = sadd.s32 1, %s2239_s13 }
   0xc   : > { %s2813_s23 = smov (%p27_p3, %s2811_s23), 0  ;;  %p122_p6 = scmp.ne.s32.totalorder %s2239_s13, %s2235_s12 }
   0xd   : > { %s2352_s27 = scalar_select %p56_p4, %s2247_s15, %s58_s24  }
   0xe   : > { %s107_s28 = ssub.s32 %s2263_s19, %s2813_s23  ;;  %p123_p7 = scmp.eq.s32.totalorder %s1820_s21, 3 }
   0xf   : > { %s109_s29 = sor.u32 %s107_s28, %s55_s25  ;;  %p1823_p10 = scmp.ge.s32.totalorder %s2267_s20, 4 }
  0x10   : > { %p110_p8 = scmp.eq.s32.totalorder %s109_s29, 0  ;;  %p2358_p9 = por %p123_p7, %p122_p6 }
  0x11   : > { %145 = sbr.rel (%p1823_p10) target bundleno = 124 (0x7c), region = 16 }
  0x12   : > { %s2363_s4 = scalar_select %p110_p8, %s2239_s13, %s112_s26  }
  0x18   : > { %158 = sbr.rel (!%p67_p5) target bundleno = 124 (0x7c), region = 24  ;;  %s160_s5 = sand.u32 (%p67_p5), 1, %s2247_s15  }
  0x19   : > { %s1824_s6 = sshll.u32 (%p67_p5), %s2259_s18, 2  ;;  %s2035_s7 = smul.u32 (%p67_p5), 576, %s160_s5 }
  0x1a   : > { %s2371_s10 = scalar_lea.vmem (%p67_p5), %s2796_s1, %s1824_s6 }
  0x1b   : > { %v180_v0 = vld [vmem:[%s2371_s10] sm:$0xf] (%p67_p5)  ;;  %v182_v1 = vld [vmem:[%s2371_s10 + $0x8] sm:$0xf] (%p67_p5)  ;;  %v184_v2 = vld [vmem:[%s2371_s10 + $0x10] sm:$0xf] (%p67_p5) }
  0x1c   : > { %v186_v3 = vld [vmem:[%s2371_s10 + $0x18] sm:$0xf] (%p67_p5)  ;;  %v188_v4 = vld [vmem:[%s2371_s10 + $0x20] sm:$0xf] (%p67_p5)  ;;  %s2378_s11 = scalar_lea.vmem (%p67_p5), [#allocation2], %s2035_s7 }
  0x1d   : > { %181 = vst [vmem:[%s2378_s11] sm:$0xf] (%p67_p5), %v180_v0  ;;  %183 = vst [vmem:[%s2378_s11 + $0x4] sm:$0xf] (%p67_p5), %v182_v1  ;;  %v190_v5 = vld [vmem:[%s2371_s10 + $0x28] sm:$0xf] (%p67_p5) }
  0x1e   : > { %185 = vst [vmem:[%s2378_s11 + $0x8] sm:$0xf] (%p67_p5), %v184_v2  ;;  %187 = vst [vmem:[%s2378_s11 + $0xc] sm:$0xf] (%p67_p5), %v186_v3  ;;  %v192_v6 = vld [vmem:[%s2371_s10 + $0x30] sm:$0xf] (%p67_p5) }
  0x1f   : > { %189 = vst [vmem:[%s2378_s11 + $0x10] sm:$0xf] %v188_v4  ;;  %v194_v7 = vld [vmem:[%s2371_s10 + $0x38] sm:$0xf]  ;;  %191 = vst [vmem:[%s2378_s11 + $0x14] sm:$0xf] %v190_v5 }
  0x20   : > { %193 = vst [vmem:[%s2378_s11 + $0x18] sm:$0xf] %v192_v6  ;;  %195 = vst [vmem:[%s2378_s11 + $0x1c] sm:$0xf] %v194_v7  ;;  %v196_v8 = vld [vmem:[%s2371_s10 + $0x40] sm:$0xf] }
  0x21   : > { %v198_v9 = vld [vmem:[%s2371_s10 + $0x48] sm:$0xf]  ;;  %v200_v10 = vld [vmem:[%s2371_s10 + $0x50] sm:$0xf]  ;;  %197 = vst [vmem:[%s2378_s11 + $0x20] sm:$0xf] %v196_v8 }
  0x22   : > { %199 = vst [vmem:[%s2378_s11 + $0x24] sm:$0xf] %v198_v9  ;;  %201 = vst [vmem:[%s2378_s11 + $0x28] sm:$0xf] %v200_v10  ;;  %v202_v11 = vld [vmem:[%s2371_s10 + $0x58] sm:$0xf] }
  0x23   : > { %v204_v12 = vld [vmem:[%s2371_s10 + $0x60] sm:$0xf]  ;;  %v206_v13 = vld [vmem:[%s2371_s10 + $0x68] sm:$0xf]  ;;  %203 = vst [vmem:[%s2378_s11 + $0x2c] sm:$0xf] %v202_v11 }
  0x24   : > { %205 = vst [vmem:[%s2378_s11 + $0x30] sm:$0xf] %v204_v12  ;;  %207 = vst [vmem:[%s2378_s11 + $0x34] sm:$0xf] %v206_v13  ;;  %v208_v14 = vld [vmem:[%s2371_s10 + $0x70] sm:$0xf] }
  0x25   : > { %v210_v15 = vld [vmem:[%s2371_s10 + $0x78] sm:$0xf]  ;;  %v212_v16 = vld [vmem:[%s2371_s10 + $0x80] sm:$0xf]  ;;  %209 = vst [vmem:[%s2378_s11 + $0x38] sm:$0xf] %v208_v14 }
  0x26   : > { %211 = vst [vmem:[%s2378_s11 + $0x3c] sm:$0xf] %v210_v15  ;;  %213 = vst [vmem:[%s2378_s11 + $0x40] sm:$0xf] %v212_v16  ;;  %v214_v17 = vld [vmem:[%s2371_s10 + $0x88] sm:$0xf] }
  0x27   : > { %v216_v18 = vld [vmem:[%s2371_s10 + $0x90] sm:$0xf]  ;;  %v218_v19 = vld [vmem:[%s2371_s10 + $0x98] sm:$0xf]  ;;  %215 = vst [vmem:[%s2378_s11 + $0x44] sm:$0xf] %v214_v17 }
  0x28   : > { %217 = vst [vmem:[%s2378_s11 + $0x48] sm:$0xf] %v216_v18  ;;  %219 = vst [vmem:[%s2378_s11 + $0x4c] sm:$0xf] %v218_v19  ;;  %v220_v20 = vld [vmem:[%s2371_s10 + $0xa0] sm:$0xf] }
  0x29   : > { %v222_v21 = vld [vmem:[%s2371_s10 + $0xa8] sm:$0xf]  ;;  %v224_v22 = vld [vmem:[%s2371_s10 + $0xb0] sm:$0xf]  ;;  %221 = vst [vmem:[%s2378_s11 + $0x50] sm:$0xf] %v220_v20 }
  0x2a   : > { %223 = vst [vmem:[%s2378_s11 + $0x54] sm:$0xf] %v222_v21  ;;  %225 = vst [vmem:[%s2378_s11 + $0x58] sm:$0xf] %v224_v22  ;;  %v226_v23 = vld [vmem:[%s2371_s10 + $0xb8] sm:$0xf] }
  0x2b   : > { %v228_v24 = vld [vmem:[%s2371_s10 + $0xc0] sm:$0xf]  ;;  %v230_v25 = vld [vmem:[%s2371_s10 + $0xc8] sm:$0xf]  ;;  %227 = vst [vmem:[%s2378_s11 + $0x5c] sm:$0xf] %v226_v23 }
  0x2c   : > { %229 = vst [vmem:[%s2378_s11 + $0x60] sm:$0xf] %v228_v24  ;;  %231 = vst [vmem:[%s2378_s11 + $0x64] sm:$0xf] %v230_v25  ;;  %v232_v26 = vld [vmem:[%s2371_s10 + $0xd0] sm:$0xf] }
  0x2d   : > { %v234_v27 = vld [vmem:[%s2371_s10 + $0xd8] sm:$0xf]  ;;  %v236_v28 = vld [vmem:[%s2371_s10 + $0xe0] sm:$0xf]  ;;  %233 = vst [vmem:[%s2378_s11 + $0x68] sm:$0xf] %v232_v26 }
  0x2e   : > { %235 = vst [vmem:[%s2378_s11 + $0x6c] sm:$0xf] %v234_v27  ;;  %237 = vst [vmem:[%s2378_s11 + $0x70] sm:$0xf] %v236_v28  ;;  %v238_v29 = vld [vmem:[%s2371_s10 + $0xe8] sm:$0xf] }
  0x2f   : > { %v240_v30 = vld [vmem:[%s2371_s10 + $0xf0] sm:$0xf]  ;;  %v242_v31 = vld [vmem:[%s2371_s10 + $0xf8] sm:$0xf]  ;;  %239 = vst [vmem:[%s2378_s11 + $0x74] sm:$0xf] %v238_v29 }
  0x30   : > { %241 = vst [vmem:[%s2378_s11 + $0x78] sm:$0xf] %v240_v30  ;;  %243 = vst [vmem:[%s2378_s11 + $0x7c] sm:$0xf] %v242_v31  ;;  %v244_v32 = vld [vmem:[%s2371_s10 + $0x100] sm:$0xf] }
  0x31   : > { %v246_v33 = vld [vmem:[%s2371_s10 + $0x108] sm:$0xf]  ;;  %v248_v34 = vld [vmem:[%s2371_s10 + $0x110] sm:$0xf]  ;;  %245 = vst [vmem:[%s2378_s11 + $0x80] sm:$0xf] %v244_v32 }
  0x32   : > { %247 = vst [vmem:[%s2378_s11 + $0x84] sm:$0xf] %v246_v33  ;;  %249 = vst [vmem:[%s2378_s11 + $0x88] sm:$0xf] %v248_v34  ;;  %v250_v35 = vld [vmem:[%s2371_s10 + $0x118] sm:$0xf] }
  0x33   : > { %v252_v36 = vld [vmem:[%s2371_s10 + $0x120] sm:$0xf]  ;;  %v254_v37 = vld [vmem:[%s2371_s10 + $0x128] sm:$0xf]  ;;  %251 = vst [vmem:[%s2378_s11 + $0x8c] sm:$0xf] %v250_v35 }
  0x34   : > { %253 = vst [vmem:[%s2378_s11 + $0x90] sm:$0xf] %v252_v36  ;;  %255 = vst [vmem:[%s2378_s11 + $0x94] sm:$0xf] %v254_v37  ;;  %v256_v38 = vld [vmem:[%s2371_s10 + $0x130] sm:$0xf] }
  0x35   : > { %v258_v39 = vld [vmem:[%s2371_s10 + $0x138] sm:$0xf]  ;;  %v260_v40 = vld [vmem:[%s2371_s10 + $0x140] sm:$0xf]  ;;  %257 = vst [vmem:[%s2378_s11 + $0x98] sm:$0xf] %v256_v38 }
  0x36   : > { %259 = vst [vmem:[%s2378_s11 + $0x9c] sm:$0xf] %v258_v39  ;;  %261 = vst [vmem:[%s2378_s11 + $0xa0] sm:$0xf] %v260_v40  ;;  %v262_v41 = vld [vmem:[%s2371_s10 + $0x148] sm:$0xf] }
  0x37   : > { %v264_v42 = vld [vmem:[%s2371_s10 + $0x150] sm:$0xf]  ;;  %v266_v43 = vld [vmem:[%s2371_s10 + $0x158] sm:$0xf]  ;;  %263 = vst [vmem:[%s2378_s11 + $0xa4] sm:$0xf] %v262_v41 }
  0x38   : > { %265 = vst [vmem:[%s2378_s11 + $0xa8] sm:$0xf] %v264_v42  ;;  %267 = vst [vmem:[%s2378_s11 + $0xac] sm:$0xf] %v266_v43  ;;  %v268_v44 = vld [vmem:[%s2371_s10 + $0x160] sm:$0xf] }
  0x39   : > { %v270_v45 = vld [vmem:[%s2371_s10 + $0x168] sm:$0xf]  ;;  %v272_v46 = vld [vmem:[%s2371_s10 + $0x170] sm:$0xf]  ;;  %269 = vst [vmem:[%s2378_s11 + $0xb0] sm:$0xf] %v268_v44 }
  0x3a   : > { %271 = vst [vmem:[%s2378_s11 + $0xb4] sm:$0xf] %v270_v45  ;;  %273 = vst [vmem:[%s2378_s11 + $0xb8] sm:$0xf] %v272_v46  ;;  %v274_v47 = vld [vmem:[%s2371_s10 + $0x178] sm:$0xf] }
  0x3b   : > { %v276_v48 = vld [vmem:[%s2371_s10 + $0x180] sm:$0xf]  ;;  %v278_v49 = vld [vmem:[%s2371_s10 + $0x188] sm:$0xf]  ;;  %275 = vst [vmem:[%s2378_s11 + $0xbc] sm:$0xf] %v274_v47 }
  0x3c   : > { %277 = vst [vmem:[%s2378_s11 + $0xc0] sm:$0xf] %v276_v48  ;;  %279 = vst [vmem:[%s2378_s11 + $0xc4] sm:$0xf] %v278_v49  ;;  %v280_v50 = vld [vmem:[%s2371_s10 + $0x190] sm:$0xf] }
  0x3d   : > { %v282_v51 = vld [vmem:[%s2371_s10 + $0x198] sm:$0xf]  ;;  %v284_v52 = vld [vmem:[%s2371_s10 + $0x1a0] sm:$0xf]  ;;  %281 = vst [vmem:[%s2378_s11 + $0xc8] sm:$0xf] %v280_v50 }
  0x3e   : > { %283 = vst [vmem:[%s2378_s11 + $0xcc] sm:$0xf] %v282_v51  ;;  %285 = vst [vmem:[%s2378_s11 + $0xd0] sm:$0xf] %v284_v52  ;;  %v286_v53 = vld [vmem:[%s2371_s10 + $0x1a8] sm:$0xf] }
  0x3f   : > { %v288_v54 = vld [vmem:[%s2371_s10 + $0x1b0] sm:$0xf]  ;;  %v290_v55 = vld [vmem:[%s2371_s10 + $0x1b8] sm:$0xf]  ;;  %287 = vst [vmem:[%s2378_s11 + $0xd4] sm:$0xf] %v286_v53 }
  0x40   : > { %289 = vst [vmem:[%s2378_s11 + $0xd8] sm:$0xf] %v288_v54  ;;  %291 = vst [vmem:[%s2378_s11 + $0xdc] sm:$0xf] %v290_v55  ;;  %v292_v56 = vld [vmem:[%s2371_s10 + $0x1c0] sm:$0xf] }
  0x41   : > { %v294_v57 = vld [vmem:[%s2371_s10 + $0x1c8] sm:$0xf]  ;;  %v296_v58 = vld [vmem:[%s2371_s10 + $0x1d0] sm:$0xf]  ;;  %293 = vst [vmem:[%s2378_s11 + $0xe0] sm:$0xf] %v292_v56 }
  0x42   : > { %295 = vst [vmem:[%s2378_s11 + $0xe4] sm:$0xf] %v294_v57  ;;  %297 = vst [vmem:[%s2378_s11 + $0xe8] sm:$0xf] %v296_v58  ;;  %v298_v59 = vld [vmem:[%s2371_s10 + $0x1d8] sm:$0xf] }
  0x43   : > { %v300_v60 = vld [vmem:[%s2371_s10 + $0x1e0] sm:$0xf]  ;;  %v302_v61 = vld [vmem:[%s2371_s10 + $0x1e8] sm:$0xf]  ;;  %299 = vst [vmem:[%s2378_s11 + $0xec] sm:$0xf] %v298_v59 }
  0x44   : > { %301 = vst [vmem:[%s2378_s11 + $0xf0] sm:$0xf] %v300_v60  ;;  %303 = vst [vmem:[%s2378_s11 + $0xf4] sm:$0xf] %v302_v61  ;;  %v304_v62 = vld [vmem:[%s2371_s10 + $0x1f0] sm:$0xf] }
  0x45   : > { %v306_v63 = vld [vmem:[%s2371_s10 + $0x1f8] sm:$0xf]  ;;  %v308_v0 = vld [vmem:[%s2371_s10 + $0x200] sm:$0xf]  ;;  %305 = vst [vmem:[%s2378_s11 + $0xf8] sm:$0xf] %v304_v62 }
  0x46   : > { %307 = vst [vmem:[%s2378_s11 + $0xfc] sm:$0xf] %v306_v63  ;;  %309 = vst [vmem:[%s2378_s11 + $0x100] sm:$0xf] %v308_v0  ;;  %v310_v1 = vld [vmem:[%s2371_s10 + $0x208] sm:$0xf] }
  0x47   : > { %v312_v2 = vld [vmem:[%s2371_s10 + $0x210] sm:$0xf]  ;;  %v314_v3 = vld [vmem:[%s2371_s10 + $0x218] sm:$0xf]  ;;  %311 = vst [vmem:[%s2378_s11 + $0x104] sm:$0xf] %v310_v1 }
  0x48   : > { %313 = vst [vmem:[%s2378_s11 + $0x108] sm:$0xf] %v312_v2  ;;  %315 = vst [vmem:[%s2378_s11 + $0x10c] sm:$0xf] %v314_v3  ;;  %v316_v4 = vld [vmem:[%s2371_s10 + $0x220] sm:$0xf] }
  0x49   : > { %v318_v5 = vld [vmem:[%s2371_s10 + $0x228] sm:$0xf]  ;;  %v320_v6 = vld [vmem:[%s2371_s10 + $0x230] sm:$0xf]  ;;  %317 = vst [vmem:[%s2378_s11 + $0x110] sm:$0xf] %v316_v4 }
  0x4a   : > { %319 = vst [vmem:[%s2378_s11 + $0x114] sm:$0xf] %v318_v5  ;;  %321 = vst [vmem:[%s2378_s11 + $0x118] sm:$0xf] %v320_v6  ;;  %v322_v7 = vld [vmem:[%s2371_s10 + $0x238] sm:$0xf] }
  0x4b   : > { %v324_v8 = vld [vmem:[%s2371_s10 + $0x240] sm:$0xf]  ;;  %v326_v9 = vld [vmem:[%s2371_s10 + $0x248] sm:$0xf]  ;;  %323 = vst [vmem:[%s2378_s11 + $0x11c] sm:$0xf] %v322_v7 }
  0x4c   : > { %325 = vst [vmem:[%s2378_s11 + $0x120] sm:$0xf] %v324_v8  ;;  %327 = vst [vmem:[%s2378_s11 + $0x124] sm:$0xf] %v326_v9  ;;  %v328_v10 = vld [vmem:[%s2371_s10 + $0x250] sm:$0xf] }
  0x4d   : > { %v330_v11 = vld [vmem:[%s2371_s10 + $0x258] sm:$0xf]  ;;  %v332_v12 = vld [vmem:[%s2371_s10 + $0x260] sm:$0xf]  ;;  %329 = vst [vmem:[%s2378_s11 + $0x128] sm:$0xf] %v328_v10 }
  0x4e   : > { %331 = vst [vmem:[%s2378_s11 + $0x12c] sm:$0xf] %v330_v11  ;;  %333 = vst [vmem:[%s2378_s11 + $0x130] sm:$0xf] %v332_v12  ;;  %v334_v13 = vld [vmem:[%s2371_s10 + $0x268] sm:$0xf] }
  0x4f   : > { %v336_v14 = vld [vmem:[%s2371_s10 + $0x270] sm:$0xf]  ;;  %v338_v15 = vld [vmem:[%s2371_s10 + $0x278] sm:$0xf]  ;;  %335 = vst [vmem:[%s2378_s11 + $0x134] sm:$0xf] %v334_v13 }
  0x50   : > { %337 = vst [vmem:[%s2378_s11 + $0x138] sm:$0xf] %v336_v14  ;;  %339 = vst [vmem:[%s2378_s11 + $0x13c] sm:$0xf] %v338_v15  ;;  %v340_v16 = vld [vmem:[%s2371_s10 + $0x280] sm:$0xf] }
  0x51   : > { %v342_v17 = vld [vmem:[%s2371_s10 + $0x288] sm:$0xf]  ;;  %v344_v18 = vld [vmem:[%s2371_s10 + $0x290] sm:$0xf]  ;;  %341 = vst [vmem:[%s2378_s11 + $0x140] sm:$0xf] %v340_v16 }
  0x52   : > { %343 = vst [vmem:[%s2378_s11 + $0x144] sm:$0xf] %v342_v17  ;;  %345 = vst [vmem:[%s2378_s11 + $0x148] sm:$0xf] %v344_v18  ;;  %v346_v19 = vld [vmem:[%s2371_s10 + $0x298] sm:$0xf] }
  0x53   : > { %v348_v20 = vld [vmem:[%s2371_s10 + $0x2a0] sm:$0xf]  ;;  %v350_v21 = vld [vmem:[%s2371_s10 + $0x2a8] sm:$0xf]  ;;  %347 = vst [vmem:[%s2378_s11 + $0x14c] sm:$0xf] %v346_v19 }
  0x54   : > { %349 = vst [vmem:[%s2378_s11 + $0x150] sm:$0xf] %v348_v20  ;;  %351 = vst [vmem:[%s2378_s11 + $0x154] sm:$0xf] %v350_v21  ;;  %v352_v22 = vld [vmem:[%s2371_s10 + $0x2b0] sm:$0xf] }
  0x55   : > { %v354_v23 = vld [vmem:[%s2371_s10 + $0x2b8] sm:$0xf]  ;;  %v356_v24 = vld [vmem:[%s2371_s10 + $0x2c0] sm:$0xf]  ;;  %353 = vst [vmem:[%s2378_s11 + $0x158] sm:$0xf] %v352_v22 }
  0x56   : > { %355 = vst [vmem:[%s2378_s11 + $0x15c] sm:$0xf] %v354_v23  ;;  %357 = vst [vmem:[%s2378_s11 + $0x160] sm:$0xf] %v356_v24  ;;  %v358_v25 = vld [vmem:[%s2371_s10 + $0x2c8] sm:$0xf] }
  0x57   : > { %v360_v26 = vld [vmem:[%s2371_s10 + $0x2d0] sm:$0xf]  ;;  %v362_v27 = vld [vmem:[%s2371_s10 + $0x2d8] sm:$0xf]  ;;  %359 = vst [vmem:[%s2378_s11 + $0x164] sm:$0xf] %v358_v25 }
  0x58   : > { %361 = vst [vmem:[%s2378_s11 + $0x168] sm:$0xf] %v360_v26  ;;  %363 = vst [vmem:[%s2378_s11 + $0x16c] sm:$0xf] %v362_v27  ;;  %v364_v28 = vld [vmem:[%s2371_s10 + $0x2e0] sm:$0xf] }
  0x59   : > { %v366_v29 = vld [vmem:[%s2371_s10 + $0x2e8] sm:$0xf]  ;;  %v368_v30 = vld [vmem:[%s2371_s10 + $0x2f0] sm:$0xf]  ;;  %365 = vst [vmem:[%s2378_s11 + $0x170] sm:$0xf] %v364_v28 }
  0x5a   : > { %367 = vst [vmem:[%s2378_s11 + $0x174] sm:$0xf] %v366_v29  ;;  %369 = vst [vmem:[%s2378_s11 + $0x178] sm:$0xf] %v368_v30  ;;  %v370_v31 = vld [vmem:[%s2371_s10 + $0x2f8] sm:$0xf] }
  0x5b   : > { %v372_v32 = vld [vmem:[%s2371_s10 + $0x300] sm:$0xf]  ;;  %v374_v33 = vld [vmem:[%s2371_s10 + $0x308] sm:$0xf]  ;;  %371 = vst [vmem:[%s2378_s11 + $0x17c] sm:$0xf] %v370_v31 }
  0x5c   : > { %373 = vst [vmem:[%s2378_s11 + $0x180] sm:$0xf] %v372_v32  ;;  %375 = vst [vmem:[%s2378_s11 + $0x184] sm:$0xf] %v374_v33  ;;  %v376_v34 = vld [vmem:[%s2371_s10 + $0x310] sm:$0xf] }
  0x5d   : > { %v378_v35 = vld [vmem:[%s2371_s10 + $0x318] sm:$0xf]  ;;  %v380_v36 = vld [vmem:[%s2371_s10 + $0x320] sm:$0xf]  ;;  %377 = vst [vmem:[%s2378_s11 + $0x188] sm:$0xf] %v376_v34 }
  0x5e   : > { %379 = vst [vmem:[%s2378_s11 + $0x18c] sm:$0xf] %v378_v35  ;;  %381 = vst [vmem:[%s2378_s11 + $0x190] sm:$0xf] %v380_v36  ;;  %v382_v37 = vld [vmem:[%s2371_s10 + $0x328] sm:$0xf] }
  0x5f   : > { %v384_v38 = vld [vmem:[%s2371_s10 + $0x330] sm:$0xf]  ;;  %v386_v39 = vld [vmem:[%s2371_s10 + $0x338] sm:$0xf]  ;;  %383 = vst [vmem:[%s2378_s11 + $0x194] sm:$0xf] %v382_v37 }
  0x60   : > { %385 = vst [vmem:[%s2378_s11 + $0x198] sm:$0xf] %v384_v38  ;;  %387 = vst [vmem:[%s2378_s11 + $0x19c] sm:$0xf] %v386_v39  ;;  %v388_v40 = vld [vmem:[%s2371_s10 + $0x340] sm:$0xf] }
  0x61   : > { %v390_v41 = vld [vmem:[%s2371_s10 + $0x348] sm:$0xf]  ;;  %v392_v42 = vld [vmem:[%s2371_s10 + $0x350] sm:$0xf]  ;;  %389 = vst [vmem:[%s2378_s11 + $0x1a0] sm:$0xf] %v388_v40 }
  0x62   : > { %391 = vst [vmem:[%s2378_s11 + $0x1a4] sm:$0xf] %v390_v41  ;;  %393 = vst [vmem:[%s2378_s11 + $0x1a8] sm:$0xf] %v392_v42  ;;  %v394_v43 = vld [vmem:[%s2371_s10 + $0x358] sm:$0xf] }
  0x63   : > { %v396_v44 = vld [vmem:[%s2371_s10 + $0x360] sm:$0xf]  ;;  %v398_v45 = vld [vmem:[%s2371_s10 + $0x368] sm:$0xf]  ;;  %395 = vst [vmem:[%s2378_s11 + $0x1ac] sm:$0xf] %v394_v43 }
  0x64   : > { %397 = vst [vmem:[%s2378_s11 + $0x1b0] sm:$0xf] %v396_v44  ;;  %399 = vst [vmem:[%s2378_s11 + $0x1b4] sm:$0xf] %v398_v45  ;;  %v400_v46 = vld [vmem:[%s2371_s10 + $0x370] sm:$0xf] }
  0x65   : > { %v402_v47 = vld [vmem:[%s2371_s10 + $0x378] sm:$0xf]  ;;  %v404_v48 = vld [vmem:[%s2371_s10 + $0x380] sm:$0xf]  ;;  %401 = vst [vmem:[%s2378_s11 + $0x1b8] sm:$0xf] %v400_v46 }
  0x66   : > { %403 = vst [vmem:[%s2378_s11 + $0x1bc] sm:$0xf] %v402_v47  ;;  %405 = vst [vmem:[%s2378_s11 + $0x1c0] sm:$0xf] %v404_v48  ;;  %v406_v49 = vld [vmem:[%s2371_s10 + $0x388] sm:$0xf] }
  0x67   : > { %v408_v50 = vld [vmem:[%s2371_s10 + $0x390] sm:$0xf]  ;;  %v410_v51 = vld [vmem:[%s2371_s10 + $0x398] sm:$0xf]  ;;  %407 = vst [vmem:[%s2378_s11 + $0x1c4] sm:$0xf] %v406_v49 }
  0x68   : > { %409 = vst [vmem:[%s2378_s11 + $0x1c8] sm:$0xf] %v408_v50  ;;  %411 = vst [vmem:[%s2378_s11 + $0x1cc] sm:$0xf] %v410_v51  ;;  %v412_v52 = vld [vmem:[%s2371_s10 + $0x3a0] sm:$0xf] }
  0x69   : > { %v414_v53 = vld [vmem:[%s2371_s10 + $0x3a8] sm:$0xf]  ;;  %v416_v54 = vld [vmem:[%s2371_s10 + $0x3b0] sm:$0xf]  ;;  %413 = vst [vmem:[%s2378_s11 + $0x1d0] sm:$0xf] %v412_v52 }
  0x6a   : > { %415 = vst [vmem:[%s2378_s11 + $0x1d4] sm:$0xf] %v414_v53  ;;  %417 = vst [vmem:[%s2378_s11 + $0x1d8] sm:$0xf] %v416_v54  ;;  %v418_v55 = vld [vmem:[%s2371_s10 + $0x3b8] sm:$0xf] }
  0x6b   : > { %v420_v56 = vld [vmem:[%s2371_s10 + $0x3c0] sm:$0xf]  ;;  %v422_v57 = vld [vmem:[%s2371_s10 + $0x3c8] sm:$0xf]  ;;  %419 = vst [vmem:[%s2378_s11 + $0x1dc] sm:$0xf] %v418_v55 }
  0x6c   : > { %421 = vst [vmem:[%s2378_s11 + $0x1e0] sm:$0xf] %v420_v56  ;;  %423 = vst [vmem:[%s2378_s11 + $0x1e4] sm:$0xf] %v422_v57  ;;  %v424_v58 = vld [vmem:[%s2371_s10 + $0x3d0] sm:$0xf] }
  0x6d   : > { %v426_v59 = vld [vmem:[%s2371_s10 + $0x3d8] sm:$0xf]  ;;  %v428_v60 = vld [vmem:[%s2371_s10 + $0x3e0] sm:$0xf]  ;;  %425 = vst [vmem:[%s2378_s11 + $0x1e8] sm:$0xf] %v424_v58 }
  0x6e   : > { %427 = vst [vmem:[%s2378_s11 + $0x1ec] sm:$0xf] %v426_v59  ;;  %429 = vst [vmem:[%s2378_s11 + $0x1f0] sm:$0xf] %v428_v60  ;;  %v430_v61 = vld [vmem:[%s2371_s10 + $0x3e8] sm:$0xf] }
  0x6f   : > { %v432_v62 = vld [vmem:[%s2371_s10 + $0x3f0] sm:$0xf]  ;;  %v434_v63 = vld [vmem:[%s2371_s10 + $0x3f8] sm:$0xf]  ;;  %431 = vst [vmem:[%s2378_s11 + $0x1f4] sm:$0xf] %v430_v61 }
  0x70   : > { %433 = vst [vmem:[%s2378_s11 + $0x1f8] sm:$0xf] %v432_v62  ;;  %435 = vst [vmem:[%s2378_s11 + $0x1fc] sm:$0xf] %v434_v63  ;;  %v436_v0 = vld [vmem:[%s2371_s10 + $0x400] sm:$0xf] }
  0x71   : > { %v438_v1 = vld [vmem:[%s2371_s10 + $0x408] sm:$0xf]  ;;  %v440_v2 = vld [vmem:[%s2371_s10 + $0x410] sm:$0xf]  ;;  %437 = vst [vmem:[%s2378_s11 + $0x200] sm:$0xf] %v436_v0 }
  0x72   : > { %439 = vst [vmem:[%s2378_s11 + $0x204] sm:$0xf] %v438_v1  ;;  %441 = vst [vmem:[%s2378_s11 + $0x208] sm:$0xf] %v440_v2  ;;  %v442_v3 = vld [vmem:[%s2371_s10 + $0x418] sm:$0xf] }
  0x73   : > { %v444_v4 = vld [vmem:[%s2371_s10 + $0x420] sm:$0xf]  ;;  %v446_v5 = vld [vmem:[%s2371_s10 + $0x428] sm:$0xf]  ;;  %443 = vst [vmem:[%s2378_s11 + $0x20c] sm:$0xf] %v442_v3 }
  0x74   : > { %445 = vst [vmem:[%s2378_s11 + $0x210] sm:$0xf] %v444_v4  ;;  %447 = vst [vmem:[%s2378_s11 + $0x214] sm:$0xf] %v446_v5  ;;  %v448_v6 = vld [vmem:[%s2371_s10 + $0x430] sm:$0xf] }
  0x75   : > { %v450_v7 = vld [vmem:[%s2371_s10 + $0x438] sm:$0xf]  ;;  %v452_v8 = vld [vmem:[%s2371_s10 + $0x440] sm:$0xf]  ;;  %449 = vst [vmem:[%s2378_s11 + $0x218] sm:$0xf] %v448_v6 }
  0x76   : > { %451 = vst [vmem:[%s2378_s11 + $0x21c] sm:$0xf] %v450_v7  ;;  %453 = vst [vmem:[%s2378_s11 + $0x220] sm:$0xf] %v452_v8  ;;  %v454_v9 = vld [vmem:[%s2371_s10 + $0x448] sm:$0xf] }
  0x77   : > { %v456_v10 = vld [vmem:[%s2371_s10 + $0x450] sm:$0xf]  ;;  %v458_v11 = vld [vmem:[%s2371_s10 + $0x458] sm:$0xf]  ;;  %455 = vst [vmem:[%s2378_s11 + $0x224] sm:$0xf] %v454_v9 }
  0x78   : > { %457 = vst [vmem:[%s2378_s11 + $0x228] sm:$0xf] %v456_v10  ;;  %459 = vst [vmem:[%s2378_s11 + $0x22c] sm:$0xf] %v458_v11  ;;  %v460_v12 = vld [vmem:[%s2371_s10 + $0x460] sm:$0xf] }
  0x79   : > { %v462_v13 = vld [vmem:[%s2371_s10 + $0x468] sm:$0xf]  ;;  %v464_v14 = vld [vmem:[%s2371_s10 + $0x470] sm:$0xf]  ;;  %461 = vst [vmem:[%s2378_s11 + $0x230] sm:$0xf] %v460_v12 }
  0x7a   : > { %463 = vst [vmem:[%s2378_s11 + $0x234] sm:$0xf] %v462_v13  ;;  %465 = vst [vmem:[%s2378_s11 + $0x238] sm:$0xf] %v464_v14  ;;  %v466_v15 = vld [vmem:[%s2371_s10 + $0x478] sm:$0xf] }
  0x7b   : > { %467 = vst [vmem:[%s2378_s11 + $0x23c] sm:$0xf] %v466_v15 }
  0x7c PF: > { %p1825_p11 = scmp.ge.s32.totalorder %s2267_s20, 1  ;;  %p783_p12 = scmp.lt.s32.totalorder %s2267_s20, 5 }
  0x7e   : > { %p784_p13 = pnand %p1825_p11, %p783_p12 }
  0x7f   : > { %s790_s21 = sand.u32 (!%p784_p13), 1, %s2243_s14   ;;  %s1827_s14 = sshll.u32 (!%p784_p13), %s2255_s17, 1  ;;  %vm2270_vm0 = vmmov (!%p784_p13), 0  }
  0x80   : > { %787 = sbr.rel (%p784_p13) target bundleno = 456 (0x1c8), region = 69  ;;  %p822_p0 = scmp.lt.s32.totalorder (!%p784_p13), %s1827_s14, 3 }
  0x81   : > { %s2036_s24 = smul.u32 (!%p784_p13), 576, %s790_s21  ;;  %p828_p1 = scmp.lt.s32.totalorder (!%p784_p13), %s2251_s16, 1 }
  0x82   : > { %s818_s10 = sand.u32 (!%p784_p13), 1, %s2235_s12  }
  0x83   : > { %s2666_s25 = scalar_lea.vmem (!%p784_p13), [#allocation2], %s2036_s24  ;;  %s1826_s11 = sshll.u32 (!%p784_p13), %s818_s10, 4 }
  0x84   : > { %v2112_v16 = vld [vmem:[%s2666_s25 + $0x40] sm:$0xff] (!%p784_p13)   ;;  %v2116_v20 = vld [vmem:[%s2666_s25 + $0x48] sm:$0xff] (!%p784_p13)   ;;  %v2120_v24 = vld [vmem:[%s2666_s25 + $0x50] sm:$0xff] (!%p784_p13)   ;;  %s820_s21 = scalar_lea.vmem (!%p784_p13), [#allocation3], %s1826_s11 }
  0x85   : > { %v2113_v17 = vld [vmem:[%s2666_s25] sm:$0xff] (!%p784_p13)   ;;  %1918 = vmatprep.subr.bf16.mxu0 (!%p784_p13), %v2112_v16  ;;  %v2117_v21 = vld [vmem:[%s2666_s25 + $0x8] sm:$0xff] (!%p784_p13)   ;;  %v2121_v25 = vld [vmem:[%s2666_s25 + $0x10] sm:$0xff] (!%p784_p13)  }
  0x86   : > { %v2114_v18 = vld [vmem:[%s2666_s25 + $0xc0] sm:$0xff] (!%p784_p13)   ;;  %1919 = vmatpush3.bf16.msra.mxu0 (!%p784_p13), %v2113_v17  ;;  %v2118_v22 = vld [vmem:[%s2666_s25 + $0xc8] sm:$0xff] (!%p784_p13)   ;;  %v2122_v26 = vld [vmem:[%s2666_s25 + $0xd0] sm:$0xff] (!%p784_p13)  }
  0x87   : > { %v2115_v19 = vld [vmem:[%s2666_s25 + $0x80] sm:$0xff]   ;;  %1940 = vmatprep.subr.bf16.mxu1 %v2114_v18  ;;  %1920 = vmatprep.subr.bf16.mxu0 %v2116_v20  ;;  %v2119_v23 = vld [vmem:[%s2666_s25 + $0x88] sm:$0xff]   ;;  %v2123_v27 = vld [vmem:[%s2666_s25 + $0x90] sm:$0xff]   ;;  %s2815_s14 = smov (!%p822_p0, %s1827_s14), 3  ;;  %s1917_s24 = sshll.u32 (%p2358_p9), %s2255_s17, 2 }
  0x88   : > { %1941 = vmatpush3.bf16.msra.mxu1 %v2115_v19  ;;  %v2124_v28 = vld [vmem:[%s2666_s25 + $0x58] sm:$0xff]   ;;  %v2128_v32 = vld [vmem:[%s2666_s25 + $0x60] sm:$0xff]   ;;  %v2132_v36 = vld [vmem:[%s2666_s25 + $0x68] sm:$0xff]   ;;  %s2037_s26 = smul.u32 36, %s2815_s14 }
  0x89   : > { %1942 = vmatprep.subr.bf16.mxu1 %v2118_v22  ;;  %v2125_v29 = vld [vmem:[%s2666_s25 + $0x18] sm:$0xff]   ;;  %v2129_v33 = vld [vmem:[%s2666_s25 + $0x20] sm:$0xff]   ;;  %v2133_v37 = vld [vmem:[%s2666_s25 + $0x28] sm:$0xff]   ;;  %v2269_v22 = vmov 0.0   ;;  %s829_s6 = scalar_select %p828_p1, %s2251_s16, 1 }
  0x8a   : > { %1921 = vmatpush3.bf16.msra.mxu0 %v2117_v21  ;;  %v2126_v30 = vld [vmem:[%s2666_s25 + $0xd8] sm:$0xff]   ;;  %v2130_v34 = vld [vmem:[%s2666_s25 + $0xe0] sm:$0xff]   ;;  %v2134_v38 = vld [vmem:[%s2666_s25 + $0xe8] sm:$0xff]   ;;  %s2701_s5 = scalar_lea.vmem %s2795_s0, %s2037_s26 }
  0x8b   : > { %1922 = vmatprep.subr.bf16.mxu0 %v2120_v24  ;;  %v2127_v31 = vld [vmem:[%s2666_s25 + $0x98] sm:$0xff]   ;;  %v2131_v35 = vld [vmem:[%s2666_s25 + $0xa0] sm:$0xff]   ;;  %v2135_v39 = vld [vmem:[%s2666_s25 + $0xa8] sm:$0xff]   ;;  %s830_s9 = scalar_lea.vmem %s2797_s2, %s829_s6 }
  0x8c   : > { %1943 = vmatpush3.bf16.msra.mxu1 %v2119_v23  ;;  %v2136_v40 = vld [vmem:[%s2666_s25 + $0x70] sm:$0xff]   ;;  %v2140_v44 = vld [vmem:[%s2666_s25 + $0x78] sm:$0xff]   ;;  %v2143_v47 = vld [vmem:[%s2701_s5] ss:$36 sps:$4 sm:$0xff]  }
  0x8d   : > { %1944 = vmatprep.subr.bf16.mxu1 %v2122_v26  ;;  %v2137_v41 = vld [vmem:[%s2666_s25 + $0x30] sm:$0xff]   ;;  %v2141_v45 = vld [vmem:[%s2666_s25 + $0x38] sm:$0xff]   ;;  %v2145_v48 = vld [vmem:[%s2701_s5 + $0x4] ss:$36 sps:$4 sm:$0xff]  }
  0x8e   : > { %1923 = vmatpush3.bf16.msra.mxu0 %v2121_v25  ;;  %v2138_v42 = vld [vmem:[%s2666_s25 + $0xf0] sm:$0xff]   ;;  %v2142_v46 = vld [vmem:[%s2666_s25 + $0xf8] sm:$0xff]   ;;  %1504 = vmatprep.mubr.bf16.mxu0 %v2145_v48  ;;  %v2147_v50 = vld [vmem:[%s2666_s25 + $0x140] sm:$0xff]  }
  0x8f   : > { %1924 = vmatprep.subr.bf16.mxu0 %v2124_v28  ;;  %v2139_v43 = vld [vmem:[%s2666_s25 + $0xb0] sm:$0xff]   ;;  %v2146_v49 = vld [vmem:[%s2666_s25 + $0xb8] sm:$0xff]   ;;  %v2148_v51 = vld [vmem:[%s2701_s5 + $0x8] ss:$36 sps:$4 sm:$0xff]  }
  0x90   : > { %1945 = vmatpush3.bf16.msra.mxu1 %v2123_v27  ;;  %v2150_v52 = vld [vmem:[%s2701_s5 + $0xc] ss:$36 sps:$4 sm:$0xff]   ;;  %v2151_v53 = vld [vmem:[%s2666_s25 + $0x100] sm:$0xff]   ;;  %v2162_v0 = vld [vmem:[%s2666_s25 + $0x158] sm:$0xff]  }
  0x91   : > { %1946 = vmatprep.subr.bf16.mxu1 %v2126_v30  ;;  %1545 = vmatprep.mubr.bf16.mxu1 %v2150_v52  ;;  %v2152_v54 = vld [vmem:[%s2666_s25 + $0x1c0] sm:$0xff]   ;;  %v2154_v56 = vld [vmem:[%s2666_s25 + $0x148] sm:$0xff]   ;;  %v2158_v60 = vld [vmem:[%s2666_s25 + $0x150] sm:$0xff]  }
  0x92   : > { %1925 = vmatpush3.bf16.msra.mxu0 %v2125_v29  ;;  %v2153_v55 = vld [vmem:[%s2666_s25 + $0x180] sm:$0xff]   ;;  %v2155_v57 = vld [vmem:[%s2666_s25 + $0x108] sm:$0xff]   ;;  %v2159_v61 = vld [vmem:[%s2666_s25 + $0x110] sm:$0xff]  }
  0x93   : > { %1926 = vmatprep.subr.bf16.mxu0 %v2128_v32  ;;  %v2156_v58 = vld [vmem:[%s2666_s25 + $0x1c8] sm:$0xff]   ;;  %v2160_v62 = vld [vmem:[%s2666_s25 + $0x1d0] sm:$0xff]   ;;  %v2163_v1 = vld [vmem:[%s2666_s25 + $0x118] sm:$0xff]  }
  0x94   : > { %1947 = vmatpush3.bf16.msra.mxu1 %v2127_v31  ;;  %v2157_v59 = vld [vmem:[%s2666_s25 + $0x188] sm:$0xff]   ;;  %v2161_v63 = vld [vmem:[%s2666_s25 + $0x190] sm:$0xff]   ;;  %v2164_v2 = vld [vmem:[%s2666_s25 + $0x1d8] sm:$0xff]  }
  0x95   : > { %1948 = vmatprep.subr.bf16.mxu1 %v2130_v34  ;;  %v2165_v3 = vld [vmem:[%s2666_s25 + $0x198] sm:$0xff]   ;;  %v2166_v4 = vld [vmem:[%s2666_s25 + $0x160] sm:$0xff]   ;;  %v2170_v8 = vld [vmem:[%s2666_s25 + $0x168] sm:$0xff]  }
  0x96   : > { %1927 = vmatpush3.bf16.msra.mxu0 %v2129_v33  ;;  %v2167_v5 = vld [vmem:[%s2666_s25 + $0x120] sm:$0xff]   ;;  %v2171_v9 = vld [vmem:[%s2666_s25 + $0x128] sm:$0xff]   ;;  %v2174_v12 = vld [vmem:[%s2666_s25 + $0x170] sm:$0xff]  }
  0x97   : > { %1928 = vmatprep.subr.bf16.mxu0 %v2132_v36  ;;  %v2168_v6 = vld [vmem:[%s2666_s25 + $0x1e0] sm:$0xff]   ;;  %v2172_v10 = vld [vmem:[%s2666_s25 + $0x1e8] sm:$0xff]   ;;  %v2175_v13 = vld [vmem:[%s2666_s25 + $0x130] sm:$0xff]  }
  0x98   : > { %1949 = vmatpush3.bf16.msra.mxu1 %v2131_v35  ;;  %v2169_v7 = vld [vmem:[%s2666_s25 + $0x1a0] sm:$0xff]   ;;  %v2173_v11 = vld [vmem:[%s2666_s25 + $0x1a8] sm:$0xff]   ;;  %v2176_v14 = vld [vmem:[%s2666_s25 + $0x1f0] sm:$0xff]  }
  0x99   : > { %1950 = vmatprep.subr.bf16.mxu1 %v2134_v38  ;;  %v2177_v15 = vld [vmem:[%s2666_s25 + $0x1b0] sm:$0xff]   ;;  %v2178_v16 = vld [vmem:[%s2666_s25 + $0x178] sm:$0xff]   ;;  %v2188_v25 = vld [vmem:[%s2666_s25 + $0x200] sm:$0xff]  }
  0x9a   : > { %1929 = vmatpush3.bf16.msra.mxu0 %v2133_v37  ;;  %v2179_v17 = vld [vmem:[%s2666_s25 + $0x138] sm:$0xff]   ;;  %v2181_v19 = vld [vmem:[%s2701_s5 + $0x10] ss:$36 sps:$4 sm:$0xff]   ;;  %v2189_v26 = vld [vmem:[%s2666_s25 + $0x208] sm:$0xff]  }
  0x9b   : > { %1930 = vmatprep.subr.bf16.mxu0 %v2136_v40  ;;  %v2180_v18 = vld [vmem:[%s2666_s25 + $0x1f8] sm:$0xff]   ;;  %v2190_v27 = vld [vmem:[%s2666_s25 + $0x210] sm:$0xff]   ;;  %v2192_v29 = vld [vmem:[%s2666_s25 + $0x220] sm:$0xff]  }
  0x9c   : > { %1951 = vmatpush3.bf16.msra.mxu1 %v2135_v39  ;;  %v2183_v20 = vld [vmem:[%s2701_s5 + $0x14] ss:$36 sps:$4 sm:$0xff]   ;;  %v2187_v24 = vld [vmem:[%s2701_s5 + $0x1c] ss:$36 sps:$4 sm:$0xff]   ;;  %v2193_v30 = vld [vmem:[%s2666_s25 + $0x228] sm:$0xff]  }
  0x9d   : > { %1952 = vmatprep.subr.bf16.mxu1 %v2138_v42  ;;  %v2184_v21 = vld [vmem:[%s2666_s25 + $0x1b8] sm:$0xff]   ;;  %v2194_v31 = vld [vmem:[%s2666_s25 + $0x230] sm:$0xff]   ;;  %v2196_v33 = vld [vmem:[%s2701_s5 + $0x20] ss:$36 sps:$4 sm:$0xff]  }
  0x9e   : > { %1931 = vmatpush3.bf16.msra.mxu0 %v2137_v41  ;;  %v2185_v23 = vld [vmem:[%s2701_s5 + $0x18] ss:$36 sps:$4 sm:$0xff]   ;;  %v1829_v35 = vld [vmem:[%s830_s9] ss:$0 sm:$0xff] }
  0x9f   : > { %1932 = vmatprep.subr.bf16.mxu0 %v2140_v44  ;;  %v2191_v28 = vld [vmem:[%s2666_s25 + $0x218] sm:$0xff]  }
  0xa0   : > { %1953 = vmatpush3.bf16.msra.mxu1 %v2139_v43  ;;  %v2195_v32 = vld [vmem:[%s2666_s25 + $0x238] sm:$0xff]   ;;  %s1690_s25 = sadd.s32 (%p2358_p9), %s2251_s16, %s1917_s24 }
  0xa1   : > { %1954 = vmatprep.subr.bf16.mxu1 %v2142_v46  ;;  %s1914_s12 = sshll.u32 (%p2358_p9), %s1690_s25, 3 }
  0xa2   : > { %1933 = vmatpush3.bf16.msra.mxu0 %v2141_v45  ;;  %s1692_s28 = scalar_lea.vmem (%p2358_p9), %s2798_s3, %s1914_s12 }
  0xa3   : > { %1962 = vmatprep.subr.bf16.mxu0 %v2147_v50 }
  0xa4   : > { %1955 = vmatpush3.bf16.msra.mxu1 %v2146_v49 }
  0xa5   : > { %1505 = vmatmul.mubr.bf16.vlgmr.msra.gmra.mrb[0].mxu0 %v2143_v47  ;;  %1984 = vmatprep.subr.bf16.mxu1 %v2152_v54 }
  0xa6   : > { %1963 = vmatpush3.bf16.msra.mxu0 %v2151_v53  ;;  %1586 = vmatprep.mubr.bf16.mxu0 %v2183_v20 }
  0xa7   : > { %1546 = vmatmul.mubr.bf16.vlgmr.msra.gmra.mrb[0].mxu1 %v2148_v51  ;;  %1964 = vmatprep.subr.bf16.mxu0 %v2154_v56 }
  0xa8   : > { %1985 = vmatpush3.bf16.msra.mxu1 %v2153_v55  ;;  %1627 = vmatprep.mubr.bf16.mxu1 %v2187_v24 }
  0xa9   : > { %1986 = vmatprep.subr.bf16.mxu1 %v2156_v58 }
  0xaa   : > { %1965 = vmatpush3.bf16.msra.mxu0 %v2155_v57 }
  0xab   : > { %1966 = vmatprep.subr.bf16.mxu0 %v2158_v60 }
  0xac   : > { %1987 = vmatpush3.bf16.msra.mxu1 %v2157_v59 }
  0xad   : > { %1988 = vmatprep.subr.bf16.mxu1 %v2160_v62 }
  0xae   : > { %1967 = vmatpush3.bf16.msra.mxu0 %v2159_v61 }
  0xaf   : > { %1968 = vmatprep.subr.bf16.mxu0 %v2162_v0 }
  0xb0   : > { %1989 = vmatpush3.bf16.msra.mxu1 %v2161_v63 }
  0xb1   : > { %1990 = vmatprep.subr.bf16.mxu1 %v2164_v2 }
  0xb2   : > { %1969 = vmatpush3.bf16.msra.mxu0 %v2163_v1 }
  0xb3   : > { %1970 = vmatprep.subr.bf16.mxu0 %v2166_v4 }
  0xb4   : > { %1991 = vmatpush3.bf16.msra.mxu1 %v2165_v3 }
  0xb5   : > { %1992 = vmatprep.subr.bf16.mxu1 %v2168_v6 }
  0xb6   : > { %1971 = vmatpush3.bf16.msra.mxu0 %v2167_v5 }
  0xb7   : > { %1972 = vmatprep.subr.bf16.mxu0 %v2170_v8 }
  0xb8   : > { %1993 = vmatpush3.bf16.msra.mxu1 %v2169_v7 }
  0xb9   : > { %1994 = vmatprep.subr.bf16.mxu1 %v2172_v10 }
  0xba   : > { %1973 = vmatpush3.bf16.msra.mxu0 %v2171_v9 }
  0xbb   : > { %1974 = vmatprep.subr.bf16.mxu0 %v2174_v12 }
  0xbc   : > { %1995 = vmatpush3.bf16.msra.mxu1 %v2173_v11 }
  0xbd   : > { %1996 = vmatprep.subr.bf16.mxu1 %v2176_v14 }
  0xbe   : > { %1975 = vmatpush3.bf16.msra.mxu0 %v2175_v13 }
  0xbf   : > { %1976 = vmatprep.subr.bf16.mxu0 %v2178_v16 }
  0xc0   : > { %1997 = vmatpush3.bf16.msra.mxu1 %v2177_v15 }
  0xc1   : > { %1998 = vmatprep.subr.bf16.mxu1 %v2180_v18 }
  0xc2   : > { %1977 = vmatpush3.bf16.msra.mxu0 %v2179_v17 }
  0xc3   : > { %2015 = vmatprep.subr.bf16.mxu0 %v2269_v22 }
  0xc4   : > { %1999 = vmatpush3.bf16.msra.mxu1 %v2184_v21 }
  0xc5   : > { %1587 = vmatmul.mubr.bf16.vlgmr.msra.gmra.mrb[4].mxu0 %v2181_v19 }
  0xc6   : > { %2031 = vmatprep.mubr.msk.bf16.mxu0 %vm2270_vm0, %v2269_v22  ;;  %2016 = vmatpush3.bf16.msra.mxu0 %v2188_v25 }
  0xc7   : > { %1628 = vmatmul.mubr.bf16.vlgmr.msra.gmra.mrb[4].mxu1 %v2185_v23  ;;  %2017 = vmatprep.subr.bf16.mxu0 %v2269_v22 }
  0xca   : > { %2018 = vmatpush3.bf16.msra.mxu0 %v2189_v26 }
  0xcb   : > { %2019 = vmatprep.subr.bf16.mxu0 %v2269_v22 }
  0xce   : > { %2020 = vmatpush3.bf16.msra.mxu0 %v2190_v27 }
  0xcf   : > { %2021 = vmatprep.subr.bf16.mxu0 %v2269_v22 }
  0xd2   : > { %2022 = vmatpush3.bf16.msra.mxu0 %v2191_v28 }
  0xd3   : > { %2023 = vmatprep.subr.bf16.mxu0 %v2269_v22 }
  0xd6   : > { %2024 = vmatpush3.bf16.msra.mxu0 %v2192_v29 }
  0xd7   : > { %2025 = vmatprep.subr.bf16.mxu0 %v2269_v22 }
  0xda   : > { %2026 = vmatpush3.bf16.msra.mxu0 %v2193_v30 }
  0xdb   : > { %2027 = vmatprep.subr.bf16.mxu0 %v2269_v22 }
  0xde   : > { %2028 = vmatpush3.bf16.msra.mxu0 %v2194_v31 }
  0xdf   : > { %2029 = vmatprep.subr.bf16.mxu0 %v2269_v22 }
  0xe2   : > { %2030 = vmatpush3.bf16.msra.mxu0 %v2195_v32 }
  0xe5   : > { %2032 = vmatmul.mubr.bf16.vlgmr.msra.gmra.mrb[8].mxu0 %v2196_v33 }
 0x178   : > { %v1934_v34 = vpop.f32.mrb[0].mxu0 }
 0x179   : > { %v1935_v36 = vpop.f32.mrb[1].mxu0 }
 0x17a   : > { %v1936_v37 = vadd.f32 %v1935_v36, %v1934_v34  ;;  %v1937_v38 = vpop.f32.mrb[2].mxu0  ;;  %v1956_v39 = vpop.f32.mrb[0].mxu1 }
 0x17b   : > { %v1938_v40 = vpop.f32.mrb[3].mxu0  ;;  %v1957_v43 = vpop.f32.mrb[1].mxu1 }
 0x17c   : > { %v1507_v41 = vadd.f32 %v1936_v37, %v1829_v35  ;;  %v1939_v42 = vadd.f32 %v1938_v40, %v1937_v38  ;;  %v1958_v44 = vadd.f32 %v1957_v43, %v1956_v39  ;;  %v1959_v45 = vpop.f32.mrb[2].mxu1 }
 0x17d   : > { %v1960_v47 = vpop.f32.mrb[3].mxu1 }
 0x17e   : > { %v1510_v46 = vadd.f32 %v1939_v42, %v1829_v35  ;;  %v1548_v48 = vadd.f32 %v1958_v44, %v1507_v41  ;;  %v1961_v49 = vadd.f32 %v1960_v47, %v1959_v45 }
 0x180   : > { %v1551_v50 = vadd.f32 %v1961_v49, %v1510_v46 }
 0x198   : > { %v1978_v51 = vpop.f32.mrb[4].mxu0 }
 0x199   : > { %v1979_v52 = vpop.f32.mrb[5].mxu0 }
 0x19a   : > { %v1980_v53 = vadd.f32 %v1979_v52, %v1978_v51  ;;  %v1981_v54 = vpop.f32.mrb[6].mxu0  ;;  %v2000_v55 = vpop.f32.mrb[4].mxu1 }
 0x19b   : > { %v1982_v56 = vpop.f32.mrb[7].mxu0  ;;  %v2001_v59 = vpop.f32.mrb[5].mxu1 }
 0x19c   : > { %v1589_v57 = vadd.f32 %v1980_v53, %v1548_v48  ;;  %v1983_v58 = vadd.f32 %v1982_v56, %v1981_v54  ;;  %v2002_v60 = vadd.f32 %v2001_v59, %v2000_v55  ;;  %v2003_v61 = vpop.f32.mrb[6].mxu1 }
 0x19d   : > { %v2004_v63 = vpop.f32.mrb[7].mxu1 }
 0x19e   : > { %v1592_v62 = vadd.f32 %v1983_v58, %v1551_v50  ;;  %v2005_v0 = vadd.f32 %v2004_v63, %v2003_v61  ;;  %v1630_v1 = vadd.f32 %v2002_v60, %v1589_v57 }
 0x1a0   : > { %v1633_v2 = vadd.f32 %v2005_v0, %v1592_v62 }
 0x1b8   : > { %v1670_v3 = vpop.f32.mrb[8].mxu0 }
 0x1b9   : > { %v1671_v4 = vadd.f32 %v1670_v3, %v1630_v1  ;;  %v2033_v5 = vpop.f32.mrb[9].mxu0  ;;  %1687 = sbr.rel (!%p2358_p9) target bundleno = 456 (0x1c8), region = 77 }
 0x1ba   : > { %v1673_v6 = vpop.f32.mrb[10].mxu0 }
 0x1bb   : > { %v1677_v7 = vmax.f32 %v1671_v4, 0.0  ;;  %v1674_v8 = vadd.f32 %v1673_v6, %v1633_v2  ;;  %v2034_v9 = vpop.f32.mrb[11].mxu0 }
 0x1bd   : > { %1679 = vst [vmem:[%s820_s21] sm:$0xff] %v1677_v7  ;;  %v1678_v10 = vmax.f32 %v1674_v8, 0.0 }
 0x1bf   : > { %1680 = vst [vmem:[%s820_s21 + $0x8] sm:$0xff] %v1678_v10 }
 0x1c4   : > { %v1722_v11 = vld [vmem:[%s820_s21] sm:$0xff] }
 0x1c5   : > { %1723 = vst [vmem:[%s1692_s28] sm:$0xff] %v1722_v11 }
 0x1c6   : > { %v1724_v12 = vld [vmem:[%s820_s21 + $0x8] sm:$0xff] }
 0x1c7   : > { %1725 = vst [vmem:[%s1692_s28 + $0x10] sm:$0xff] %v1724_v12 }
 0x1c8 PF: > { %s13_s20 = sadd.s32 1, %s2267_s20   ;;  %s2800_s12 = smov %s2239_s13 }
 0x1c9   : > { %p10_p2 = scmp.ge.s32.totalorder %s13_s20, 6   ;;  %s2801_s13 = smov %s2363_s4 }
 0x1ca   : > { %s2802_s14 = smov %s2247_s15  ;;  %s2803_s15 = smov %s2352_s27 }
 0x1cb   : > { %s2804_s16 = smov %s2259_s18  ;;  %s2805_s17 = smov %s2263_s19 }
 0x1cc   : > { %s2806_s18 = smov %s2809_s22  ;;  %s2807_s19 = smov %s2813_s23 }
 0x1cd   :  { %12 = sbr.rel (!%p10_p2) target bundleno = 5 (0x5), region = 152 }

// kernel: forward.12
= control target key start
LH: loop header
LB: loop body
LE: loop exit
PB: predicated region body
PF: predicated region fallthrough
CT: control target
= control target key end

     0   :  { %s1635_s15 = smov 0   ;;  %s1637_s16 = smov 0   ;;  %s1908_s0 = inlined_call_operand.vmem [shape: bf16[32,1152], index: 0, kind: input, shape index: {}]   ;;  %s1909_s1 = inlined_call_operand.vmem [shape: bf16[1152,128], index: 1, kind: input, shape index: {}]   ;;  %s1910_s2 = inlined_call_operand.vmem [shape: f32[1,128], index: 2, kind: input, shape index: {}]   ;;  %s1911_s3 = inlined_call_operand.vmem [shape: f32[32,128], index: 3, kind: input, shape index: {}]   ;;  %s1912_s4 = inlined_call_operand.vmem [shape: f32[32,128], index: 4, kind: output, shape index: {}]  }
   0x1   :  { %s1639_s17 = smov 0  }
   0x2 LB: > { %s26_s18 = sadd.s32 1, %s1602_s16  ;;  %p1264_p0 = scmp.ge.s32.totalorder %s1606_s17, 1  ;;  %s1606_s17 = sphi %s1639_s17, %s14_s17   ;;  %s1602_s16 = sphi %s1637_s16, %s1914_s16   ;;  %s1598_s15 = sphi %s1635_s15, %s1913_s15  }
   0x3   : > { %p28_p1 = scmp.ge.s32.totalorder %s26_s18, 2  ;;  %p211_p2 = scmp.lt.s32.totalorder %s1606_s17, 3 }
   0x5   : > { %s1916_s18 = smov (%p28_p1, %s26_s18), 0  ;;  %p212_p3 = pnand %p1264_p0, %p211_p2 }
   0x6   : > { %v1499_v0 = vld [vmem:[%s1909_s1 + $0x40] sm:$0xff] (!%p212_p3)   ;;  %v1503_v4 = vld [vmem:[%s1909_s1 + $0x48] sm:$0xff] (!%p212_p3)   ;;  %v1507_v8 = vld [vmem:[%s1909_s1 + $0x50] sm:$0xff] (!%p212_p3)   ;;  %s1265_s25 = sshll.u32 (!%p212_p3), %s1598_s15, 1  ;;  %vm1609_vm0 = vmmov (!%p212_p3), 0  }
   0x7   : > { %215 = sbr.rel (%p212_p3) target bundleno = 324 (0x144), region = 36  ;;  %v1500_v1 = vld [vmem:[%s1909_s1] sm:$0xff] (!%p212_p3)   ;;  %1355 = vmatprep.subr.bf16.mxu0 (!%p212_p3), %v1499_v0  ;;  %v1504_v5 = vld [vmem:[%s1909_s1 + $0x8] sm:$0xff] (!%p212_p3)   ;;  %v1508_v9 = vld [vmem:[%s1909_s1 + $0x10] sm:$0xff] (!%p212_p3)   ;;  %p257_p4 = scmp.lt.s32.totalorder (!%p212_p3), %s1265_s25, 3 }
   0x8   : > { %v1501_v2 = vld [vmem:[%s1909_s1 + $0xc0] sm:$0xff] (!%p212_p3)   ;;  %1356 = vmatpush3.bf16.msra.mxu0 (!%p212_p3), %v1500_v1  ;;  %v1505_v6 = vld [vmem:[%s1909_s1 + $0xc8] sm:$0xff] (!%p212_p3)   ;;  %v1509_v10 = vld [vmem:[%s1909_s1 + $0xd0] sm:$0xff] (!%p212_p3)  }
   0x9   : > { %v1502_v3 = vld [vmem:[%s1909_s1 + $0x80] sm:$0xff] (!%p212_p3)   ;;  %1377 = vmatprep.subr.bf16.mxu1 (!%p212_p3), %v1501_v2  ;;  %1357 = vmatprep.subr.bf16.mxu0 (!%p212_p3), %v1503_v4  ;;  %v1506_v7 = vld [vmem:[%s1909_s1 + $0x88] sm:$0xff] (!%p212_p3)   ;;  %v1510_v11 = vld [vmem:[%s1909_s1 + $0x90] sm:$0xff] (!%p212_p3)  }
   0xa   : > { %1378 = vmatpush3.bf16.msra.mxu1 (!%p212_p3), %v1502_v3  ;;  %v1511_v12 = vld [vmem:[%s1909_s1 + $0x58] sm:$0xff] (!%p212_p3)   ;;  %v1515_v16 = vld [vmem:[%s1909_s1 + $0x60] sm:$0xff] (!%p212_p3)   ;;  %v1519_v20 = vld [vmem:[%s1909_s1 + $0x68] sm:$0xff] (!%p212_p3)  }
   0xb   : > { %1379 = vmatprep.subr.bf16.mxu1 (!%p212_p3), %v1505_v6  ;;  %v1512_v13 = vld [vmem:[%s1909_s1 + $0x18] sm:$0xff] (!%p212_p3)   ;;  %v1516_v17 = vld [vmem:[%s1909_s1 + $0x20] sm:$0xff] (!%p212_p3)   ;;  %v1520_v21 = vld [vmem:[%s1909_s1 + $0x28] sm:$0xff] (!%p212_p3)   ;;  %v1608_v6 = vmov (!%p212_p3), 0.0  }
   0xc   : > { %1358 = vmatpush3.bf16.msra.mxu0 (!%p212_p3), %v1504_v5  ;;  %v1513_v14 = vld [vmem:[%s1909_s1 + $0xd8] sm:$0xff] (!%p212_p3)   ;;  %v1517_v18 = vld [vmem:[%s1909_s1 + $0xe0] sm:$0xff] (!%p212_p3)   ;;  %v1521_v22 = vld [vmem:[%s1909_s1 + $0xe8] sm:$0xff] (!%p212_p3)  }
   0xd   : > { %1359 = vmatprep.subr.bf16.mxu0 (!%p212_p3), %v1507_v8  ;;  %v1514_v15 = vld [vmem:[%s1909_s1 + $0x98] sm:$0xff] (!%p212_p3)   ;;  %v1518_v19 = vld [vmem:[%s1909_s1 + $0xa0] sm:$0xff] (!%p212_p3)   ;;  %v1522_v23 = vld [vmem:[%s1909_s1 + $0xa8] sm:$0xff] (!%p212_p3)  }
   0xe   : > { %1380 = vmatpush3.bf16.msra.mxu1 %v1506_v7  ;;  %s1918_s25 = smov (!%p257_p4, %s1265_s25), 3  ;;  %v1523_v24 = vld [vmem:[%s1909_s1 + $0x70] sm:$0xff]   ;;  %v1527_v28 = vld [vmem:[%s1909_s1 + $0x78] sm:$0xff]   ;;  %v1534_v34 = vld [vmem:[%s1909_s1 + $0x140] sm:$0xff]  }
   0xf   : > { %1381 = vmatprep.subr.bf16.mxu1 %v1509_v10  ;;  %s1472_s26 = smul.u32 36, %s1918_s25  ;;  %v1524_v25 = vld [vmem:[%s1909_s1 + $0x30] sm:$0xff]   ;;  %v1528_v29 = vld [vmem:[%s1909_s1 + $0x38] sm:$0xff]   ;;  %v1538_v37 = vld [vmem:[%s1909_s1 + $0x100] sm:$0xff]  }
  0x10   : > { %1360 = vmatpush3.bf16.msra.mxu0 %v1508_v9  ;;  %v1525_v26 = vld [vmem:[%s1909_s1 + $0xf0] sm:$0xff]   ;;  %v1529_v30 = vld [vmem:[%s1909_s1 + $0xf8] sm:$0xff]   ;;  %v1539_v38 = vld [vmem:[%s1909_s1 + $0x1c0] sm:$0xff]  }
  0x11   : > { %1361 = vmatprep.subr.bf16.mxu0 %v1511_v12  ;;  %v1526_v27 = vld [vmem:[%s1909_s1 + $0xb0] sm:$0xff]   ;;  %s1749_s10 = scalar_lea.vmem %s1908_s0, %s1472_s26  ;;  %v1533_v33 = vld [vmem:[%s1909_s1 + $0xb8] sm:$0xff]   ;;  %v1540_v39 = vld [vmem:[%s1909_s1 + $0x180] sm:$0xff]  }
  0x12   : > { %1382 = vmatpush3.bf16.msra.mxu1 %v1510_v11  ;;  %v1530_v31 = vld [vmem:[%s1749_s10] ss:$36 sps:$4 sm:$0xff]   ;;  %v1535_v35 = vld [vmem:[%s1749_s10 + $0x8] ss:$36 sps:$4 sm:$0xff]   ;;  %v1545_v44 = vld [vmem:[%s1909_s1 + $0x150] sm:$0xff]  }
  0x13   : > { %1383 = vmatprep.subr.bf16.mxu1 %v1513_v14  ;;  %v1532_v32 = vld [vmem:[%s1749_s10 + $0x4] ss:$36 sps:$4 sm:$0xff]   ;;  %v1537_v36 = vld [vmem:[%s1749_s10 + $0xc] ss:$36 sps:$4 sm:$0xff]   ;;  %v1549_v48 = vld [vmem:[%s1909_s1 + $0x158] sm:$0xff]  }
  0x14   : > { %1362 = vmatpush3.bf16.msra.mxu0 %v1512_v13  ;;  %960 = vmatprep.mubr.bf16.mxu0 %v1532_v32  ;;  %v1541_v40 = vld [vmem:[%s1909_s1 + $0x148] sm:$0xff]   ;;  %v1546_v45 = vld [vmem:[%s1909_s1 + $0x110] sm:$0xff]   ;;  %v1550_v49 = vld [vmem:[%s1909_s1 + $0x118] sm:$0xff]  }
  0x15   : > { %1363 = vmatprep.subr.bf16.mxu0 %v1515_v16  ;;  %1001 = vmatprep.mubr.bf16.mxu1 %v1537_v36  ;;  %v1542_v41 = vld [vmem:[%s1909_s1 + $0x108] sm:$0xff]   ;;  %v1547_v46 = vld [vmem:[%s1909_s1 + $0x1d0] sm:$0xff]   ;;  %v1551_v50 = vld [vmem:[%s1909_s1 + $0x1d8] sm:$0xff]  }
  0x16   : > { %1384 = vmatpush3.bf16.msra.mxu1 %v1514_v15  ;;  %v1543_v42 = vld [vmem:[%s1909_s1 + $0x1c8] sm:$0xff]   ;;  %v1548_v47 = vld [vmem:[%s1909_s1 + $0x190] sm:$0xff]   ;;  %v1552_v51 = vld [vmem:[%s1909_s1 + $0x198] sm:$0xff]  }
  0x17   : > { %1385 = vmatprep.subr.bf16.mxu1 %v1517_v18  ;;  %v1544_v43 = vld [vmem:[%s1909_s1 + $0x188] sm:$0xff]   ;;  %v1553_v52 = vld [vmem:[%s1909_s1 + $0x160] sm:$0xff]   ;;  %v1561_v60 = vld [vmem:[%s1909_s1 + $0x170] sm:$0xff]  }
  0x18   : > { %1364 = vmatpush3.bf16.msra.mxu0 %v1516_v17  ;;  %v1554_v53 = vld [vmem:[%s1909_s1 + $0x120] sm:$0xff]   ;;  %v1557_v56 = vld [vmem:[%s1909_s1 + $0x168] sm:$0xff]   ;;  %v1562_v61 = vld [vmem:[%s1909_s1 + $0x130] sm:$0xff]  }
  0x19   : > { %1365 = vmatprep.subr.bf16.mxu0 %v1519_v20  ;;  %v1555_v54 = vld [vmem:[%s1909_s1 + $0x1e0] sm:$0xff]   ;;  %v1558_v57 = vld [vmem:[%s1909_s1 + $0x128] sm:$0xff]   ;;  %v1563_v62 = vld [vmem:[%s1909_s1 + $0x1f0] sm:$0xff]  }
  0x1a   : > { %1386 = vmatpush3.bf16.msra.mxu1 %v1518_v19  ;;  %v1556_v55 = vld [vmem:[%s1909_s1 + $0x1a0] sm:$0xff]   ;;  %v1559_v58 = vld [vmem:[%s1909_s1 + $0x1e8] sm:$0xff]   ;;  %v1564_v63 = vld [vmem:[%s1909_s1 + $0x1b0] sm:$0xff]  }
  0x1b   : > { %1387 = vmatprep.subr.bf16.mxu1 %v1521_v22  ;;  %v1560_v59 = vld [vmem:[%s1909_s1 + $0x1a8] sm:$0xff]   ;;  %v1565_v0 = vld [vmem:[%s1909_s1 + $0x178] sm:$0xff]   ;;  %v1568_v3 = vld [vmem:[%s1749_s10 + $0x10] ss:$36 sps:$4 sm:$0xff]  }
  0x1c   : > { %1366 = vmatpush3.bf16.msra.mxu0 %v1520_v21  ;;  %v1566_v1 = vld [vmem:[%s1909_s1 + $0x138] sm:$0xff]   ;;  %v1575_v9 = vld [vmem:[%s1909_s1 + $0x200] sm:$0xff]   ;;  %v1576_v10 = vld [vmem:[%s1909_s1 + $0x208] sm:$0xff]  }
  0x1d   : > { %1367 = vmatprep.subr.bf16.mxu0 %v1523_v24  ;;  %v1567_v2 = vld [vmem:[%s1909_s1 + $0x1f8] sm:$0xff]   ;;  %v1577_v11 = vld [vmem:[%s1909_s1 + $0x210] sm:$0xff]   ;;  %v1579_v13 = vld [vmem:[%s1909_s1 + $0x220] sm:$0xff]  }
  0x1e   : > { %1388 = vmatpush3.bf16.msra.mxu1 %v1522_v23  ;;  %v1570_v4 = vld [vmem:[%s1749_s10 + $0x14] ss:$36 sps:$4 sm:$0xff]   ;;  %v1574_v8 = vld [vmem:[%s1749_s10 + $0x1c] ss:$36 sps:$4 sm:$0xff]   ;;  %v1580_v14 = vld [vmem:[%s1909_s1 + $0x228] sm:$0xff]  }
  0x1f   : > { %1389 = vmatprep.subr.bf16.mxu1 %v1525_v26  ;;  %v1571_v5 = vld [vmem:[%s1909_s1 + $0x1b8] sm:$0xff]   ;;  %v1581_v15 = vld [vmem:[%s1909_s1 + $0x230] sm:$0xff]   ;;  %v1583_v17 = vld [vmem:[%s1749_s10 + $0x20] ss:$36 sps:$4 sm:$0xff]  }
  0x20   : > { %1368 = vmatpush3.bf16.msra.mxu0 %v1524_v25  ;;  %v1572_v7 = vld [vmem:[%s1749_s10 + $0x18] ss:$36 sps:$4 sm:$0xff]   ;;  %v1271_v19 = vld [vmem:[%s1910_s2] ss:$0 sm:$0xff]  ;;  %s1268_s10 = sshll.u32 %s1918_s25, 3 }
  0x21   : > { %1369 = vmatprep.subr.bf16.mxu0 %v1527_v28  ;;  %v1578_v12 = vld [vmem:[%s1909_s1 + $0x218] sm:$0xff]   ;;  %s277_s21 = scalar_lea.vmem %s1911_s3, %s1268_s10  ;;  %s286_s24 = scalar_lea.vmem %s1912_s4, %s1268_s10 }
  0x22   : > { %1390 = vmatpush3.bf16.msra.mxu1 %v1526_v27  ;;  %v1582_v16 = vld [vmem:[%s1909_s1 + $0x238] sm:$0xff]  }
  0x23   : > { %1391 = vmatprep.subr.bf16.mxu1 %v1529_v30 }
  0x24   : > { %1370 = vmatpush3.bf16.msra.mxu0 %v1528_v29 }
  0x25   : > { %1399 = vmatprep.subr.bf16.mxu0 %v1534_v34 }
  0x26   : > { %1392 = vmatpush3.bf16.msra.mxu1 %v1533_v33 }
  0x27   : > { %961 = vmatmul.mubr.bf16.vlgmr.msra.gmra.mrb[0].mxu0 %v1530_v31  ;;  %1421 = vmatprep.subr.bf16.mxu1 %v1539_v38 }
  0x28   : > { %1400 = vmatpush3.bf16.msra.mxu0 %v1538_v37  ;;  %1042 = vmatprep.mubr.bf16.mxu0 %v1570_v4 }
  0x29   : > { %1002 = vmatmul.mubr.bf16.vlgmr.msra.gmra.mrb[0].mxu1 %v1535_v35  ;;  %1401 = vmatprep.subr.bf16.mxu0 %v1541_v40 }
  0x2a   : > { %1422 = vmatpush3.bf16.msra.mxu1 %v1540_v39  ;;  %1083 = vmatprep.mubr.bf16.mxu1 %v1574_v8 }
  0x2b   : > { %1423 = vmatprep.subr.bf16.mxu1 %v1543_v42 }
  0x2c   : > { %1402 = vmatpush3.bf16.msra.mxu0 %v1542_v41 }
  0x2d   : > { %1403 = vmatprep.subr.bf16.mxu0 %v1545_v44 }
  0x2e   : > { %1424 = vmatpush3.bf16.msra.mxu1 %v1544_v43 }
  0x2f   : > { %1425 = vmatprep.subr.bf16.mxu1 %v1547_v46 }
  0x30   : > { %1404 = vmatpush3.bf16.msra.mxu0 %v1546_v45 }
  0x31   : > { %1405 = vmatprep.subr.bf16.mxu0 %v1549_v48 }
  0x32   : > { %1426 = vmatpush3.bf16.msra.mxu1 %v1548_v47 }
  0x33   : > { %1427 = vmatprep.subr.bf16.mxu1 %v1551_v50 }
  0x34   : > { %1406 = vmatpush3.bf16.msra.mxu0 %v1550_v49 }
  0x35   : > { %1407 = vmatprep.subr.bf16.mxu0 %v1553_v52 }
  0x36   : > { %1428 = vmatpush3.bf16.msra.mxu1 %v1552_v51 }
  0x37   : > { %1429 = vmatprep.subr.bf16.mxu1 %v1555_v54  ;;  %v1135_v54 = vld [vmem:[%s277_s21] sm:$0xff] }
  0x38   : > { %1408 = vmatpush3.bf16.msra.mxu0 %v1554_v53 }
  0x39   : > { %1409 = vmatprep.subr.bf16.mxu0 %v1557_v56 }
  0x3a   : > { %1430 = vmatpush3.bf16.msra.mxu1 %v1556_v55 }
  0x3b   : > { %1431 = vmatprep.subr.bf16.mxu1 %v1559_v58 }
  0x3c   : > { %1410 = vmatpush3.bf16.msra.mxu0 %v1558_v57 }
  0x3d   : > { %1411 = vmatprep.subr.bf16.mxu0 %v1561_v60 }
  0x3e   : > { %1432 = vmatpush3.bf16.msra.mxu1 %v1560_v59  ;;  %v1136_v59 = vld [vmem:[%s277_s21 + $0x8] sm:$0xff] }
  0x3f   : > { %1433 = vmatprep.subr.bf16.mxu1 %v1563_v62 }
  0x40   : > { %1412 = vmatpush3.bf16.msra.mxu0 %v1562_v61 }
  0x41   : > { %1413 = vmatprep.subr.bf16.mxu0 %v1565_v0 }
  0x42   : > { %1434 = vmatpush3.bf16.msra.mxu1 %v1564_v63 }
  0x43   : > { %1435 = vmatprep.subr.bf16.mxu1 %v1567_v2 }
  0x44   : > { %1414 = vmatpush3.bf16.msra.mxu0 %v1566_v1 }
  0x45   : > { %1452 = vmatprep.subr.bf16.mxu0 %v1608_v6 }
  0x46   : > { %1436 = vmatpush3.bf16.msra.mxu1 %v1571_v5 }
  0x47   : > { %1043 = vmatmul.mubr.bf16.vlgmr.msra.gmra.mrb[4].mxu0 %v1568_v3 }
  0x48   : > { %1468 = vmatprep.mubr.msk.bf16.mxu0 %vm1609_vm0, %v1608_v6  ;;  %1453 = vmatpush3.bf16.msra.mxu0 %v1575_v9 }
  0x49   : > { %1084 = vmatmul.mubr.bf16.vlgmr.msra.gmra.mrb[4].mxu1 %v1572_v7  ;;  %1454 = vmatprep.subr.bf16.mxu0 %v1608_v6 }
  0x4c   : > { %1455 = vmatpush3.bf16.msra.mxu0 %v1576_v10 }
  0x4d   : > { %1456 = vmatprep.subr.bf16.mxu0 %v1608_v6 }
  0x50   : > { %1457 = vmatpush3.bf16.msra.mxu0 %v1577_v11 }
  0x51   : > { %1458 = vmatprep.subr.bf16.mxu0 %v1608_v6 }
  0x54   : > { %1459 = vmatpush3.bf16.msra.mxu0 %v1578_v12 }
  0x55   : > { %1460 = vmatprep.subr.bf16.mxu0 %v1608_v6 }
  0x58   : > { %1461 = vmatpush3.bf16.msra.mxu0 %v1579_v13 }
  0x59   : > { %1462 = vmatprep.subr.bf16.mxu0 %v1608_v6 }
  0x5c   : > { %1463 = vmatpush3.bf16.msra.mxu0 %v1580_v14 }
  0x5d   : > { %1464 = vmatprep.subr.bf16.mxu0 %v1608_v6 }
  0x60   : > { %1465 = vmatpush3.bf16.msra.mxu0 %v1581_v15 }
  0x61   : > { %1466 = vmatprep.subr.bf16.mxu0 %v1608_v6 }
  0x64   : > { %1467 = vmatpush3.bf16.msra.mxu0 %v1582_v16 }
  0x67   : > { %1469 = vmatmul.mubr.bf16.vlgmr.msra.gmra.mrb[8].mxu0 %v1583_v17 }
  0xfa   : > { %v1371_v18 = vpop.f32.mrb[0].mxu0 }
  0xfb   : > { %v1372_v20 = vpop.f32.mrb[1].mxu0 }
  0xfc   : > { %v1373_v21 = vadd.f32 %v1372_v20, %v1371_v18  ;;  %v1374_v22 = vpop.f32.mrb[2].mxu0  ;;  %v1393_v23 = vpop.f32.mrb[0].mxu1 }
  0xfd   : > { %v1375_v24 = vpop.f32.mrb[3].mxu0  ;;  %v1394_v27 = vpop.f32.mrb[1].mxu1 }
  0xfe   : > { %v963_v25 = vadd.f32 %v1373_v21, %v1271_v19  ;;  %v1376_v26 = vadd.f32 %v1375_v24, %v1374_v22  ;;  %v1395_v28 = vadd.f32 %v1394_v27, %v1393_v23  ;;  %v1396_v29 = vpop.f32.mrb[2].mxu1 }
  0xff   : > { %v1397_v31 = vpop.f32.mrb[3].mxu1 }
 0x100   : > { %v966_v30 = vadd.f32 %v1376_v26, %v1271_v19  ;;  %v1004_v32 = vadd.f32 %v1395_v28, %v963_v25  ;;  %v1398_v33 = vadd.f32 %v1397_v31, %v1396_v29 }
 0x102   : > { %v1007_v34 = vadd.f32 %v1398_v33, %v966_v30 }
 0x11a   : > { %v1415_v35 = vpop.f32.mrb[4].mxu0 }
 0x11b   : > { %v1416_v36 = vpop.f32.mrb[5].mxu0 }
 0x11c   : > { %v1417_v37 = vadd.f32 %v1416_v36, %v1415_v35  ;;  %v1418_v38 = vpop.f32.mrb[6].mxu0  ;;  %v1437_v39 = vpop.f32.mrb[4].mxu1 }
 0x11d   : > { %v1419_v40 = vpop.f32.mrb[7].mxu0  ;;  %v1438_v43 = vpop.f32.mrb[5].mxu1 }
 0x11e   : > { %v1045_v41 = vadd.f32 %v1417_v37, %v1004_v32  ;;  %v1420_v42 = vadd.f32 %v1419_v40, %v1418_v38  ;;  %v1439_v44 = vadd.f32 %v1438_v43, %v1437_v39  ;;  %v1440_v45 = vpop.f32.mrb[6].mxu1 }
 0x11f   : > { %v1441_v47 = vpop.f32.mrb[7].mxu1 }
 0x120   : > { %v1048_v46 = vadd.f32 %v1420_v42, %v1007_v34  ;;  %v1442_v48 = vadd.f32 %v1441_v47, %v1440_v45  ;;  %v1086_v49 = vadd.f32 %v1439_v44, %v1045_v41 }
 0x122   : > { %v1089_v50 = vadd.f32 %v1442_v48, %v1048_v46 }
 0x13a   : > { %v1126_v51 = vpop.f32.mrb[8].mxu0 }
 0x13b   : > { %v1127_v52 = vadd.f32 %v1126_v51, %v1086_v49  ;;  %v1470_v53 = vpop.f32.mrb[9].mxu0 }
 0x13c   : > { %v1129_v55 = vpop.f32.mrb[10].mxu0 }
 0x13d   : > { %v1133_v56 = vmax.f32 %v1127_v52, 0.0  ;;  %v1130_v57 = vadd.f32 %v1129_v55, %v1089_v50  ;;  %v1471_v58 = vpop.f32.mrb[11].mxu0 }
 0x13f   : > { %v1137_v60 = vadd.f32 %v1135_v54, %v1133_v56  ;;  %v1134_v61 = vmax.f32 %v1130_v57, 0.0 }
 0x141   : > { %1139 = vst [vmem:[%s286_s24] sm:$0xff] %v1137_v60  ;;  %v1138_v62 = vadd.f32 %v1136_v59, %v1134_v61 }
 0x143   : > { %1140 = vst [vmem:[%s286_s24 + $0x8] sm:$0xff] %v1138_v62 }
 0x144 PF: > { %s14_s17 = sadd.s32 1, %s1606_s17   ;;  %s1913_s15 = smov %s1602_s16 }
 0x145   : > { %p11_p5 = scmp.ge.s32.totalorder %s14_s17, 4   ;;  %s1914_s16 = smov %s1916_s18 }
 0x147   :  { %13 = sbr.rel (!%p11_p5) target bundleno = 2 (0x2), region = 75 }

// kernel: forward.14
= control target key start
LH: loop header
LB: loop body
LE: loop exit
PB: predicated region body
PF: predicated region fallthrough
CT: control target
= control target key end

     0   :  { %vm1129_vm0 = vmmov 0   ;;  %s1395_s1 = inlined_call_operand.vmem [shape: bf16[1152,128], index: 1, kind: input, shape index: {}]   ;;  %s1396_s0 = inlined_call_operand.vmem [shape: bf16[8,1152], index: 0, kind: input, shape index: {}]   ;;  %s1397_s2 = inlined_call_operand.vmem [shape: f32[1,128], index: 2, kind: input, shape index: {}]   ;;  %s1398_s3 = inlined_call_operand.vmem [shape: f32[8,128], index: 3, kind: input, shape index: {}]   ;;  %s1399_s4 = inlined_call_operand.vmem [shape: f32[8,128], index: 4, kind: output, shape index: {}]  }
   0x1   :  { %v1047_v0 = vld [vmem:[%s1395_s1 + $0x40] sm:$0xff]   ;;  %v1051_v4 = vld [vmem:[%s1395_s1 + $0x48] sm:$0xff]   ;;  %v1055_v8 = vld [vmem:[%s1395_s1 + $0x50] sm:$0xff]  }
   0x2   :  { %v1048_v1 = vld [vmem:[%s1395_s1] sm:$0xff]   ;;  %928 = vmatprep.subr.bf16.mxu0 %v1047_v0  ;;  %v1052_v5 = vld [vmem:[%s1395_s1 + $0x8] sm:$0xff]   ;;  %v1056_v9 = vld [vmem:[%s1395_s1 + $0x10] sm:$0xff]  }
   0x3   :  { %v1049_v2 = vld [vmem:[%s1395_s1 + $0xc0] sm:$0xff]   ;;  %929 = vmatpush3.bf16.msra.mxu0 %v1048_v1  ;;  %v1053_v6 = vld [vmem:[%s1395_s1 + $0xc8] sm:$0xff]   ;;  %v1057_v10 = vld [vmem:[%s1395_s1 + $0xd0] sm:$0xff]  }
   0x4   :  { %v1050_v3 = vld [vmem:[%s1395_s1 + $0x80] sm:$0xff]   ;;  %950 = vmatprep.subr.bf16.mxu1 %v1049_v2  ;;  %930 = vmatprep.subr.bf16.mxu0 %v1051_v4  ;;  %v1054_v7 = vld [vmem:[%s1395_s1 + $0x88] sm:$0xff]   ;;  %v1058_v11 = vld [vmem:[%s1395_s1 + $0x90] sm:$0xff]  }
   0x5   :  { %951 = vmatpush3.bf16.msra.mxu1 %v1050_v3  ;;  %v1059_v12 = vld [vmem:[%s1395_s1 + $0x58] sm:$0xff]   ;;  %v1063_v16 = vld [vmem:[%s1395_s1 + $0x60] sm:$0xff]   ;;  %v1067_v20 = vld [vmem:[%s1395_s1 + $0x68] sm:$0xff]  }
   0x6   :  { %952 = vmatprep.subr.bf16.mxu1 %v1053_v6  ;;  %v1060_v13 = vld [vmem:[%s1395_s1 + $0x18] sm:$0xff]   ;;  %v1064_v17 = vld [vmem:[%s1395_s1 + $0x20] sm:$0xff]   ;;  %v1068_v21 = vld [vmem:[%s1395_s1 + $0x28] sm:$0xff]  }
   0x7   :  { %931 = vmatpush3.bf16.msra.mxu0 %v1052_v5  ;;  %v1061_v14 = vld [vmem:[%s1395_s1 + $0xd8] sm:$0xff]   ;;  %v1065_v18 = vld [vmem:[%s1395_s1 + $0xe0] sm:$0xff]   ;;  %v1069_v22 = vld [vmem:[%s1395_s1 + $0xe8] sm:$0xff]  }
   0x8   :  { %932 = vmatprep.subr.bf16.mxu0 %v1055_v8  ;;  %v1062_v15 = vld [vmem:[%s1395_s1 + $0x98] sm:$0xff]   ;;  %v1066_v19 = vld [vmem:[%s1395_s1 + $0xa0] sm:$0xff]   ;;  %v1070_v23 = vld [vmem:[%s1395_s1 + $0xa8] sm:$0xff]  }
   0x9   :  { %953 = vmatpush3.bf16.msra.mxu1 %v1054_v7  ;;  %v1071_v24 = vld [vmem:[%s1395_s1 + $0x70] sm:$0xff]   ;;  %v1075_v28 = vld [vmem:[%s1395_s1 + $0x78] sm:$0xff]   ;;  %v18_v31 = vld [vmem:[%s1396_s0] sm:$0xff] }
   0xa   :  { %954 = vmatprep.subr.bf16.mxu1 %v1057_v10  ;;  %v1072_v25 = vld [vmem:[%s1395_s1 + $0x30] sm:$0xff]   ;;  %v1076_v29 = vld [vmem:[%s1395_s1 + $0x38] sm:$0xff]   ;;  %v847_v32 = vcombine.low %v18_v31, %v18_v31  ;;  %v848_v33 = vcombine.high %v18_v31, %v18_v31  ;;  %v1081_v35 = vld [vmem:[%s1395_s1 + $0x140] sm:$0xff]  }
   0xb   :  { %933 = vmatpush3.bf16.msra.mxu0 %v1056_v9  ;;  %v1073_v26 = vld [vmem:[%s1395_s1 + $0xf0] sm:$0xff]   ;;  %v1077_v30 = vld [vmem:[%s1395_s1 + $0xf8] sm:$0xff]   ;;  %v19_v36 = vld [vmem:[%s1396_s0 + $0x8] sm:$0xff]  ;;  %v1128_v9 = vmov 0.0  }
   0xc   :  { %934 = vmatprep.subr.bf16.mxu0 %v1059_v12  ;;  %v1074_v27 = vld [vmem:[%s1395_s1 + $0xb0] sm:$0xff]   ;;  %v1080_v34 = vld [vmem:[%s1395_s1 + $0xb8] sm:$0xff]   ;;  %670 = vmatprep.mubr.bf16.mxu0 %v848_v33  ;;  %v849_v37 = vcombine.low %v19_v36, %v19_v36  ;;  %v850_v38 = vcombine.high %v19_v36, %v19_v36  ;;  %v1084_v39 = vld [vmem:[%s1395_s1 + $0x100] sm:$0xff]  }
   0xd   :  { %955 = vmatpush3.bf16.msra.mxu1 %v1058_v11  ;;  %v1085_v40 = vld [vmem:[%s1395_s1 + $0x1c0] sm:$0xff]   ;;  %v1087_v42 = vld [vmem:[%s1395_s1 + $0x148] sm:$0xff]   ;;  %v1091_v46 = vld [vmem:[%s1395_s1 + $0x150] sm:$0xff]  }
   0xe   :  { %956 = vmatprep.subr.bf16.mxu1 %v1061_v14  ;;  %710 = vmatprep.mubr.bf16.mxu1 %v850_v38  ;;  %v1086_v41 = vld [vmem:[%s1395_s1 + $0x180] sm:$0xff]   ;;  %v1088_v43 = vld [vmem:[%s1395_s1 + $0x108] sm:$0xff]   ;;  %v1092_v47 = vld [vmem:[%s1395_s1 + $0x110] sm:$0xff]  }
   0xf   :  { %935 = vmatpush3.bf16.msra.mxu0 %v1060_v13  ;;  %v1089_v44 = vld [vmem:[%s1395_s1 + $0x1c8] sm:$0xff]   ;;  %v1093_v48 = vld [vmem:[%s1395_s1 + $0x1d0] sm:$0xff]   ;;  %v1095_v50 = vld [vmem:[%s1395_s1 + $0x158] sm:$0xff]  }
  0x10   :  { %936 = vmatprep.subr.bf16.mxu0 %v1063_v16  ;;  %v1090_v45 = vld [vmem:[%s1395_s1 + $0x188] sm:$0xff]   ;;  %v1094_v49 = vld [vmem:[%s1395_s1 + $0x190] sm:$0xff]   ;;  %v1096_v51 = vld [vmem:[%s1395_s1 + $0x118] sm:$0xff]  }
  0x11   :  { %957 = vmatpush3.bf16.msra.mxu1 %v1062_v15  ;;  %v1097_v52 = vld [vmem:[%s1395_s1 + $0x1d8] sm:$0xff]   ;;  %v1099_v54 = vld [vmem:[%s1395_s1 + $0x160] sm:$0xff]   ;;  %v1103_v58 = vld [vmem:[%s1395_s1 + $0x168] sm:$0xff]  }
  0x12   :  { %958 = vmatprep.subr.bf16.mxu1 %v1065_v18  ;;  %v1098_v53 = vld [vmem:[%s1395_s1 + $0x198] sm:$0xff]   ;;  %v1100_v55 = vld [vmem:[%s1395_s1 + $0x120] sm:$0xff]   ;;  %v1104_v59 = vld [vmem:[%s1395_s1 + $0x128] sm:$0xff]  }
  0x13   :  { %937 = vmatpush3.bf16.msra.mxu0 %v1064_v17  ;;  %v1101_v56 = vld [vmem:[%s1395_s1 + $0x1e0] sm:$0xff]   ;;  %v1105_v60 = vld [vmem:[%s1395_s1 + $0x1e8] sm:$0xff]   ;;  %v1107_v62 = vld [vmem:[%s1395_s1 + $0x170] sm:$0xff]  }
  0x14   :  { %938 = vmatprep.subr.bf16.mxu0 %v1067_v20  ;;  %v1102_v57 = vld [vmem:[%s1395_s1 + $0x1a0] sm:$0xff]   ;;  %v1106_v61 = vld [vmem:[%s1395_s1 + $0x1a8] sm:$0xff]   ;;  %v1108_v63 = vld [vmem:[%s1395_s1 + $0x130] sm:$0xff]  }
  0x15   :  { %959 = vmatpush3.bf16.msra.mxu1 %v1066_v19  ;;  %v1109_v0 = vld [vmem:[%s1395_s1 + $0x1f0] sm:$0xff]   ;;  %v1111_v2 = vld [vmem:[%s1395_s1 + $0x178] sm:$0xff]   ;;  %v1119_v13 = vld [vmem:[%s1395_s1 + $0x200] sm:$0xff]  }
  0x16   :  { %960 = vmatprep.subr.bf16.mxu1 %v1069_v22  ;;  %v1110_v1 = vld [vmem:[%s1395_s1 + $0x1b0] sm:$0xff]   ;;  %v1112_v3 = vld [vmem:[%s1395_s1 + $0x138] sm:$0xff]   ;;  %v1120_v14 = vld [vmem:[%s1395_s1 + $0x208] sm:$0xff]  }
  0x17   :  { %939 = vmatpush3.bf16.msra.mxu0 %v1068_v21  ;;  %v1113_v4 = vld [vmem:[%s1395_s1 + $0x1f8] sm:$0xff]   ;;  %v20_v5 = vld [vmem:[%s1396_s0 + $0x10] sm:$0xff]  ;;  %v1123_v17 = vld [vmem:[%s1395_s1 + $0x220] sm:$0xff]  }
  0x18   :  { %940 = vmatprep.subr.bf16.mxu0 %v1071_v24  ;;  %v851_v6 = vcombine.low %v20_v5, %v20_v5  ;;  %v852_v7 = vcombine.high %v20_v5, %v20_v5  ;;  %v1116_v8 = vld [vmem:[%s1395_s1 + $0x1b8] sm:$0xff]   ;;  %v1121_v15 = vld [vmem:[%s1395_s1 + $0x210] sm:$0xff]   ;;  %v1124_v18 = vld [vmem:[%s1395_s1 + $0x228] sm:$0xff]  }
  0x19   :  { %961 = vmatpush3.bf16.msra.mxu1 %v1070_v23  ;;  %v21_v10 = vld [vmem:[%s1396_s0 + $0x18] sm:$0xff]  ;;  %v1125_v19 = vld [vmem:[%s1395_s1 + $0x230] sm:$0xff]   ;;  %v1127_v21 = vld [vmem:[%s1396_s0 + $0x20] ss:$0 sps:$4 sm:$0xff]  }
  0x1a   :  { %962 = vmatprep.subr.bf16.mxu1 %v1073_v26  ;;  %v853_v11 = vcombine.low %v21_v10, %v21_v10  ;;  %v854_v12 = vcombine.high %v21_v10, %v21_v10  ;;  %v1122_v16 = vld [vmem:[%s1395_s1 + $0x218] sm:$0xff]   ;;  %v846_v23 = vld [vmem:[%s1397_s2] ss:$0 sm:$0xff] }
  0x1b   :  { %941 = vmatpush3.bf16.msra.mxu0 %v1072_v25  ;;  %v1126_v20 = vld [vmem:[%s1395_s1 + $0x238] sm:$0xff]  }
  0x1c   :  { %942 = vmatprep.subr.bf16.mxu0 %v1075_v28 }
  0x1d   :  { %963 = vmatpush3.bf16.msra.mxu1 %v1074_v27 }
  0x1e   :  { %964 = vmatprep.subr.bf16.mxu1 %v1077_v30 }
  0x1f   :  { %943 = vmatpush3.bf16.msra.mxu0 %v1076_v29 }
  0x20   :  { %972 = vmatprep.subr.bf16.mxu0 %v1081_v35 }
  0x21   :  { %965 = vmatpush3.bf16.msra.mxu1 %v1080_v34 }
  0x22   :  { %671 = vmatmul.mubr.bf16.vlgmr.msra.gmra.mrb[0].mxu0 %v847_v32  ;;  %994 = vmatprep.subr.bf16.mxu1 %v1085_v40 }
  0x23   :  { %973 = vmatpush3.bf16.msra.mxu0 %v1084_v39  ;;  %750 = vmatprep.mubr.bf16.mxu0 %v852_v7 }
  0x24   :  { %711 = vmatmul.mubr.bf16.vlgmr.msra.gmra.mrb[0].mxu1 %v849_v37  ;;  %974 = vmatprep.subr.bf16.mxu0 %v1087_v42 }
  0x25   :  { %995 = vmatpush3.bf16.msra.mxu1 %v1086_v41  ;;  %790 = vmatprep.mubr.bf16.mxu1 %v854_v12 }
  0x26   :  { %996 = vmatprep.subr.bf16.mxu1 %v1089_v44 }
  0x27   :  { %975 = vmatpush3.bf16.msra.mxu0 %v1088_v43 }
  0x28   :  { %976 = vmatprep.subr.bf16.mxu0 %v1091_v46 }
  0x29   :  { %997 = vmatpush3.bf16.msra.mxu1 %v1090_v45 }
  0x2a   :  { %998 = vmatprep.subr.bf16.mxu1 %v1093_v48 }
  0x2b   :  { %977 = vmatpush3.bf16.msra.mxu0 %v1092_v47 }
  0x2c   :  { %978 = vmatprep.subr.bf16.mxu0 %v1095_v50  ;;  %v839_v50 = vld [vmem:[%s1398_s3] sm:$0xff] }
  0x2d   :  { %999 = vmatpush3.bf16.msra.mxu1 %v1094_v49 }
  0x2e   :  { %1000 = vmatprep.subr.bf16.mxu1 %v1097_v52 }
  0x2f   :  { %979 = vmatpush3.bf16.msra.mxu0 %v1096_v51 }
  0x30   :  { %980 = vmatprep.subr.bf16.mxu0 %v1099_v54 }
  0x31   :  { %1001 = vmatpush3.bf16.msra.mxu1 %v1098_v53 }
  0x32   :  { %1002 = vmatprep.subr.bf16.mxu1 %v1101_v56 }
  0x33   :  { %981 = vmatpush3.bf16.msra.mxu0 %v1100_v55 }
  0x34   :  { %982 = vmatprep.subr.bf16.mxu0 %v1103_v58 }
  0x35   :  { %1003 = vmatpush3.bf16.msra.mxu1 %v1102_v57 }
  0x36   :  { %1004 = vmatprep.subr.bf16.mxu1 %v1105_v60 }
  0x37   :  { %983 = vmatpush3.bf16.msra.mxu0 %v1104_v59 }
  0x38   :  { %984 = vmatprep.subr.bf16.mxu0 %v1107_v62 }
  0x39   :  { %1005 = vmatpush3.bf16.msra.mxu1 %v1106_v61 }
  0x3a   :  { %1006 = vmatprep.subr.bf16.mxu1 %v1109_v0 }
  0x3b   :  { %985 = vmatpush3.bf16.msra.mxu0 %v1108_v63 }
  0x3c   :  { %986 = vmatprep.subr.bf16.mxu0 %v1111_v2 }
  0x3d   :  { %1007 = vmatpush3.bf16.msra.mxu1 %v1110_v1 }
  0x3e   :  { %1008 = vmatprep.subr.bf16.mxu1 %v1113_v4 }
  0x3f   :  { %987 = vmatpush3.bf16.msra.mxu0 %v1112_v3 }
  0x40   :  { %1025 = vmatprep.subr.bf16.mxu0 %v1128_v9 }
  0x41   :  { %1009 = vmatpush3.bf16.msra.mxu1 %v1116_v8 }
  0x42   :  { %751 = vmatmul.mubr.bf16.vlgmr.msra.gmra.mrb[4].mxu0 %v851_v6 }
  0x43   :  { %1026 = vmatpush3.bf16.msra.mxu0 %v1119_v13  ;;  %1041 = vmatprep.mubr.msk.bf16.mxu0 %vm1129_vm0, %v1128_v9 }
  0x44   :  { %791 = vmatmul.mubr.bf16.vlgmr.msra.gmra.mrb[4].mxu1 %v853_v11  ;;  %1027 = vmatprep.subr.bf16.mxu0 %v1128_v9 }
  0x47   :  { %1028 = vmatpush3.bf16.msra.mxu0 %v1120_v14 }
  0x48   :  { %1029 = vmatprep.subr.bf16.mxu0 %v1128_v9 }
  0x4b   :  { %1030 = vmatpush3.bf16.msra.mxu0 %v1121_v15 }
  0x4c   :  { %1031 = vmatprep.subr.bf16.mxu0 %v1128_v9 }
  0x4f   :  { %1032 = vmatpush3.bf16.msra.mxu0 %v1122_v16 }
  0x50   :  { %1033 = vmatprep.subr.bf16.mxu0 %v1128_v9 }
  0x53   :  { %1034 = vmatpush3.bf16.msra.mxu0 %v1123_v17 }
  0x54   :  { %1035 = vmatprep.subr.bf16.mxu0 %v1128_v9 }
  0x57   :  { %1036 = vmatpush3.bf16.msra.mxu0 %v1124_v18 }
  0x58   :  { %1037 = vmatprep.subr.bf16.mxu0 %v1128_v9 }
  0x5b   :  { %1038 = vmatpush3.bf16.msra.mxu0 %v1125_v19 }
  0x5c   :  { %1039 = vmatprep.subr.bf16.mxu0 %v1128_v9 }
  0x5f   :  { %1040 = vmatpush3.bf16.msra.mxu0 %v1126_v20 }
  0x62   :  { %1042 = vmatmul.mubr.bf16.vlgmr.msra.gmra.mrb[8].mxu0 %v1127_v21 }
  0xf5   :  { %v944_v22 = vpop.f32.mrb[0].mxu0 }
  0xf6   :  { %v945_v24 = vpop.f32.mrb[1].mxu0 }
  0xf7   :  { %v946_v25 = vadd.f32 %v945_v24, %v944_v22  ;;  %v947_v26 = vpop.f32.mrb[2].mxu0  ;;  %v966_v27 = vpop.f32.mrb[0].mxu1 }
  0xf8   :  { %v948_v28 = vpop.f32.mrb[3].mxu0  ;;  %v967_v29 = vpop.f32.mrb[1].mxu1 }
  0xf9   :  { %v673_v30 = vadd.f32 %v946_v25, %v846_v23  ;;  %v968_v31 = vadd.f32 %v967_v29, %v966_v27  ;;  %v969_v32 = vpop.f32.mrb[2].mxu1 }
  0xfa   :  { %v970_v33 = vpop.f32.mrb[3].mxu1 }
  0xfb   :  { %v713_v34 = vadd.f32 %v968_v31, %v673_v30 }
 0x115   :  { %v988_v35 = vpop.f32.mrb[4].mxu0 }
 0x116   :  { %v989_v36 = vpop.f32.mrb[5].mxu0 }
 0x117   :  { %v990_v37 = vadd.f32 %v989_v36, %v988_v35  ;;  %v991_v38 = vpop.f32.mrb[6].mxu0  ;;  %v1010_v39 = vpop.f32.mrb[4].mxu1 }
 0x118   :  { %v992_v40 = vpop.f32.mrb[7].mxu0  ;;  %v1011_v41 = vpop.f32.mrb[5].mxu1 }
 0x119   :  { %v753_v42 = vadd.f32 %v990_v37, %v713_v34  ;;  %v1012_v43 = vadd.f32 %v1011_v41, %v1010_v39  ;;  %v1013_v44 = vpop.f32.mrb[6].mxu1 }
 0x11a   :  { %v1014_v45 = vpop.f32.mrb[7].mxu1 }
 0x11b   :  { %v793_v46 = vadd.f32 %v1012_v43, %v753_v42 }
 0x135   :  { %v832_v47 = vpop.f32.mrb[8].mxu0 }
 0x136   :  { %v833_v48 = vadd.f32 %v832_v47, %v793_v46  ;;  %v1043_v49 = vpop.f32.mrb[9].mxu0 }
 0x137   :  { %v835_v51 = vpop.f32.mrb[10].mxu0 }
 0x138   :  { %v838_v52 = vmax.f32 %v833_v48, 0.0  ;;  %v1044_v53 = vpop.f32.mrb[11].mxu0 }
 0x13a   :  { %v840_v54 = vadd.f32 %v839_v50, %v838_v52 }
 0x13c   :  { %841 = vst [vmem:[%s1399_s4] sm:$0xff] %v840_v54 }

// kernel: forward.15
= control target key start
LH: loop header
LB: loop body
LE: loop exit
PB: predicated region body
PF: predicated region fallthrough
CT: control target
= control target key end

     0   :  { %v822_v2 = vmov 0   ;;  %s1080_s0 = inlined_call_operand.vmem [shape: bf16[2,128], index: 0, kind: input, shape index: {}]   ;;  %s1081_s1 = inlined_call_operand.vmem [shape: bf16[128,256], index: 1, kind: input, shape index: {}]   ;;  %s1082_s2 = inlined_call_operand.vmem [shape: f32[1,256], index: 2, kind: input, shape index: {}]   ;;  %s1083_s3 = inlined_call_operand.vmem [shape: bf16[256,256], index: 3, kind: input, shape index: {}]   ;;  %s1084_s4 = inlined_call_operand.vmem [shape: f32[1,256], index: 4, kind: input, shape index: {}]   ;;  %s1085_s5 = inlined_call_operand.vmem [shape: bf16[256,128], index: 5, kind: input, shape index: {}]   ;;  %s1086_s6 = inlined_call_operand.vmem [shape: f32[1,128], index: 6, kind: input, shape index: {}]   ;;  %s1087_s7 = inlined_call_operand.hbm [shape: f32[2,128], index: 7, kind: output, shape index: {}]  }
   0x1   :  { %v710_v0 = vld [vmem:[%s1081_s1 + $0x4] ss:$8 sps:$4 sm:$0xff]   ;;  %v712_v1 = vld [vmem:[%s1081_s1] ss:$8 sps:$4 sm:$0xff]   ;;  %169 = vmatprep.mubr.bf16.mxu0 %v822_v2  ;;  %v713_v3 = vld [vmem:[%s1081_s1 + $0x14] ss:$8 sps:$4 sm:$0xff]  }
   0x2   :  { %137 = vmatprep.subr.bf16.mxu0 %v710_v0  ;;  %v715_v4 = vld [vmem:[%s1081_s1 + $0x10] ss:$8 sps:$4 sm:$0xff]   ;;  %v716_v5 = vld [vmem:[%s1081_s1 + $0x24] ss:$8 sps:$4 sm:$0xff]   ;;  %v718_v6 = vld [vmem:[%s1081_s1 + $0x20] ss:$8 sps:$4 sm:$0xff]  }
   0x3   :  { %138 = vmatpush1.bf16.msra.mxu0 %v712_v1  ;;  %v719_v7 = vld [vmem:[%s1081_s1 + $0x34] ss:$8 sps:$4 sm:$0xff]   ;;  %v721_v8 = vld [vmem:[%s1081_s1 + $0x30] ss:$8 sps:$4 sm:$0xff]   ;;  %v722_v9 = vld [vmem:[%s1081_s1 + $0x44] ss:$8 sps:$4 sm:$0xff]  }
   0x4   :  { %139 = vmatprep.subr.bf16.mxu0 %v713_v3  ;;  %v734_v10 = vld [vmem:[%s1083_s3 + $0x4] ss:$8 sps:$4 sm:$0xff]   ;;  %v736_v11 = vld [vmem:[%s1083_s3] ss:$8 sps:$4 sm:$0xff]   ;;  %v737_v12 = vld [vmem:[%s1083_s3 + $0x14] ss:$8 sps:$4 sm:$0xff]  }
   0x5   :  { %386 = vmatprep.subr.bf16.mxu1 %v734_v10  ;;  %v724_v13 = vld [vmem:[%s1081_s1 + $0x40] ss:$8 sps:$4 sm:$0xff]   ;;  %v739_v14 = vld [vmem:[%s1083_s3 + $0x10] ss:$8 sps:$4 sm:$0xff]   ;;  %v740_v15 = vld [vmem:[%s1083_s3 + $0x24] ss:$8 sps:$4 sm:$0xff]  }
   0x6   :  { %387 = vmatpush1.bf16.msra.mxu1 %v736_v11  ;;  %v725_v16 = vld [vmem:[%s1081_s1 + $0x54] ss:$8 sps:$4 sm:$0xff]   ;;  %v727_v17 = vld [vmem:[%s1081_s1 + $0x50] ss:$8 sps:$4 sm:$0xff]   ;;  %v742_v18 = vld [vmem:[%s1083_s3 + $0x20] ss:$8 sps:$4 sm:$0xff]  }
   0x7   :  { %140 = vmatpush1.bf16.msra.mxu0 %v715_v4  ;;  %388 = vmatprep.subr.bf16.mxu1 %v737_v12  ;;  %v743_v19 = vld [vmem:[%s1083_s3 + $0x34] ss:$8 sps:$4 sm:$0xff]   ;;  %v728_v20 = vld [vmem:[%s1081_s1 + $0x64] ss:$8 sps:$4 sm:$0xff]   ;;  %v730_v21 = vld [vmem:[%s1081_s1 + $0x60] ss:$8 sps:$4 sm:$0xff]  }
   0x8   :  { %141 = vmatprep.subr.bf16.mxu0 %v716_v5  ;;  %v745_v22 = vld [vmem:[%s1083_s3 + $0x30] ss:$8 sps:$4 sm:$0xff]   ;;  %v746_v23 = vld [vmem:[%s1083_s3 + $0x44] ss:$8 sps:$4 sm:$0xff]   ;;  %v731_v24 = vld [vmem:[%s1081_s1 + $0x74] ss:$8 sps:$4 sm:$0xff]  }
   0x9   :  { %v733_v25 = vld [vmem:[%s1081_s1 + $0x70] ss:$8 sps:$4 sm:$0xff]   ;;  %v748_v26 = vld [vmem:[%s1083_s3 + $0x40] ss:$8 sps:$4 sm:$0xff]   ;;  %v749_v27 = vld [vmem:[%s1083_s3 + $0x54] ss:$8 sps:$4 sm:$0xff]  }
   0xa   :  { %389 = vmatpush1.bf16.msra.mxu1 %v739_v14  ;;  %v28_v28 = vld [vmem:[%s1080_s0] sm:$0x1]  ;;  %v751_v29 = vld [vmem:[%s1083_s3 + $0x50] ss:$8 sps:$4 sm:$0xff]   ;;  %v752_v30 = vld [vmem:[%s1083_s3 + $0x64] ss:$8 sps:$4 sm:$0xff]  }
   0xb   :  { %142 = vmatpush1.bf16.msra.mxu0 %v718_v6  ;;  %390 = vmatprep.subr.bf16.mxu1 %v740_v15  ;;  %v754_v31 = vld [vmem:[%s1083_s3 + $0x60] ss:$8 sps:$4 sm:$0xff]   ;;  %v755_v32 = vld [vmem:[%s1083_s3 + $0x74] ss:$8 sps:$4 sm:$0xff]   ;;  %v757_v33 = vld [vmem:[%s1083_s3 + $0x70] ss:$8 sps:$4 sm:$0xff]  }
   0xc   :  { %143 = vmatprep.subr.bf16.mxu0 %v719_v7  ;;  %v758_v34 = vld [vmem:[%s1083_s3 + $0x84] ss:$8 sps:$4 sm:$0xff]   ;;  %v760_v35 = vld [vmem:[%s1083_s3 + $0x80] ss:$8 sps:$4 sm:$0xff]  }
   0xe   :  { %391 = vmatpush1.bf16.msra.mxu1 %v742_v18 }
   0xf   :  { %144 = vmatpush1.bf16.msra.mxu0 %v721_v8  ;;  %392 = vmatprep.subr.bf16.mxu1 %v743_v19 }
  0x10   :  { %145 = vmatprep.subr.bf16.mxu0 %v722_v9 }
  0x12   :  { %393 = vmatpush1.bf16.msra.mxu1 %v745_v22 }
  0x13   :  { %146 = vmatpush1.bf16.msra.mxu0 %v724_v13  ;;  %394 = vmatprep.subr.bf16.mxu1 %v746_v23 }
  0x14   :  { %147 = vmatprep.subr.bf16.mxu0 %v725_v16 }
  0x16   :  { %395 = vmatpush1.bf16.msra.mxu1 %v748_v26 }
  0x17   :  { %148 = vmatpush1.bf16.msra.mxu0 %v727_v17  ;;  %396 = vmatprep.subr.bf16.mxu1 %v749_v27 }
  0x18   :  { %149 = vmatprep.subr.bf16.mxu0 %v728_v20 }
  0x1a   :  { %397 = vmatpush1.bf16.msra.mxu1 %v751_v29 }
  0x1b   :  { %150 = vmatpush1.bf16.msra.mxu0 %v730_v21  ;;  %398 = vmatprep.subr.bf16.mxu1 %v752_v30 }
  0x1c   :  { %151 = vmatprep.subr.bf16.mxu0 %v731_v24 }
  0x1e   :  { %399 = vmatpush1.bf16.msra.mxu1 %v754_v31 }
  0x1f   :  { %152 = vmatpush1.bf16.msra.mxu0 %v733_v25  ;;  %400 = vmatprep.subr.bf16.mxu1 %v755_v32 }
  0x22   :  { %170 = vmatmul.mubr.bf16.vlgmr.msra.gmra.mrb[0].mxu0 %v28_v28  ;;  %401 = vmatpush1.bf16.msra.mxu1 %v757_v33 }
  0x23   :  { %12 = vsyncpa [#allocation3], 0  ;;  %402 = vmatprep.subr.bf16.mxu1 %v758_v34  ;;  %v761_v36 = vld [vmem:[%s1083_s3 + $0x94] ss:$8 sps:$4 sm:$0xff]   ;;  %v763_v37 = vld [vmem:[%s1083_s3 + $0x90] ss:$8 sps:$4 sm:$0xff]   ;;  %v47_v62 = vlaneseq }
  0x24   :  { %v764_v38 = vld [vmem:[%s1083_s3 + $0xa4] ss:$8 sps:$4 sm:$0xff]   ;;  %v766_v39 = vld [vmem:[%s1083_s3 + $0xa0] ss:$8 sps:$4 sm:$0xff]   ;;  %v767_v40 = vld [vmem:[%s1083_s3 + $0xb4] ss:$8 sps:$4 sm:$0xff]  }
  0x25   :  { %v769_v41 = vld [vmem:[%s1083_s3 + $0xb0] ss:$8 sps:$4 sm:$0xff]   ;;  %v770_v42 = vld [vmem:[%s1083_s3 + $0xc4] ss:$8 sps:$4 sm:$0xff]   ;;  %v772_v43 = vld [vmem:[%s1083_s3 + $0xc0] ss:$8 sps:$4 sm:$0xff]  }
  0x26   :  { %403 = vmatpush1.bf16.msra.mxu1 %v760_v35  ;;  %v773_v44 = vld [vmem:[%s1083_s3 + $0xd4] ss:$8 sps:$4 sm:$0xff]   ;;  %v775_v45 = vld [vmem:[%s1083_s3 + $0xd0] ss:$8 sps:$4 sm:$0xff]   ;;  %v776_v46 = vld [vmem:[%s1083_s3 + $0xe4] ss:$8 sps:$4 sm:$0xff]  }
  0x27   :  { %404 = vmatprep.subr.bf16.mxu1 %v761_v36  ;;  %v778_v47 = vld [vmem:[%s1083_s3 + $0xe0] ss:$8 sps:$4 sm:$0xff]   ;;  %v779_v48 = vld [vmem:[%s1083_s3 + $0xf4] ss:$8 sps:$4 sm:$0xff]   ;;  %v781_v49 = vld [vmem:[%s1083_s3 + $0xf0] ss:$8 sps:$4 sm:$0xff]  }
  0x28   :  { %v782_v50 = vld [vmem:[%s1085_s5 + $0x40] sm:$0xff]   ;;  %v784_v52 = vld [vmem:[%s1085_s5 + $0x48] sm:$0xff]   ;;  %v786_v54 = vld [vmem:[%s1085_s5 + $0x50] sm:$0xff]   ;;  %v48_v63 = vshrl.u32 %v47_v62, 7 }
  0x29   :  { %v783_v51 = vld [vmem:[%s1085_s5] sm:$0xff]   ;;  %686 = vmatprep.subr.bf16.mxu0 %v782_v50  ;;  %v785_v53 = vld [vmem:[%s1085_s5 + $0x8] sm:$0xff]   ;;  %v787_v55 = vld [vmem:[%s1085_s5 + $0x10] sm:$0xff]  }
  0x2a   :  { %405 = vmatpush1.bf16.msra.mxu1 %v763_v37  ;;  %687 = vmatpush3.bf16.msra.mxu0 %v783_v51  ;;  %v788_v56 = vld [vmem:[%s1085_s5 + $0x58] sm:$0xff]   ;;  %v790_v58 = vld [vmem:[%s1085_s5 + $0x60] sm:$0xff]   ;;  %v792_v60 = vld [vmem:[%s1085_s5 + $0x68] sm:$0xff]   ;;  %v49_v0 = vsub.s32 0, %v48_v63  ;;  %v53_v2 = vsub.s32 1, %v48_v63 }
  0x2b   :  { %406 = vmatprep.subr.bf16.mxu1 %v764_v38  ;;  %688 = vmatprep.subr.bf16.mxu0 %v784_v52  ;;  %v789_v57 = vld [vmem:[%s1085_s5 + $0x18] sm:$0xff]   ;;  %v791_v59 = vld [vmem:[%s1085_s5 + $0x20] sm:$0xff]   ;;  %v793_v61 = vld [vmem:[%s1085_s5 + $0x28] sm:$0xff]  }
  0x2c   :  { %v45_v1 = vld [vmem:[%s1082_s2] sm:$0x3]  ;;  %v794_v15 = vld [vmem:[%s1085_s5 + $0x70] sm:$0xff]   ;;  %v796_v17 = vld [vmem:[%s1085_s5 + $0x78] sm:$0xff]  }
  0x2d   :  { %v50_v3 = vrot.slane %v45_v1, %v49_v0  ;;  %v54_v4 = vrot.slane %v45_v1, %v53_v2  ;;  %v795_v16 = vld [vmem:[%s1085_s5 + $0x30] sm:$0xff]   ;;  %v797_v18 = vld [vmem:[%s1085_s5 + $0x38] sm:$0xff]   ;;  %v214_v19 = vld [vmem:[%s1084_s4] sm:$0x3]  ;;  %s823_s4 = smov [#allocation2]  }
  0x2e   :  { %407 = vmatpush1.bf16.msra.mxu1 %v766_v39  ;;  %689 = vmatpush3.bf16.msra.mxu0 %v785_v53  ;;  %v219_v20 = vrot.slane %v214_v19, %v49_v0  ;;  %v223_v21 = vrot.slane %v214_v19, %v53_v2  ;;  %v669_v34 = vld [vmem:[%s1086_s6] ss:$0 sm:$0xff]  ;;  %s613_s12 = sshll.u32 %s823_s4, 4  ;;  %s614_s12 = int_to_ptr.vmem [resolvable:$true] %s613_s12 }
  0x2f   :  { %408 = vmatprep.subr.bf16.mxu1 %v767_v40  ;;  %690 = vmatprep.subr.bf16.mxu0 %v786_v54  ;;  %s798_s1 = scalar_lea.vmem %s614_s12, 32  ;;  %p803_p1 = scmp.lt.s32.totalorder %s614_s12, %s614_s12 }
  0x30   :  { %p799_p0 = scmp.ne.s32.totalorder %s614_s12, %s798_s1  ;;  %p804_p2 = scmp.lt.s32.totalorder %s798_s1, %s798_s1 }
  0x32   :  { %409 = vmatpush1.bf16.msra.mxu1 %v769_v41  ;;  %691 = vmatpush3.bf16.msra.mxu0 %v787_v55  ;;  %p805_p3 = por %p804_p2, %p803_p1 }
  0x33   :  { %410 = vmatprep.subr.bf16.mxu1 %v770_v42  ;;  %692 = vmatprep.subr.bf16.mxu0 %v788_v56 }
  0x34   :  { %p806_p4 = pnand %p805_p3, %p799_p0 }
  0x36   :  { %411 = vmatpush1.bf16.msra.mxu1 %v772_v43  ;;  %693 = vmatpush3.bf16.msra.mxu0 %v789_v57 }
  0x37   :  { %412 = vmatprep.subr.bf16.mxu1 %v773_v44  ;;  %694 = vmatprep.subr.bf16.mxu0 %v790_v58 }
  0x3a   :  { %413 = vmatpush1.bf16.msra.mxu1 %v775_v45  ;;  %695 = vmatpush3.bf16.msra.mxu0 %v791_v59 }
  0x3b   :  { %414 = vmatprep.subr.bf16.mxu1 %v776_v46  ;;  %696 = vmatprep.subr.bf16.mxu0 %v792_v60 }
  0x3e   :  { %415 = vmatpush1.bf16.msra.mxu1 %v778_v47  ;;  %697 = vmatpush3.bf16.msra.mxu0 %v793_v61 }
  0x3f   :  { %416 = vmatprep.subr.bf16.mxu1 %v779_v48  ;;  %698 = vmatprep.subr.bf16.mxu0 %v794_v15 }
  0x42   :  { %417 = vmatpush1.bf16.msra.mxu1 %v781_v49  ;;  %699 = vmatpush3.bf16.msra.mxu0 %v795_v16 }
  0x43   :  { %700 = vmatprep.subr.bf16.mxu0 %v796_v17 }
  0x46   :  { %701 = vmatpush3.bf16.msra.mxu0 %v797_v18 }
  0xf5   :  { %v171_v5 = vpop.f32.mrb[0].mxu0 }
  0xf6   :  { %v172_v6 = vadd.f32 %v171_v5, %v50_v3  ;;  %v173_v7 = vpop.f32.mrb[1].mxu0 }
  0xf7   :  { %v174_v8 = vadd.f32 %v173_v7, %v54_v4  ;;  %v175_v9 = vpop.f32.mrb[2].mxu0 }
  0xf8   :  { %v178_v10 = vmax.f32 %v172_v6, 0.0  ;;  %v176_v11 = vpop.f32.mrb[3].mxu0 }
  0xf9   :  { %v179_v12 = vmax.f32 %v174_v8, 0.0 }
  0xfa   :  { %v180_v14 = vpack.c.bf16 %v178_v10, %v178_v10 }
  0xfb   :  { %v181_v13 = vpack.c.bf16 %v179_v12, %v179_v12 }
  0xfd   :  { %418 = vmatprep.mubr.bf16.mxu1 %v181_v13 }
  0xfe   :  { %419 = vmatmul.mubr.bf16.vlgmr.msra.gmra.mrb[0].mxu1 %v180_v14 }
 0x1d1   :  { %v420_v22 = vpop.f32.mrb[0].mxu1 }
 0x1d2   :  { %v421_v23 = vadd.f32 %v420_v22, %v219_v20  ;;  %v422_v24 = vpop.f32.mrb[1].mxu1 }
 0x1d3   :  { %v423_v25 = vadd.f32 %v422_v24, %v223_v21  ;;  %v424_v26 = vpop.f32.mrb[2].mxu1 }
 0x1d4   :  { %v427_v27 = vmax.f32 %v421_v23, 0.0  ;;  %v425_v28 = vpop.f32.mrb[3].mxu1 }
 0x1d5   :  { %v428_v29 = vmax.f32 %v423_v25, 0.0 }
 0x1d6   :  { %v429_v31 = vpack.c.bf16 %v427_v27, %v427_v27 }
 0x1d7   :  { %v430_v30 = vpack.c.bf16 %v428_v29, %v428_v29 }
 0x1d9   :  { %598 = vmatprep.mubr.bf16.mxu0 %v430_v30 }
 0x1da   :  { %599 = vmatmul.mubr.bf16.vlgmr.msra.gmra.mrb[4].mxu0 %v429_v31 }
 0x2ad   :  { %v702_v32 = vpop.f32.mrb[4].mxu0 }
 0x2ae   :  { %v703_v33 = vpop.f32.mrb[5].mxu0 }
 0x2af   :  { %v704_v35 = vadd.f32 %v703_v33, %v702_v32  ;;  %v705_v36 = vpop.f32.mrb[6].mxu0 }
 0x2b0   :  { %v706_v37 = vpop.f32.mrb[7].mxu0 }
 0x2b1   :  { %v601_v38 = vadd.f32 %v704_v35, %v669_v34 }
 0x2b3   :  { %606 = vst [vmem:[#allocation2] sm:$0x3] %v601_v38 }
 0x2b4   :  { %809 = shalt.err (!%p806_p4)
}
 0x2b5   :  { %s810_s15 = scalar_lea.hbm %s1087_s7, 32 }
 0x2b6   :  { %p811_p5 = scmp.ne.s32.totalorder %s1087_s7, %s810_s15  ;;  %p814_p6 = scmp.lt.u32.totalorder %s810_s15, %s1087_s7 }
 0x2b8   :  { %p816_p7 = pnand %p814_p6, %p811_p5 }
 0x2ba   :  { %819 = shalt.err (!%p816_p7)
}
 0x2bb   :  { %616 = dma.vmem_to_hbm [thread:$0]  %s614_s12, 32, %s1087_s7, [#allocation3]  }
 0x2bc   :  { %820 = dma.done.wait [#allocation3], 32  }
 0x2bd   :  { %821 = vsyncadd [#allocation3], 4294967264 }
 0x2be   :  { %620 = vsyncpa [#allocation3], 1 }

// kernel: forward.13
= control target key start
LH: loop header
LB: loop body
LE: loop exit
PB: predicated region body
PF: predicated region fallthrough
CT: control target
= control target key end

     0   :  { %s2165_s12 = smov 0   ;;  %s2167_s13 = smov 0   ;;  %s2643_s0 = inlined_call_operand.vmem [shape: bf16[8,1152], index: 0, kind: input, shape index: {}]   ;;  %s2644_s1 = inlined_call_operand.vmem [shape: bf16[1152,256], index: 1, kind: input, shape index: {}]   ;;  %s2645_s2 = inlined_call_operand.vmem [shape: f32[1,256], index: 2, kind: input, shape index: {}]   ;;  %s2646_s3 = inlined_call_operand.vmem [shape: f32[8,256], index: 3, kind: output, shape index: {}]  }
   0x1   :  { %s2169_s14 = smov 0   ;;  %s2171_s15 = smov 0  }
   0x2   :  { %s2173_s16 = smov 0  }
   0x3 LB: > { %s22_s17 = sadd.s32 1, %s2137_s15  ;;  %p65_p1 = scmp.ne.s32.totalorder %s2129_s13, %s2125_s12  ;;  %s2141_s16 = sphi %s2173_s16, %s13_s16   ;;  %s2137_s15 = sphi %s2171_s15, %s2650_s15   ;;  %s2133_s14 = sphi %s2169_s14, %s2649_s14   ;;  %s2129_s13 = sphi %s2167_s13, %s2648_s13   ;;  %s2125_s12 = sphi %s2165_s12, %s2647_s12  }
   0x4   : > { %p23_p0 = scmp.ge.s32.totalorder %s22_s17, 2  ;;  %p66_p2 = scmp.eq.s32.totalorder %s2141_s16, 0 }
   0x5   : > { %s58_s19 = sadd.s32 1, %s2129_s13  ;;  %p1773_p5 = scmp.ge.s32.totalorder %s2141_s16, 2 }
   0x6   : > { %s2652_s17 = smov (%p23_p0, %s22_s17), 0  ;;  %p67_p3 = por %p66_p2, %p65_p1 }
   0x7   : > { %s55_s18 = ssub.s32 %s2137_s15, %s2652_s17  ;;  %153 = sbr.rel (%p1773_p5) target bundleno = 114 (0x72), region = 20 }
   0x8   : > { %p56_p4 = scmp.eq.s32.totalorder %s55_s18, 0 }
   0xa   : > { %s2200_s20 = scalar_select %p56_p4, %s2129_s13, %s58_s19  }
   0xe   : > { %156 = sbr.rel (!%p67_p3) target bundleno = 114 (0x72), region = 24  ;;  %s158_s21 = sand.u32 (%p67_p3), 1, %s2129_s13  }
   0xf   : > { %s1774_s22 = sshll.u32 (%p67_p3), %s2137_s15, 2  ;;  %s1978_s23 = smul.u32 (%p67_p3), 576, %s158_s21 }
  0x10   : > { %s2208_s26 = scalar_lea.vmem (%p67_p3), %s2644_s1, %s1774_s22 }
  0x11   : > { %v178_v0 = vld [vmem:[%s2208_s26] sm:$0xf] (%p67_p3)  ;;  %v180_v1 = vld [vmem:[%s2208_s26 + $0x8] sm:$0xf] (%p67_p3)  ;;  %v182_v2 = vld [vmem:[%s2208_s26 + $0x10] sm:$0xf] (%p67_p3) }
  0x12   : > { %v184_v3 = vld [vmem:[%s2208_s26 + $0x18] sm:$0xf] (%p67_p3)  ;;  %v186_v4 = vld [vmem:[%s2208_s26 + $0x20] sm:$0xf] (%p67_p3)  ;;  %s2215_s27 = scalar_lea.vmem (%p67_p3), [#allocation2], %s1978_s23 }
  0x13   : > { %179 = vst [vmem:[%s2215_s27] sm:$0xf] (%p67_p3), %v178_v0  ;;  %181 = vst [vmem:[%s2215_s27 + $0x4] sm:$0xf] (%p67_p3), %v180_v1  ;;  %v188_v5 = vld [vmem:[%s2208_s26 + $0x28] sm:$0xf] (%p67_p3) }
  0x14   : > { %183 = vst [vmem:[%s2215_s27 + $0x8] sm:$0xf] (%p67_p3), %v182_v2  ;;  %185 = vst [vmem:[%s2215_s27 + $0xc] sm:$0xf] (%p67_p3), %v184_v3  ;;  %v190_v6 = vld [vmem:[%s2208_s26 + $0x30] sm:$0xf] (%p67_p3) }
  0x15   : > { %187 = vst [vmem:[%s2215_s27 + $0x10] sm:$0xf] %v186_v4  ;;  %v192_v7 = vld [vmem:[%s2208_s26 + $0x38] sm:$0xf]  ;;  %189 = vst [vmem:[%s2215_s27 + $0x14] sm:$0xf] %v188_v5 }
  0x16   : > { %191 = vst [vmem:[%s2215_s27 + $0x18] sm:$0xf] %v190_v6  ;;  %193 = vst [vmem:[%s2215_s27 + $0x1c] sm:$0xf] %v192_v7  ;;  %v194_v8 = vld [vmem:[%s2208_s26 + $0x40] sm:$0xf] }
  0x17   : > { %v196_v9 = vld [vmem:[%s2208_s26 + $0x48] sm:$0xf]  ;;  %v198_v10 = vld [vmem:[%s2208_s26 + $0x50] sm:$0xf]  ;;  %195 = vst [vmem:[%s2215_s27 + $0x20] sm:$0xf] %v194_v8 }
  0x18   : > { %197 = vst [vmem:[%s2215_s27 + $0x24] sm:$0xf] %v196_v9  ;;  %199 = vst [vmem:[%s2215_s27 + $0x28] sm:$0xf] %v198_v10  ;;  %v200_v11 = vld [vmem:[%s2208_s26 + $0x58] sm:$0xf] }
  0x19   : > { %v202_v12 = vld [vmem:[%s2208_s26 + $0x60] sm:$0xf]  ;;  %v204_v13 = vld [vmem:[%s2208_s26 + $0x68] sm:$0xf]  ;;  %201 = vst [vmem:[%s2215_s27 + $0x2c] sm:$0xf] %v200_v11 }
  0x1a   : > { %203 = vst [vmem:[%s2215_s27 + $0x30] sm:$0xf] %v202_v12  ;;  %205 = vst [vmem:[%s2215_s27 + $0x34] sm:$0xf] %v204_v13  ;;  %v206_v14 = vld [vmem:[%s2208_s26 + $0x70] sm:$0xf] }
  0x1b   : > { %v208_v15 = vld [vmem:[%s2208_s26 + $0x78] sm:$0xf]  ;;  %v210_v16 = vld [vmem:[%s2208_s26 + $0x80] sm:$0xf]  ;;  %207 = vst [vmem:[%s2215_s27 + $0x38] sm:$0xf] %v206_v14 }
  0x1c   : > { %209 = vst [vmem:[%s2215_s27 + $0x3c] sm:$0xf] %v208_v15  ;;  %211 = vst [vmem:[%s2215_s27 + $0x40] sm:$0xf] %v210_v16  ;;  %v212_v17 = vld [vmem:[%s2208_s26 + $0x88] sm:$0xf] }
  0x1d   : > { %v214_v18 = vld [vmem:[%s2208_s26 + $0x90] sm:$0xf]  ;;  %v216_v19 = vld [vmem:[%s2208_s26 + $0x98] sm:$0xf]  ;;  %213 = vst [vmem:[%s2215_s27 + $0x44] sm:$0xf] %v212_v17 }
  0x1e   : > { %215 = vst [vmem:[%s2215_s27 + $0x48] sm:$0xf] %v214_v18  ;;  %217 = vst [vmem:[%s2215_s27 + $0x4c] sm:$0xf] %v216_v19  ;;  %v218_v20 = vld [vmem:[%s2208_s26 + $0xa0] sm:$0xf] }
  0x1f   : > { %v220_v21 = vld [vmem:[%s2208_s26 + $0xa8] sm:$0xf]  ;;  %v222_v22 = vld [vmem:[%s2208_s26 + $0xb0] sm:$0xf]  ;;  %219 = vst [vmem:[%s2215_s27 + $0x50] sm:$0xf] %v218_v20 }
  0x20   : > { %221 = vst [vmem:[%s2215_s27 + $0x54] sm:$0xf] %v220_v21  ;;  %223 = vst [vmem:[%s2215_s27 + $0x58] sm:$0xf] %v222_v22  ;;  %v224_v23 = vld [vmem:[%s2208_s26 + $0xb8] sm:$0xf] }
  0x21   : > { %v226_v24 = vld [vmem:[%s2208_s26 + $0xc0] sm:$0xf]  ;;  %v228_v25 = vld [vmem:[%s2208_s26 + $0xc8] sm:$0xf]  ;;  %225 = vst [vmem:[%s2215_s27 + $0x5c] sm:$0xf] %v224_v23 }
  0x22   : > { %227 = vst [vmem:[%s2215_s27 + $0x60] sm:$0xf] %v226_v24  ;;  %229 = vst [vmem:[%s2215_s27 + $0x64] sm:$0xf] %v228_v25  ;;  %v230_v26 = vld [vmem:[%s2208_s26 + $0xd0] sm:$0xf] }
  0x23   : > { %v232_v27 = vld [vmem:[%s2208_s26 + $0xd8] sm:$0xf]  ;;  %v234_v28 = vld [vmem:[%s2208_s26 + $0xe0] sm:$0xf]  ;;  %231 = vst [vmem:[%s2215_s27 + $0x68] sm:$0xf] %v230_v26 }
  0x24   : > { %233 = vst [vmem:[%s2215_s27 + $0x6c] sm:$0xf] %v232_v27  ;;  %235 = vst [vmem:[%s2215_s27 + $0x70] sm:$0xf] %v234_v28  ;;  %v236_v29 = vld [vmem:[%s2208_s26 + $0xe8] sm:$0xf] }
  0x25   : > { %v238_v30 = vld [vmem:[%s2208_s26 + $0xf0] sm:$0xf]  ;;  %v240_v31 = vld [vmem:[%s2208_s26 + $0xf8] sm:$0xf]  ;;  %237 = vst [vmem:[%s2215_s27 + $0x74] sm:$0xf] %v236_v29 }
  0x26   : > { %239 = vst [vmem:[%s2215_s27 + $0x78] sm:$0xf] %v238_v30  ;;  %241 = vst [vmem:[%s2215_s27 + $0x7c] sm:$0xf] %v240_v31  ;;  %v242_v32 = vld [vmem:[%s2208_s26 + $0x100] sm:$0xf] }
  0x27   : > { %v244_v33 = vld [vmem:[%s2208_s26 + $0x108] sm:$0xf]  ;;  %v246_v34 = vld [vmem:[%s2208_s26 + $0x110] sm:$0xf]  ;;  %243 = vst [vmem:[%s2215_s27 + $0x80] sm:$0xf] %v242_v32 }
  0x28   : > { %245 = vst [vmem:[%s2215_s27 + $0x84] sm:$0xf] %v244_v33  ;;  %247 = vst [vmem:[%s2215_s27 + $0x88] sm:$0xf] %v246_v34  ;;  %v248_v35 = vld [vmem:[%s2208_s26 + $0x118] sm:$0xf] }
  0x29   : > { %v250_v36 = vld [vmem:[%s2208_s26 + $0x120] sm:$0xf]  ;;  %v252_v37 = vld [vmem:[%s2208_s26 + $0x128] sm:$0xf]  ;;  %249 = vst [vmem:[%s2215_s27 + $0x8c] sm:$0xf] %v248_v35 }
  0x2a   : > { %251 = vst [vmem:[%s2215_s27 + $0x90] sm:$0xf] %v250_v36  ;;  %253 = vst [vmem:[%s2215_s27 + $0x94] sm:$0xf] %v252_v37  ;;  %v254_v38 = vld [vmem:[%s2208_s26 + $0x130] sm:$0xf] }
  0x2b   : > { %v256_v39 = vld [vmem:[%s2208_s26 + $0x138] sm:$0xf]  ;;  %v258_v40 = vld [vmem:[%s2208_s26 + $0x140] sm:$0xf]  ;;  %255 = vst [vmem:[%s2215_s27 + $0x98] sm:$0xf] %v254_v38 }
  0x2c   : > { %257 = vst [vmem:[%s2215_s27 + $0x9c] sm:$0xf] %v256_v39  ;;  %259 = vst [vmem:[%s2215_s27 + $0xa0] sm:$0xf] %v258_v40  ;;  %v260_v41 = vld [vmem:[%s2208_s26 + $0x148] sm:$0xf] }
  0x2d   : > { %v262_v42 = vld [vmem:[%s2208_s26 + $0x150] sm:$0xf]  ;;  %v264_v43 = vld [vmem:[%s2208_s26 + $0x158] sm:$0xf]  ;;  %261 = vst [vmem:[%s2215_s27 + $0xa4] sm:$0xf] %v260_v41 }
  0x2e   : > { %263 = vst [vmem:[%s2215_s27 + $0xa8] sm:$0xf] %v262_v42  ;;  %265 = vst [vmem:[%s2215_s27 + $0xac] sm:$0xf] %v264_v43  ;;  %v266_v44 = vld [vmem:[%s2208_s26 + $0x160] sm:$0xf] }
  0x2f   : > { %v268_v45 = vld [vmem:[%s2208_s26 + $0x168] sm:$0xf]  ;;  %v270_v46 = vld [vmem:[%s2208_s26 + $0x170] sm:$0xf]  ;;  %267 = vst [vmem:[%s2215_s27 + $0xb0] sm:$0xf] %v266_v44 }
  0x30   : > { %269 = vst [vmem:[%s2215_s27 + $0xb4] sm:$0xf] %v268_v45  ;;  %271 = vst [vmem:[%s2215_s27 + $0xb8] sm:$0xf] %v270_v46  ;;  %v272_v47 = vld [vmem:[%s2208_s26 + $0x178] sm:$0xf] }
  0x31   : > { %v274_v48 = vld [vmem:[%s2208_s26 + $0x180] sm:$0xf]  ;;  %v276_v49 = vld [vmem:[%s2208_s26 + $0x188] sm:$0xf]  ;;  %273 = vst [vmem:[%s2215_s27 + $0xbc] sm:$0xf] %v272_v47 }
  0x32   : > { %275 = vst [vmem:[%s2215_s27 + $0xc0] sm:$0xf] %v274_v48  ;;  %277 = vst [vmem:[%s2215_s27 + $0xc4] sm:$0xf] %v276_v49  ;;  %v278_v50 = vld [vmem:[%s2208_s26 + $0x190] sm:$0xf] }
  0x33   : > { %v280_v51 = vld [vmem:[%s2208_s26 + $0x198] sm:$0xf]  ;;  %v282_v52 = vld [vmem:[%s2208_s26 + $0x1a0] sm:$0xf]  ;;  %279 = vst [vmem:[%s2215_s27 + $0xc8] sm:$0xf] %v278_v50 }
  0x34   : > { %281 = vst [vmem:[%s2215_s27 + $0xcc] sm:$0xf] %v280_v51  ;;  %283 = vst [vmem:[%s2215_s27 + $0xd0] sm:$0xf] %v282_v52  ;;  %v284_v53 = vld [vmem:[%s2208_s26 + $0x1a8] sm:$0xf] }
  0x35   : > { %v286_v54 = vld [vmem:[%s2208_s26 + $0x1b0] sm:$0xf]  ;;  %v288_v55 = vld [vmem:[%s2208_s26 + $0x1b8] sm:$0xf]  ;;  %285 = vst [vmem:[%s2215_s27 + $0xd4] sm:$0xf] %v284_v53 }
  0x36   : > { %287 = vst [vmem:[%s2215_s27 + $0xd8] sm:$0xf] %v286_v54  ;;  %289 = vst [vmem:[%s2215_s27 + $0xdc] sm:$0xf] %v288_v55  ;;  %v290_v56 = vld [vmem:[%s2208_s26 + $0x1c0] sm:$0xf] }
  0x37   : > { %v292_v57 = vld [vmem:[%s2208_s26 + $0x1c8] sm:$0xf]  ;;  %v294_v58 = vld [vmem:[%s2208_s26 + $0x1d0] sm:$0xf]  ;;  %291 = vst [vmem:[%s2215_s27 + $0xe0] sm:$0xf] %v290_v56 }
  0x38   : > { %293 = vst [vmem:[%s2215_s27 + $0xe4] sm:$0xf] %v292_v57  ;;  %295 = vst [vmem:[%s2215_s27 + $0xe8] sm:$0xf] %v294_v58  ;;  %v296_v59 = vld [vmem:[%s2208_s26 + $0x1d8] sm:$0xf] }
  0x39   : > { %v298_v60 = vld [vmem:[%s2208_s26 + $0x1e0] sm:$0xf]  ;;  %v300_v61 = vld [vmem:[%s2208_s26 + $0x1e8] sm:$0xf]  ;;  %297 = vst [vmem:[%s2215_s27 + $0xec] sm:$0xf] %v296_v59 }
  0x3a   : > { %299 = vst [vmem:[%s2215_s27 + $0xf0] sm:$0xf] %v298_v60  ;;  %301 = vst [vmem:[%s2215_s27 + $0xf4] sm:$0xf] %v300_v61  ;;  %v302_v62 = vld [vmem:[%s2208_s26 + $0x1f0] sm:$0xf] }
  0x3b   : > { %v304_v63 = vld [vmem:[%s2208_s26 + $0x1f8] sm:$0xf]  ;;  %v306_v0 = vld [vmem:[%s2208_s26 + $0x200] sm:$0xf]  ;;  %303 = vst [vmem:[%s2215_s27 + $0xf8] sm:$0xf] %v302_v62 }
  0x3c   : > { %305 = vst [vmem:[%s2215_s27 + $0xfc] sm:$0xf] %v304_v63  ;;  %307 = vst [vmem:[%s2215_s27 + $0x100] sm:$0xf] %v306_v0  ;;  %v308_v1 = vld [vmem:[%s2208_s26 + $0x208] sm:$0xf] }
  0x3d   : > { %v310_v2 = vld [vmem:[%s2208_s26 + $0x210] sm:$0xf]  ;;  %v312_v3 = vld [vmem:[%s2208_s26 + $0x218] sm:$0xf]  ;;  %309 = vst [vmem:[%s2215_s27 + $0x104] sm:$0xf] %v308_v1 }
  0x3e   : > { %311 = vst [vmem:[%s2215_s27 + $0x108] sm:$0xf] %v310_v2  ;;  %313 = vst [vmem:[%s2215_s27 + $0x10c] sm:$0xf] %v312_v3  ;;  %v314_v4 = vld [vmem:[%s2208_s26 + $0x220] sm:$0xf] }
  0x3f   : > { %v316_v5 = vld [vmem:[%s2208_s26 + $0x228] sm:$0xf]  ;;  %v318_v6 = vld [vmem:[%s2208_s26 + $0x230] sm:$0xf]  ;;  %315 = vst [vmem:[%s2215_s27 + $0x110] sm:$0xf] %v314_v4 }
  0x40   : > { %317 = vst [vmem:[%s2215_s27 + $0x114] sm:$0xf] %v316_v5  ;;  %319 = vst [vmem:[%s2215_s27 + $0x118] sm:$0xf] %v318_v6  ;;  %v320_v7 = vld [vmem:[%s2208_s26 + $0x238] sm:$0xf] }
  0x41   : > { %v322_v8 = vld [vmem:[%s2208_s26 + $0x240] sm:$0xf]  ;;  %v324_v9 = vld [vmem:[%s2208_s26 + $0x248] sm:$0xf]  ;;  %321 = vst [vmem:[%s2215_s27 + $0x11c] sm:$0xf] %v320_v7 }
  0x42   : > { %323 = vst [vmem:[%s2215_s27 + $0x120] sm:$0xf] %v322_v8  ;;  %325 = vst [vmem:[%s2215_s27 + $0x124] sm:$0xf] %v324_v9  ;;  %v326_v10 = vld [vmem:[%s2208_s26 + $0x250] sm:$0xf] }
  0x43   : > { %v328_v11 = vld [vmem:[%s2208_s26 + $0x258] sm:$0xf]  ;;  %v330_v12 = vld [vmem:[%s2208_s26 + $0x260] sm:$0xf]  ;;  %327 = vst [vmem:[%s2215_s27 + $0x128] sm:$0xf] %v326_v10 }
  0x44   : > { %329 = vst [vmem:[%s2215_s27 + $0x12c] sm:$0xf] %v328_v11  ;;  %331 = vst [vmem:[%s2215_s27 + $0x130] sm:$0xf] %v330_v12  ;;  %v332_v13 = vld [vmem:[%s2208_s26 + $0x268] sm:$0xf] }
  0x45   : > { %v334_v14 = vld [vmem:[%s2208_s26 + $0x270] sm:$0xf]  ;;  %v336_v15 = vld [vmem:[%s2208_s26 + $0x278] sm:$0xf]  ;;  %333 = vst [vmem:[%s2215_s27 + $0x134] sm:$0xf] %v332_v13 }
  0x46   : > { %335 = vst [vmem:[%s2215_s27 + $0x138] sm:$0xf] %v334_v14  ;;  %337 = vst [vmem:[%s2215_s27 + $0x13c] sm:$0xf] %v336_v15  ;;  %v338_v16 = vld [vmem:[%s2208_s26 + $0x280] sm:$0xf] }
  0x47   : > { %v340_v17 = vld [vmem:[%s2208_s26 + $0x288] sm:$0xf]  ;;  %v342_v18 = vld [vmem:[%s2208_s26 + $0x290] sm:$0xf]  ;;  %339 = vst [vmem:[%s2215_s27 + $0x140] sm:$0xf] %v338_v16 }
  0x48   : > { %341 = vst [vmem:[%s2215_s27 + $0x144] sm:$0xf] %v340_v17  ;;  %343 = vst [vmem:[%s2215_s27 + $0x148] sm:$0xf] %v342_v18  ;;  %v344_v19 = vld [vmem:[%s2208_s26 + $0x298] sm:$0xf] }
  0x49   : > { %v346_v20 = vld [vmem:[%s2208_s26 + $0x2a0] sm:$0xf]  ;;  %v348_v21 = vld [vmem:[%s2208_s26 + $0x2a8] sm:$0xf]  ;;  %345 = vst [vmem:[%s2215_s27 + $0x14c] sm:$0xf] %v344_v19 }
  0x4a   : > { %347 = vst [vmem:[%s2215_s27 + $0x150] sm:$0xf] %v346_v20  ;;  %349 = vst [vmem:[%s2215_s27 + $0x154] sm:$0xf] %v348_v21  ;;  %v350_v22 = vld [vmem:[%s2208_s26 + $0x2b0] sm:$0xf] }
  0x4b   : > { %v352_v23 = vld [vmem:[%s2208_s26 + $0x2b8] sm:$0xf]  ;;  %v354_v24 = vld [vmem:[%s2208_s26 + $0x2c0] sm:$0xf]  ;;  %351 = vst [vmem:[%s2215_s27 + $0x158] sm:$0xf] %v350_v22 }
  0x4c   : > { %353 = vst [vmem:[%s2215_s27 + $0x15c] sm:$0xf] %v352_v23  ;;  %355 = vst [vmem:[%s2215_s27 + $0x160] sm:$0xf] %v354_v24  ;;  %v356_v25 = vld [vmem:[%s2208_s26 + $0x2c8] sm:$0xf] }
  0x4d   : > { %v358_v26 = vld [vmem:[%s2208_s26 + $0x2d0] sm:$0xf]  ;;  %v360_v27 = vld [vmem:[%s2208_s26 + $0x2d8] sm:$0xf]  ;;  %357 = vst [vmem:[%s2215_s27 + $0x164] sm:$0xf] %v356_v25 }
  0x4e   : > { %359 = vst [vmem:[%s2215_s27 + $0x168] sm:$0xf] %v358_v26  ;;  %361 = vst [vmem:[%s2215_s27 + $0x16c] sm:$0xf] %v360_v27  ;;  %v362_v28 = vld [vmem:[%s2208_s26 + $0x2e0] sm:$0xf] }
  0x4f   : > { %v364_v29 = vld [vmem:[%s2208_s26 + $0x2e8] sm:$0xf]  ;;  %v366_v30 = vld [vmem:[%s2208_s26 + $0x2f0] sm:$0xf]  ;;  %363 = vst [vmem:[%s2215_s27 + $0x170] sm:$0xf] %v362_v28 }
  0x50   : > { %365 = vst [vmem:[%s2215_s27 + $0x174] sm:$0xf] %v364_v29  ;;  %367 = vst [vmem:[%s2215_s27 + $0x178] sm:$0xf] %v366_v30  ;;  %v368_v31 = vld [vmem:[%s2208_s26 + $0x2f8] sm:$0xf] }
  0x51   : > { %v370_v32 = vld [vmem:[%s2208_s26 + $0x300] sm:$0xf]  ;;  %v372_v33 = vld [vmem:[%s2208_s26 + $0x308] sm:$0xf]  ;;  %369 = vst [vmem:[%s2215_s27 + $0x17c] sm:$0xf] %v368_v31 }
  0x52   : > { %371 = vst [vmem:[%s2215_s27 + $0x180] sm:$0xf] %v370_v32  ;;  %373 = vst [vmem:[%s2215_s27 + $0x184] sm:$0xf] %v372_v33  ;;  %v374_v34 = vld [vmem:[%s2208_s26 + $0x310] sm:$0xf] }
  0x53   : > { %v376_v35 = vld [vmem:[%s2208_s26 + $0x318] sm:$0xf]  ;;  %v378_v36 = vld [vmem:[%s2208_s26 + $0x320] sm:$0xf]  ;;  %375 = vst [vmem:[%s2215_s27 + $0x188] sm:$0xf] %v374_v34 }
  0x54   : > { %377 = vst [vmem:[%s2215_s27 + $0x18c] sm:$0xf] %v376_v35  ;;  %379 = vst [vmem:[%s2215_s27 + $0x190] sm:$0xf] %v378_v36  ;;  %v380_v37 = vld [vmem:[%s2208_s26 + $0x328] sm:$0xf] }
  0x55   : > { %v382_v38 = vld [vmem:[%s2208_s26 + $0x330] sm:$0xf]  ;;  %v384_v39 = vld [vmem:[%s2208_s26 + $0x338] sm:$0xf]  ;;  %381 = vst [vmem:[%s2215_s27 + $0x194] sm:$0xf] %v380_v37 }
  0x56   : > { %383 = vst [vmem:[%s2215_s27 + $0x198] sm:$0xf] %v382_v38  ;;  %385 = vst [vmem:[%s2215_s27 + $0x19c] sm:$0xf] %v384_v39  ;;  %v386_v40 = vld [vmem:[%s2208_s26 + $0x340] sm:$0xf] }
  0x57   : > { %v388_v41 = vld [vmem:[%s2208_s26 + $0x348] sm:$0xf]  ;;  %v390_v42 = vld [vmem:[%s2208_s26 + $0x350] sm:$0xf]  ;;  %387 = vst [vmem:[%s2215_s27 + $0x1a0] sm:$0xf] %v386_v40 }
  0x58   : > { %389 = vst [vmem:[%s2215_s27 + $0x1a4] sm:$0xf] %v388_v41  ;;  %391 = vst [vmem:[%s2215_s27 + $0x1a8] sm:$0xf] %v390_v42  ;;  %v392_v43 = vld [vmem:[%s2208_s26 + $0x358] sm:$0xf] }
  0x59   : > { %v394_v44 = vld [vmem:[%s2208_s26 + $0x360] sm:$0xf]  ;;  %v396_v45 = vld [vmem:[%s2208_s26 + $0x368] sm:$0xf]  ;;  %393 = vst [vmem:[%s2215_s27 + $0x1ac] sm:$0xf] %v392_v43 }
  0x5a   : > { %395 = vst [vmem:[%s2215_s27 + $0x1b0] sm:$0xf] %v394_v44  ;;  %397 = vst [vmem:[%s2215_s27 + $0x1b4] sm:$0xf] %v396_v45  ;;  %v398_v46 = vld [vmem:[%s2208_s26 + $0x370] sm:$0xf] }
  0x5b   : > { %v400_v47 = vld [vmem:[%s2208_s26 + $0x378] sm:$0xf]  ;;  %v402_v48 = vld [vmem:[%s2208_s26 + $0x380] sm:$0xf]  ;;  %399 = vst [vmem:[%s2215_s27 + $0x1b8] sm:$0xf] %v398_v46 }
  0x5c   : > { %401 = vst [vmem:[%s2215_s27 + $0x1bc] sm:$0xf] %v400_v47  ;;  %403 = vst [vmem:[%s2215_s27 + $0x1c0] sm:$0xf] %v402_v48  ;;  %v404_v49 = vld [vmem:[%s2208_s26 + $0x388] sm:$0xf] }
  0x5d   : > { %v406_v50 = vld [vmem:[%s2208_s26 + $0x390] sm:$0xf]  ;;  %v408_v51 = vld [vmem:[%s2208_s26 + $0x398] sm:$0xf]  ;;  %405 = vst [vmem:[%s2215_s27 + $0x1c4] sm:$0xf] %v404_v49 }
  0x5e   : > { %407 = vst [vmem:[%s2215_s27 + $0x1c8] sm:$0xf] %v406_v50  ;;  %409 = vst [vmem:[%s2215_s27 + $0x1cc] sm:$0xf] %v408_v51  ;;  %v410_v52 = vld [vmem:[%s2208_s26 + $0x3a0] sm:$0xf] }
  0x5f   : > { %v412_v53 = vld [vmem:[%s2208_s26 + $0x3a8] sm:$0xf]  ;;  %v414_v54 = vld [vmem:[%s2208_s26 + $0x3b0] sm:$0xf]  ;;  %411 = vst [vmem:[%s2215_s27 + $0x1d0] sm:$0xf] %v410_v52 }
  0x60   : > { %413 = vst [vmem:[%s2215_s27 + $0x1d4] sm:$0xf] %v412_v53  ;;  %415 = vst [vmem:[%s2215_s27 + $0x1d8] sm:$0xf] %v414_v54  ;;  %v416_v55 = vld [vmem:[%s2208_s26 + $0x3b8] sm:$0xf] }
  0x61   : > { %v418_v56 = vld [vmem:[%s2208_s26 + $0x3c0] sm:$0xf]  ;;  %v420_v57 = vld [vmem:[%s2208_s26 + $0x3c8] sm:$0xf]  ;;  %417 = vst [vmem:[%s2215_s27 + $0x1dc] sm:$0xf] %v416_v55 }
  0x62   : > { %419 = vst [vmem:[%s2215_s27 + $0x1e0] sm:$0xf] %v418_v56  ;;  %421 = vst [vmem:[%s2215_s27 + $0x1e4] sm:$0xf] %v420_v57  ;;  %v422_v58 = vld [vmem:[%s2208_s26 + $0x3d0] sm:$0xf] }
  0x63   : > { %v424_v59 = vld [vmem:[%s2208_s26 + $0x3d8] sm:$0xf]  ;;  %v426_v60 = vld [vmem:[%s2208_s26 + $0x3e0] sm:$0xf]  ;;  %423 = vst [vmem:[%s2215_s27 + $0x1e8] sm:$0xf] %v422_v58 }
  0x64   : > { %425 = vst [vmem:[%s2215_s27 + $0x1ec] sm:$0xf] %v424_v59  ;;  %427 = vst [vmem:[%s2215_s27 + $0x1f0] sm:$0xf] %v426_v60  ;;  %v428_v61 = vld [vmem:[%s2208_s26 + $0x3e8] sm:$0xf] }
  0x65   : > { %v430_v62 = vld [vmem:[%s2208_s26 + $0x3f0] sm:$0xf]  ;;  %v432_v63 = vld [vmem:[%s2208_s26 + $0x3f8] sm:$0xf]  ;;  %429 = vst [vmem:[%s2215_s27 + $0x1f4] sm:$0xf] %v428_v61 }
  0x66   : > { %431 = vst [vmem:[%s2215_s27 + $0x1f8] sm:$0xf] %v430_v62  ;;  %433 = vst [vmem:[%s2215_s27 + $0x1fc] sm:$0xf] %v432_v63  ;;  %v434_v0 = vld [vmem:[%s2208_s26 + $0x400] sm:$0xf] }
  0x67   : > { %v436_v1 = vld [vmem:[%s2208_s26 + $0x408] sm:$0xf]  ;;  %v438_v2 = vld [vmem:[%s2208_s26 + $0x410] sm:$0xf]  ;;  %435 = vst [vmem:[%s2215_s27 + $0x200] sm:$0xf] %v434_v0 }
  0x68   : > { %437 = vst [vmem:[%s2215_s27 + $0x204] sm:$0xf] %v436_v1  ;;  %439 = vst [vmem:[%s2215_s27 + $0x208] sm:$0xf] %v438_v2  ;;  %v440_v3 = vld [vmem:[%s2208_s26 + $0x418] sm:$0xf] }
  0x69   : > { %v442_v4 = vld [vmem:[%s2208_s26 + $0x420] sm:$0xf]  ;;  %v444_v5 = vld [vmem:[%s2208_s26 + $0x428] sm:$0xf]  ;;  %441 = vst [vmem:[%s2215_s27 + $0x20c] sm:$0xf] %v440_v3 }
  0x6a   : > { %443 = vst [vmem:[%s2215_s27 + $0x210] sm:$0xf] %v442_v4  ;;  %445 = vst [vmem:[%s2215_s27 + $0x214] sm:$0xf] %v444_v5  ;;  %v446_v6 = vld [vmem:[%s2208_s26 + $0x430] sm:$0xf] }
  0x6b   : > { %v448_v7 = vld [vmem:[%s2208_s26 + $0x438] sm:$0xf]  ;;  %v450_v8 = vld [vmem:[%s2208_s26 + $0x440] sm:$0xf]  ;;  %447 = vst [vmem:[%s2215_s27 + $0x218] sm:$0xf] %v446_v6 }
  0x6c   : > { %449 = vst [vmem:[%s2215_s27 + $0x21c] sm:$0xf] %v448_v7  ;;  %451 = vst [vmem:[%s2215_s27 + $0x220] sm:$0xf] %v450_v8  ;;  %v452_v9 = vld [vmem:[%s2208_s26 + $0x448] sm:$0xf] }
  0x6d   : > { %v454_v10 = vld [vmem:[%s2208_s26 + $0x450] sm:$0xf]  ;;  %v456_v11 = vld [vmem:[%s2208_s26 + $0x458] sm:$0xf]  ;;  %453 = vst [vmem:[%s2215_s27 + $0x224] sm:$0xf] %v452_v9 }
  0x6e   : > { %455 = vst [vmem:[%s2215_s27 + $0x228] sm:$0xf] %v454_v10  ;;  %457 = vst [vmem:[%s2215_s27 + $0x22c] sm:$0xf] %v456_v11  ;;  %v458_v12 = vld [vmem:[%s2208_s26 + $0x460] sm:$0xf] }
  0x6f   : > { %v460_v13 = vld [vmem:[%s2208_s26 + $0x468] sm:$0xf]  ;;  %v462_v14 = vld [vmem:[%s2208_s26 + $0x470] sm:$0xf]  ;;  %459 = vst [vmem:[%s2215_s27 + $0x230] sm:$0xf] %v458_v12 }
  0x70   : > { %461 = vst [vmem:[%s2215_s27 + $0x234] sm:$0xf] %v460_v13  ;;  %463 = vst [vmem:[%s2215_s27 + $0x238] sm:$0xf] %v462_v14  ;;  %v464_v15 = vld [vmem:[%s2208_s26 + $0x478] sm:$0xf] }
  0x71   : > { %465 = vst [vmem:[%s2215_s27 + $0x23c] sm:$0xf] %v464_v15 }
  0x72 PF: > { %p1775_p6 = scmp.ge.s32.totalorder %s2141_s16, 1  ;;  %p781_p7 = scmp.lt.s32.totalorder %s2141_s16, 3 }
  0x74   : > { %p782_p8 = pnand %p1775_p6, %p781_p7 }
  0x75   : > { %s788_s28 = sand.u32 (!%p782_p8), 1, %s2125_s12   ;;  %v2506_v16 = vld [vmem:[%s2643_s0] sm:$0xff] (!%p782_p8)  ;;  %v2511_v17 = vld [vmem:[%s2643_s0 + $0x8] sm:$0xff] (!%p782_p8)  ;;  %v2549_v47 = vld [vmem:[%s2643_s0 + $0x10] sm:$0xff] (!%p782_p8)  ;;  %vm2144_vm0 = vmmov (!%p782_p8), 0   ;;  %p827_p9 = scmp.lt.s32.totalorder (!%p782_p8), %s2133_s14, 1 }
  0x76   : > { %785 = sbr.rel (%p782_p8) target bundleno = 436 (0x1b4), region = 69  ;;  %v1779_v18 = vcombine.high (!%p782_p8), %v2506_v16, %v2506_v16  ;;  %v1781_v19 = vcombine.high (!%p782_p8), %v2511_v17, %v2511_v17  ;;  %v2556_v50 = vld [vmem:[%s2643_s0 + $0x18] sm:$0xff] (!%p782_p8)  ;;  %v1778_v53 = vcombine.low (!%p782_p8), %v2506_v16, %v2506_v16  ;;  %v1783_v55 = vcombine.high (!%p782_p8), %v2549_v47, %v2549_v47 }
  0x77   : > { %s1979_s6 = smul.u32 (!%p782_p8), 576, %s788_s28  ;;  %v1780_v57 = vcombine.low (!%p782_p8), %v2511_v17, %v2511_v17  ;;  %v1785_v59 = vcombine.high (!%p782_p8), %v2556_v50, %v2556_v50 }
  0x78   : > { %1491 = vmatprep.mubr.bf16.mxu0 (!%p782_p8), %v1779_v18  ;;  %1531 = vmatprep.mubr.bf16.mxu1 (!%p782_p8), %v1781_v19 }
  0x79   : > { %s2517_s7 = scalar_lea.vmem (!%p782_p8), [#allocation2], %s1979_s6 }
  0x7a   : > { %v2022_v20 = vld [vmem:[%s2517_s7 + $0x40] sm:$0xff] (!%p782_p8)   ;;  %v2026_v24 = vld [vmem:[%s2517_s7 + $0x48] sm:$0xff] (!%p782_p8)   ;;  %v2030_v28 = vld [vmem:[%s2517_s7 + $0x50] sm:$0xff] (!%p782_p8)  }
  0x7b   : > { %v2023_v21 = vld [vmem:[%s2517_s7] sm:$0xff] (!%p782_p8)   ;;  %1861 = vmatprep.subr.bf16.mxu0 (!%p782_p8), %v2022_v20  ;;  %v2027_v25 = vld [vmem:[%s2517_s7 + $0x8] sm:$0xff] (!%p782_p8)   ;;  %v2031_v29 = vld [vmem:[%s2517_s7 + $0x10] sm:$0xff] (!%p782_p8)  }
  0x7c   : > { %v2024_v22 = vld [vmem:[%s2517_s7 + $0xc0] sm:$0xff] (!%p782_p8)   ;;  %1862 = vmatpush3.bf16.msra.mxu0 (!%p782_p8), %v2023_v21  ;;  %v2028_v26 = vld [vmem:[%s2517_s7 + $0xc8] sm:$0xff] (!%p782_p8)   ;;  %v2032_v30 = vld [vmem:[%s2517_s7 + $0xd0] sm:$0xff] (!%p782_p8)  }
  0x7d   : > { %v2025_v23 = vld [vmem:[%s2517_s7 + $0x80] sm:$0xff]   ;;  %1883 = vmatprep.subr.bf16.mxu1 %v2024_v22  ;;  %1863 = vmatprep.subr.bf16.mxu0 %v2026_v24  ;;  %v2029_v27 = vld [vmem:[%s2517_s7 + $0x88] sm:$0xff]   ;;  %v2033_v31 = vld [vmem:[%s2517_s7 + $0x90] sm:$0xff]   ;;  %s2654_s14 = smov (!%p827_p9, %s2133_s14), 1 }
  0x7e   : > { %1884 = vmatpush3.bf16.msra.mxu1 %v2025_v23  ;;  %v2034_v32 = vld [vmem:[%s2517_s7 + $0x58] sm:$0xff]   ;;  %v2038_v36 = vld [vmem:[%s2517_s7 + $0x60] sm:$0xff]   ;;  %v2042_v40 = vld [vmem:[%s2517_s7 + $0x68] sm:$0xff]   ;;  %s829_s22 = scalar_lea.vmem %s2645_s2, %s2654_s14  ;;  %s1776_s23 = sshll.u32 %s2654_s14, 3 }
  0x7f   : > { %1885 = vmatprep.subr.bf16.mxu1 %v2028_v26  ;;  %v2035_v33 = vld [vmem:[%s2517_s7 + $0x18] sm:$0xff]   ;;  %v2039_v37 = vld [vmem:[%s2517_s7 + $0x20] sm:$0xff]   ;;  %v2043_v41 = vld [vmem:[%s2517_s7 + $0x28] sm:$0xff]   ;;  %s837_s26 = scalar_lea.vmem %s2646_s3, %s1776_s23 }
  0x80   : > { %1864 = vmatpush3.bf16.msra.mxu0 %v2027_v25  ;;  %v2036_v34 = vld [vmem:[%s2517_s7 + $0xd8] sm:$0xff]   ;;  %v2040_v38 = vld [vmem:[%s2517_s7 + $0xe0] sm:$0xff]   ;;  %v2044_v42 = vld [vmem:[%s2517_s7 + $0xe8] sm:$0xff]   ;;  %v1782_v25 = vcombine.low %v2549_v47, %v2549_v47 }
  0x81   : > { %1865 = vmatprep.subr.bf16.mxu0 %v2030_v28  ;;  %v2037_v35 = vld [vmem:[%s2517_s7 + $0x98] sm:$0xff]   ;;  %v2041_v39 = vld [vmem:[%s2517_s7 + $0xa0] sm:$0xff]   ;;  %v2045_v43 = vld [vmem:[%s2517_s7 + $0xa8] sm:$0xff]   ;;  %v1784_v28 = vcombine.low %v2556_v50, %v2556_v50 }
  0x82   : > { %1886 = vmatpush3.bf16.msra.mxu1 %v2029_v27  ;;  %v2046_v44 = vld [vmem:[%s2517_s7 + $0x70] sm:$0xff]   ;;  %v2050_v49 = vld [vmem:[%s2517_s7 + $0x78] sm:$0xff]   ;;  %v2056_v56 = vld [vmem:[%s2517_s7 + $0x140] sm:$0xff]   ;;  %v2143_v27 = vmov 0.0  }
  0x83   : > { %1887 = vmatprep.subr.bf16.mxu1 %v2032_v30  ;;  %v2047_v45 = vld [vmem:[%s2517_s7 + $0x30] sm:$0xff]   ;;  %v2051_v51 = vld [vmem:[%s2517_s7 + $0x38] sm:$0xff]   ;;  %v2059_v58 = vld [vmem:[%s2517_s7 + $0x100] sm:$0xff]  }
  0x84   : > { %1866 = vmatpush3.bf16.msra.mxu0 %v2031_v29  ;;  %v2048_v46 = vld [vmem:[%s2517_s7 + $0xf0] sm:$0xff]   ;;  %v2052_v52 = vld [vmem:[%s2517_s7 + $0xf8] sm:$0xff]   ;;  %v2060_v60 = vld [vmem:[%s2517_s7 + $0x1c0] sm:$0xff]  }
  0x85   : > { %1867 = vmatprep.subr.bf16.mxu0 %v2034_v32  ;;  %v2049_v48 = vld [vmem:[%s2517_s7 + $0xb0] sm:$0xff]   ;;  %v2055_v54 = vld [vmem:[%s2517_s7 + $0xb8] sm:$0xff]   ;;  %v2061_v61 = vld [vmem:[%s2517_s7 + $0x180] sm:$0xff]  }
  0x86   : > { %1888 = vmatpush3.bf16.msra.mxu1 %v2033_v31  ;;  %v2062_v62 = vld [vmem:[%s2517_s7 + $0x148] sm:$0xff]   ;;  %v2066_v2 = vld [vmem:[%s2517_s7 + $0x150] sm:$0xff]   ;;  %v2070_v6 = vld [vmem:[%s2517_s7 + $0x158] sm:$0xff]  }
  0x87   : > { %1889 = vmatprep.subr.bf16.mxu1 %v2036_v34  ;;  %v2063_v63 = vld [vmem:[%s2517_s7 + $0x108] sm:$0xff]   ;;  %v2067_v3 = vld [vmem:[%s2517_s7 + $0x110] sm:$0xff]   ;;  %v2071_v7 = vld [vmem:[%s2517_s7 + $0x118] sm:$0xff]  }
  0x88   : > { %1868 = vmatpush3.bf16.msra.mxu0 %v2035_v33  ;;  %v2064_v0 = vld [vmem:[%s2517_s7 + $0x1c8] sm:$0xff]   ;;  %v2068_v4 = vld [vmem:[%s2517_s7 + $0x1d0] sm:$0xff]   ;;  %v2072_v8 = vld [vmem:[%s2517_s7 + $0x1d8] sm:$0xff]  }
  0x89   : > { %1869 = vmatprep.subr.bf16.mxu0 %v2038_v36  ;;  %v2065_v1 = vld [vmem:[%s2517_s7 + $0x188] sm:$0xff]   ;;  %v2069_v5 = vld [vmem:[%s2517_s7 + $0x190] sm:$0xff]   ;;  %v2073_v9 = vld [vmem:[%s2517_s7 + $0x198] sm:$0xff]  }
  0x8a   : > { %1890 = vmatpush3.bf16.msra.mxu1 %v2037_v35  ;;  %v2074_v10 = vld [vmem:[%s2517_s7 + $0x160] sm:$0xff]   ;;  %v2078_v14 = vld [vmem:[%s2517_s7 + $0x168] sm:$0xff]   ;;  %v2082_v18 = vld [vmem:[%s2517_s7 + $0x170] sm:$0xff]  }
  0x8b   : > { %1891 = vmatprep.subr.bf16.mxu1 %v2040_v38  ;;  %v2075_v11 = vld [vmem:[%s2517_s7 + $0x120] sm:$0xff]   ;;  %v2079_v15 = vld [vmem:[%s2517_s7 + $0x128] sm:$0xff]   ;;  %v2083_v19 = vld [vmem:[%s2517_s7 + $0x130] sm:$0xff]  }
  0x8c   : > { %1870 = vmatpush3.bf16.msra.mxu0 %v2039_v37  ;;  %v2076_v12 = vld [vmem:[%s2517_s7 + $0x1e0] sm:$0xff]   ;;  %v2080_v16 = vld [vmem:[%s2517_s7 + $0x1e8] sm:$0xff]   ;;  %v2084_v20 = vld [vmem:[%s2517_s7 + $0x1f0] sm:$0xff]  }
  0x8d   : > { %1871 = vmatprep.subr.bf16.mxu0 %v2042_v40  ;;  %v2077_v13 = vld [vmem:[%s2517_s7 + $0x1a0] sm:$0xff]   ;;  %v2081_v17 = vld [vmem:[%s2517_s7 + $0x1a8] sm:$0xff]   ;;  %v2085_v21 = vld [vmem:[%s2517_s7 + $0x1b0] sm:$0xff]  }
  0x8e   : > { %1892 = vmatpush3.bf16.msra.mxu1 %v2041_v39  ;;  %v2086_v22 = vld [vmem:[%s2517_s7 + $0x178] sm:$0xff]   ;;  %v2094_v29 = vld [vmem:[%s2517_s7 + $0x200] sm:$0xff]   ;;  %v2095_v30 = vld [vmem:[%s2517_s7 + $0x208] sm:$0xff]  }
  0x8f   : > { %1893 = vmatprep.subr.bf16.mxu1 %v2044_v42  ;;  %v2087_v23 = vld [vmem:[%s2517_s7 + $0x138] sm:$0xff]   ;;  %v2096_v31 = vld [vmem:[%s2517_s7 + $0x210] sm:$0xff]   ;;  %v2098_v33 = vld [vmem:[%s2517_s7 + $0x220] sm:$0xff]  }
  0x90   : > { %1872 = vmatpush3.bf16.msra.mxu0 %v2043_v41  ;;  %v2088_v24 = vld [vmem:[%s2517_s7 + $0x1f8] sm:$0xff]   ;;  %v2099_v34 = vld [vmem:[%s2517_s7 + $0x228] sm:$0xff]   ;;  %v2100_v35 = vld [vmem:[%s2517_s7 + $0x230] sm:$0xff]  }
  0x91   : > { %1873 = vmatprep.subr.bf16.mxu0 %v2046_v44  ;;  %v2091_v26 = vld [vmem:[%s2517_s7 + $0x1b8] sm:$0xff]   ;;  %v2102_v37 = vld [vmem:[%s2643_s0 + $0x20] ss:$0 sps:$4 sm:$0xff]  }
  0x92   : > { %1894 = vmatpush3.bf16.msra.mxu1 %v2045_v43  ;;  %v2097_v32 = vld [vmem:[%s2517_s7 + $0x218] sm:$0xff]   ;;  %v1777_v39 = vld [vmem:[%s829_s22] ss:$0 sm:$0xff] }
  0x93   : > { %1895 = vmatprep.subr.bf16.mxu1 %v2048_v46  ;;  %v2101_v36 = vld [vmem:[%s2517_s7 + $0x238] sm:$0xff]  }
  0x94   : > { %1874 = vmatpush3.bf16.msra.mxu0 %v2047_v45 }
  0x95   : > { %1875 = vmatprep.subr.bf16.mxu0 %v2050_v49 }
  0x96   : > { %1896 = vmatpush3.bf16.msra.mxu1 %v2049_v48 }
  0x97   : > { %1897 = vmatprep.subr.bf16.mxu1 %v2052_v52 }
  0x98   : > { %1876 = vmatpush3.bf16.msra.mxu0 %v2051_v51 }
  0x99   : > { %1905 = vmatprep.subr.bf16.mxu0 %v2056_v56 }
  0x9a   : > { %1898 = vmatpush3.bf16.msra.mxu1 %v2055_v54 }
  0x9b   : > { %1492 = vmatmul.mubr.bf16.vlgmr.msra.gmra.mrb[0].mxu0 %v1778_v53  ;;  %1927 = vmatprep.subr.bf16.mxu1 %v2060_v60 }
  0x9c   : > { %1906 = vmatpush3.bf16.msra.mxu0 %v2059_v58  ;;  %1571 = vmatprep.mubr.bf16.mxu0 %v1783_v55 }
  0x9d   : > { %1532 = vmatmul.mubr.bf16.vlgmr.msra.gmra.mrb[0].mxu1 %v1780_v57  ;;  %1907 = vmatprep.subr.bf16.mxu0 %v2062_v62 }
  0x9e   : > { %1928 = vmatpush3.bf16.msra.mxu1 %v2061_v61  ;;  %1611 = vmatprep.mubr.bf16.mxu1 %v1785_v59 }
  0x9f   : > { %1929 = vmatprep.subr.bf16.mxu1 %v2064_v0 }
  0xa0   : > { %1908 = vmatpush3.bf16.msra.mxu0 %v2063_v63 }
  0xa1   : > { %1909 = vmatprep.subr.bf16.mxu0 %v2066_v2 }
  0xa2   : > { %1930 = vmatpush3.bf16.msra.mxu1 %v2065_v1 }
  0xa3   : > { %1931 = vmatprep.subr.bf16.mxu1 %v2068_v4 }
  0xa4   : > { %1910 = vmatpush3.bf16.msra.mxu0 %v2067_v3 }
  0xa5   : > { %1911 = vmatprep.subr.bf16.mxu0 %v2070_v6 }
  0xa6   : > { %1932 = vmatpush3.bf16.msra.mxu1 %v2069_v5 }
  0xa7   : > { %1933 = vmatprep.subr.bf16.mxu1 %v2072_v8 }
  0xa8   : > { %1912 = vmatpush3.bf16.msra.mxu0 %v2071_v7 }
  0xa9   : > { %1913 = vmatprep.subr.bf16.mxu0 %v2074_v10 }
  0xaa   : > { %1934 = vmatpush3.bf16.msra.mxu1 %v2073_v9 }
  0xab   : > { %1935 = vmatprep.subr.bf16.mxu1 %v2076_v12 }
  0xac   : > { %1914 = vmatpush3.bf16.msra.mxu0 %v2075_v11 }
  0xad   : > { %1915 = vmatprep.subr.bf16.mxu0 %v2078_v14 }
  0xae   : > { %1936 = vmatpush3.bf16.msra.mxu1 %v2077_v13 }
  0xaf   : > { %1937 = vmatprep.subr.bf16.mxu1 %v2080_v16 }
  0xb0   : > { %1916 = vmatpush3.bf16.msra.mxu0 %v2079_v15 }
  0xb1   : > { %1917 = vmatprep.subr.bf16.mxu0 %v2082_v18 }
  0xb2   : > { %1938 = vmatpush3.bf16.msra.mxu1 %v2081_v17 }
  0xb3   : > { %1939 = vmatprep.subr.bf16.mxu1 %v2084_v20 }
  0xb4   : > { %1918 = vmatpush3.bf16.msra.mxu0 %v2083_v19 }
  0xb5   : > { %1919 = vmatprep.subr.bf16.mxu0 %v2086_v22 }
  0xb6   : > { %1940 = vmatpush3.bf16.msra.mxu1 %v2085_v21 }
  0xb7   : > { %1941 = vmatprep.subr.bf16.mxu1 %v2088_v24 }
  0xb8   : > { %1920 = vmatpush3.bf16.msra.mxu0 %v2087_v23 }
  0xb9   : > { %1958 = vmatprep.subr.bf16.mxu0 %v2143_v27 }
  0xba   : > { %1942 = vmatpush3.bf16.msra.mxu1 %v2091_v26 }
  0xbb   : > { %1572 = vmatmul.mubr.bf16.vlgmr.msra.gmra.mrb[4].mxu0 %v1782_v25 }
  0xbc   : > { %1959 = vmatpush3.bf16.msra.mxu0 %v2094_v29  ;;  %1974 = vmatprep.mubr.msk.bf16.mxu0 %vm2144_vm0, %v2143_v27 }
  0xbd   : > { %1612 = vmatmul.mubr.bf16.vlgmr.msra.gmra.mrb[4].mxu1 %v1784_v28  ;;  %1960 = vmatprep.subr.bf16.mxu0 %v2143_v27 }
  0xc0   : > { %1961 = vmatpush3.bf16.msra.mxu0 %v2095_v30 }
  0xc1   : > { %1962 = vmatprep.subr.bf16.mxu0 %v2143_v27 }
  0xc4   : > { %1963 = vmatpush3.bf16.msra.mxu0 %v2096_v31 }
  0xc5   : > { %1964 = vmatprep.subr.bf16.mxu0 %v2143_v27 }
  0xc8   : > { %1965 = vmatpush3.bf16.msra.mxu0 %v2097_v32 }
  0xc9   : > { %1966 = vmatprep.subr.bf16.mxu0 %v2143_v27 }
  0xcc   : > { %1967 = vmatpush3.bf16.msra.mxu0 %v2098_v33 }
  0xcd   : > { %1968 = vmatprep.subr.bf16.mxu0 %v2143_v27 }
  0xd0   : > { %1969 = vmatpush3.bf16.msra.mxu0 %v2099_v34 }
  0xd1   : > { %1970 = vmatprep.subr.bf16.mxu0 %v2143_v27 }
  0xd4   : > { %1971 = vmatpush3.bf16.msra.mxu0 %v2100_v35 }
  0xd5   : > { %1972 = vmatprep.subr.bf16.mxu0 %v2143_v27 }
  0xd8   : > { %1973 = vmatpush3.bf16.msra.mxu0 %v2101_v36 }
  0xdb   : > { %1975 = vmatmul.mubr.bf16.vlgmr.msra.gmra.mrb[8].mxu0 %v2102_v37 }
 0x16e   : > { %v1877_v38 = vpop.f32.mrb[0].mxu0 }
 0x16f   : > { %v1878_v40 = vpop.f32.mrb[1].mxu0 }
 0x170   : > { %v1879_v41 = vadd.f32 %v1878_v40, %v1877_v38  ;;  %v1880_v42 = vpop.f32.mrb[2].mxu0  ;;  %v1899_v43 = vpop.f32.mrb[0].mxu1 }
 0x171   : > { %v1881_v44 = vpop.f32.mrb[3].mxu0  ;;  %v1900_v45 = vpop.f32.mrb[1].mxu1 }
 0x172   : > { %v1494_v46 = vadd.f32 %v1879_v41, %v1777_v39  ;;  %v1901_v47 = vadd.f32 %v1900_v45, %v1899_v43  ;;  %v1902_v48 = vpop.f32.mrb[2].mxu1 }
 0x173   : > { %v1903_v49 = vpop.f32.mrb[3].mxu1 }
 0x174   : > { %v1534_v50 = vadd.f32 %v1901_v47, %v1494_v46 }
 0x18e   : > { %v1921_v51 = vpop.f32.mrb[4].mxu0 }
 0x18f   : > { %v1922_v52 = vpop.f32.mrb[5].mxu0 }
 0x190   : > { %v1923_v53 = vadd.f32 %v1922_v52, %v1921_v51  ;;  %v1924_v54 = vpop.f32.mrb[6].mxu0  ;;  %v1943_v55 = vpop.f32.mrb[4].mxu1 }
 0x191   : > { %v1925_v56 = vpop.f32.mrb[7].mxu0  ;;  %v1944_v57 = vpop.f32.mrb[5].mxu1 }
 0x192   : > { %v1574_v58 = vadd.f32 %v1923_v53, %v1534_v50  ;;  %v1945_v59 = vadd.f32 %v1944_v57, %v1943_v55  ;;  %v1946_v60 = vpop.f32.mrb[6].mxu1 }
 0x193   : > { %v1947_v61 = vpop.f32.mrb[7].mxu1 }
 0x194   : > { %v1614_v62 = vadd.f32 %v1945_v59, %v1574_v58 }
 0x1ae   : > { %v1653_v63 = vpop.f32.mrb[8].mxu0 }
 0x1af   : > { %v1654_v0 = vadd.f32 %v1653_v63, %v1614_v62  ;;  %v1976_v1 = vpop.f32.mrb[9].mxu0 }
 0x1b0   : > { %v1656_v2 = vpop.f32.mrb[10].mxu0 }
 0x1b1   : > { %v1659_v3 = vmax.f32 %v1654_v0, 0.0  ;;  %v1977_v4 = vpop.f32.mrb[11].mxu0 }
 0x1b3   : > { %1660 = vst [vmem:[%s837_s26] sm:$0xff] %v1659_v3 }
 0x1b4 PF: > { %s13_s16 = sadd.s32 1, %s2141_s16   ;;  %s2647_s12 = smov %s2129_s13 }
 0x1b5   : > { %p10_p10 = scmp.ge.s32.totalorder %s13_s16, 4   ;;  %s2648_s13 = smov %s2200_s20 }
 0x1b6   : > { %s2649_s14 = smov %s2137_s15  ;;  %s2650_s15 = smov %s2652_s17 }
 0x1b7   :  { %12 = sbr.rel (!%p10_p10) target bundleno = 3 (0x3), region = 114 }

</bundles_post_ra>
